<compile_context>
chip_gen: v7x
topology: tpu7x:2x2x1
jax: 0.10.0
libtpu: 0.0.40
codegen_flags: <defaults>
</compile_context>

<pallas_src>
import math
from functools import partial

import jax
import jax.numpy as jnp
from jax import lax
from jax.experimental import pallas as pl
from jax.experimental.pallas import tpu as pltpu

PRIOR_MU = 0.0
PRIOR_SIGMA = 1.0
POSTERIOR_MU_INIT = 0.0
POSTERIOR_RHO_INIT = -3.0

_LANE = 128                      # lane-dense padding for last_pos / decoder output
_VMEM_LIMIT = 32 * 1024 * 1024   # safe on v5e/v6e/v7x; actual use is ~1.5 MiB


# ---------------------------------------------------------------------------
# Fused encoder + decoder kernel.  grid = (num_mc,); everything else in-kernel.
# ---------------------------------------------------------------------------

def _encdec_kernel(training, in_size, E, H,
                   x_ref,            # (Tobs, B, in)        shared across MC samples
                   wemb_e_ref,       # (1, in, E)           per-MC encoder embedding sample
                   bemb_e_ref,       # (1, 1, E)
                   mu1_ref,          # (E+H, 4H)            lane-dense lstm1 [ih|hh] mu
                   sig1_ref,         # (E+H, 4H)            softplus(rho), precomputed
                   eps1_ref,         # (1, Tobs, E+H, 4H)   per-MC per-step eps
                   b1_ref,           # (1, Tobs, 1, 4H)     per-MC per-step sampled bias
                   wemb_d_ref,       # (1, Tpred, LANE, E)  per-step embedding sample (rows >= in are 0)
                   bemb_d_ref,       # (1, Tpred, 1, E)
                   mu2_ref,          # (E+H, 4H)
                   sig2_ref,         # (E+H, 4H)
                   eps2_ref,         # (1, Tpred, E+H, 4H)
                   b2_ref,           # (1, Tpred, 1, 4H)
                   wdec_ref,         # (1, Tpred, H, LANE)  per-step decoder sample (cols >= O are 0)
                   bdec_ref,         # (1, Tpred, 1, LANE)
                   lp0_ref,          # (B, LANE)            x_last, zero-padded
                   y_ref,            # (Tpred, B, LANE)     teacher-forcing targets, zero-padded
                   out_ref):         # (1, Tpred, B, LANE)  [pred_pos | sigma | 0-pad]
    Tobs, B, _ = x_ref.shape
    Tpred = out_ref.shape[1]
    lanes = out_ref.shape[3]

    def cell(emb, h, c, w, b):
        # two lane-dense dots instead of concat([emb, h]) at a sub-128-lane offset
        gates = (jnp.dot(emb, w[:E, :], preferred_element_type=jnp.float32)
                 + jnp.dot(h, w[E:, :], preferred_element_type=jnp.float32)
                 + b)
        sg = jax.nn.sigmoid(gates)        # one EUP pass over the full (B, 4H) tile
        tg = jnp.tanh(gates)              # one EUP pass
        i_t = sg[:, 0 * H:1 * H]
        f_t = sg[:, 1 * H:2 * H]
        g_t = tg[:, 2 * H:3 * H]
        o_t = sg[:, 3 * H:4 * H]
        c_new = f_t * c + i_t * g_t
        h_new = o_t * jnp.tanh(c_new)
        return h_new, c_new

    # ----------------------- encoder: embedding + lstm1 -----------------------
    w_emb = wemb_e_ref[0]                 # (in, E) — sampled once per MC run
    b_emb = bemb_e_ref[0]                 # (1, E)
    mu1 = mu1_ref[...]
    sig1 = sig1_ref[...]

    h = jnp.zeros((B, H), jnp.float32)
    c = jnp.zeros((B, H), jnp.float32)
    for t in range(Tobs):                 # static full unroll (tiny trip count)
        emb = jnp.dot(x_ref[t], w_emb, preferred_element_type=jnp.float32) + b_emb
        w = mu1 + sig1 * eps1_ref[0, t]   # fresh LSTM weight sample per step
        h, c = cell(emb, h, c, w, b1_ref[0, t])

    # --------------- decoder: embedding + lstm2 + linear rollout ---------------
    mu2 = mu2_ref[...]
    sig2 = sig2_ref[...]
    lp_mask = (lax.broadcasted_iota(jnp.int32, (1, lanes), 1) < in_size
               ).astype(jnp.float32)

    lp = lp0_ref[...]                     # (B, LANE) lane-padded last_pos
    for t in range(Tpred):
        emb = (jnp.dot(lp, wemb_d_ref[0, t], preferred_element_type=jnp.float32)
               + bemb_d_ref[0, t])
        w = mu2 + sig2 * eps2_ref[0, t]
        h, c = cell(emb, h, c, w, b2_ref[0, t])
        dec = (jnp.dot(h, wdec_ref[0, t], preferred_element_type=jnp.float32)
               + bdec_ref[0, t])          # (B, LANE); cols >= O are exactly 0
        out_row = dec + lp                # cols [:2]=pred_pos, [2:O]=sigma, rest 0
        out_ref[0, t] = out_row           # full-lane, unmasked store
        if training:
            lp = y_ref[t]                 # teacher forcing
        else:
            lp = out_row * lp_mask        # autoregressive feedback (pos lanes only)


def fused_encdec(params, X_tbi, y_tbi, x_last, key, training, num_mc):
    sp = jax.nn.softplus
    p_emb, p1, p2, p_dec = (params['embedding'], params['lstm1'],
                            params['lstm2'], params['decoder'])
    Tobs, B, in_size = X_tbi.shape
    Tpred = y_tbi.shape[0]
    E = p_emb['mu_w'].shape[0]
    H = p1['hh']['mu_w'].shape[1]
    fourH = 4 * H
    EH = E + H
    O = p_dec['mu_w'].shape[0]

    k = jax.random.split(key, 12)

    # encoder embedding: sampled ONCE per MC run (LinearReparameterization(X))
    W_emb_e = jnp.swapaxes(
        p_emb['mu_w'][None] + sp(p_emb['rho_w'])[None]
        * jax.random.normal(k[0], (num_mc, E, in_size), jnp.float32), -1, -2)      # (mc, in, E)
    b_emb_e = (p_emb['mu_b'][None, None]
               + sp(p_emb['rho_b'])[None, None]
               * jax.random.normal(k[1], (num_mc, 1, E), jnp.float32))              # (mc, 1, E)

    # lstm1: lane-dense (E+H, 4H) mu/sigma; per-MC per-step eps / sampled bias
    mu1 = jnp.concatenate([p1['ih']['mu_w'], p1['hh']['mu_w']], axis=1).T           # (E+H, 4H)
    sig1 = jnp.concatenate([sp(p1['ih']['rho_w']), sp(p1['hh']['rho_w'])], axis=1).T
    eps1 = jax.random.normal(k[2], (num_mc, Tobs, EH, fourH), jnp.float32)
    b1 = ((p1['ih']['mu_b'] + p1['hh']['mu_b'])[None, None, None, :]
          + sp(p1['ih']['rho_b'])[None, None, None, :]
          * jax.random.normal(k[3], (num_mc, Tobs, 1, fourH), jnp.float32)
          + sp(p1['hh']['rho_b'])[None, None, None, :]
          * jax.random.normal(k[4], (num_mc, Tobs, 1, fourH), jnp.float32))

    # decoder embedding: resampled every step; rows padded to _LANE (zeros beyond in)
    W_ed = jnp.swapaxes(
        p_emb['mu_w'][None, None] + sp(p_emb['rho_w'])[None, None]
        * jax.random.normal(k[5], (num_mc, Tpred, E, in_size), jnp.float32), -1, -2)
    W_emb_d = jnp.zeros((num_mc, Tpred, _LANE, E), jnp.float32
                        ).at[:, :, :in_size, :].set(W_ed)
    b_emb_d = (p_emb['mu_b'][None, None, None]
               + sp(p_emb['rho_b'])[None, None, None]
               * jax.random.normal(k[6], (num_mc, Tpred, 1, E), jnp.float32))

    # lstm2
    mu2 = jnp.concatenate([p2['ih']['mu_w'], p2['hh']['mu_w']], axis=1).T
    sig2 = jnp.concatenate([sp(p2['ih']['rho_w']), sp(p2['hh']['rho_w'])], axis=1).T
    eps2 = jax.random.normal(k[7], (num_mc, Tpred, EH, fourH), jnp.float32)
    b2 = ((p2['ih']['mu_b'] + p2['hh']['mu_b'])[None, None, None, :]
          + sp(p2['ih']['rho_b'])[None, None, None, :]
          * jax.random.normal(k[8], (num_mc, Tpred, 1, fourH), jnp.float32)
          + sp(p2['hh']['rho_b'])[None, None, None, :]
          * jax.random.normal(k[9], (num_mc, Tpred, 1, fourH), jnp.float32))

    # decoder linear: resampled every step; columns padded to _LANE (zeros beyond O)
    Wd = jnp.swapaxes(
        p_dec['mu_w'][None, None] + sp(p_dec['rho_w'])[None, None]
        * jax.random.normal(k[10], (num_mc, Tpred, O, H), jnp.float32), -1, -2)     # (mc,T,H,O)
    W_dec = jnp.zeros((num_mc, Tpred, H, _LANE), jnp.float32).at[..., :O].set(Wd)
    bd = (p_dec['mu_b'][None, None, None]
          + sp(p_dec['rho_b'])[None, None, None]
          * jax.random.normal(k[11], (num_mc, Tpred, 1, O), jnp.float32))
    b_dec = jnp.zeros((num_mc, Tpred, 1, _LANE), jnp.float32).at[..., :O].set(bd)

    # lane-padded last_pos / teacher-forcing targets
    lp0 = jnp.zeros((B, _LANE), jnp.float32).at[:, :in_size].set(x_last)
    y_pad = jnp.zeros((Tpred, B, _LANE), jnp.float32).at[..., :in_size].set(y_tbi)
    # NOTE: in eval mode y_pad is never read in-kernel; it is a single tiny
    # constant-resident block (one DMA for the whole call), not a per-step stream.

    kernel = partial(_encdec_kernel, training, in_size, E, H)
    return pl.pallas_call(
        kernel,
        out_shape=jax.ShapeDtypeStruct((num_mc, Tpred, B, _LANE), jnp.float32),
        grid_spec=pltpu.PrefetchScalarGridSpec(
            num_scalar_prefetch=0,
            grid=(num_mc,),
            in_specs=[
                pl.BlockSpec((Tobs, B, in_size), lambda m: (0, 0, 0)),
                pl.BlockSpec((1, in_size, E), lambda m: (m, 0, 0)),
                pl.BlockSpec((1, 1, E), lambda m: (m, 0, 0)),
                pl.BlockSpec((EH, fourH), lambda m: (0, 0)),
                pl.BlockSpec((EH, fourH), lambda m: (0, 0)),
                pl.BlockSpec((1, Tobs, EH, fourH), lambda m: (m, 0, 0, 0)),
                pl.BlockSpec((1, Tobs, 1, fourH), lambda m: (m, 0, 0, 0)),
                pl.BlockSpec((1, Tpred, _LANE, E), lambda m: (m, 0, 0, 0)),
                pl.BlockSpec((1, Tpred, 1, E), lambda m: (m, 0, 0, 0)),
                pl.BlockSpec((EH, fourH), lambda m: (0, 0)),
                pl.BlockSpec((EH, fourH), lambda m: (0, 0)),
                pl.BlockSpec((1, Tpred, EH, fourH), lambda m: (m, 0, 0, 0)),
                pl.BlockSpec((1, Tpred, 1, fourH), lambda m: (m, 0, 0, 0)),
                pl.BlockSpec((1, Tpred, H, _LANE), lambda m: (m, 0, 0, 0)),
                pl.BlockSpec((1, Tpred, 1, _LANE), lambda m: (m, 0, 0, 0)),
                pl.BlockSpec((B, _LANE), lambda m: (0, 0)),
                pl.BlockSpec((Tpred, B, _LANE), lambda m: (0, 0, 0)),
            ],
            out_specs=pl.BlockSpec((1, Tpred, B, _LANE), lambda m: (m, 0, 0, 0)),
        ),
        compiler_params=pltpu.CompilerParams(
            dimension_semantics=("parallel",),   # MC samples are independent (v7x: 2 TCs)
            vmem_limit_bytes=_VMEM_LIMIT),
    )(X_tbi, W_emb_e, b_emb_e, mu1, sig1, eps1, b1,
      W_emb_d, b_emb_d, mu2, sig2, eps2, b2, W_dec, b_dec, lp0, y_pad)


# ---------------------------------------------------------------------------
# Parameter init (mirrors bayesian_torch: mu~N(mu_init,.1), rho~N(rho_init,.1))
# ---------------------------------------------------------------------------

def init_bayes_linear(key, in_f, out_f, mu_init, rho_init):
    k1, k2, k3, k4 = jax.random.split(key, 4)
    return {
        'mu_w': (mu_init + 0.1 * jax.random.normal(k1, (out_f, in_f))).astype(jnp.float32),
        'rho_w': (rho_init + 0.1 * jax.random.normal(k2, (out_f, in_f))).astype(jnp.float32),
        'mu_b': (mu_init + 0.1 * jax.random.normal(k3, (out_f,))).astype(jnp.float32),
        'rho_b': (rho_init + 0.1 * jax.random.normal(k4, (out_f,))).astype(jnp.float32),
    }


def init_model(key, in_size, emb_dim, hidden_dim, output_size, mu_init, rho_init):
    k1, k2, k3, k4, k5, k6 = jax.random.split(key, 6)
    return {
        'embedding': init_bayes_linear(k1, in_size, emb_dim, mu_init, rho_init),
        'lstm1': {'ih': init_bayes_linear(k2, emb_dim, 4 * hidden_dim, mu_init, rho_init),
                  'hh': init_bayes_linear(k3, hidden_dim, 4 * hidden_dim, mu_init, rho_init)},
        'lstm2': {'ih': init_bayes_linear(k4, emb_dim, 4 * hidden_dim, mu_init, rho_init),
                  'hh': init_bayes_linear(k5, hidden_dim, 4 * hidden_dim, mu_init, rho_init)},
        'decoder': init_bayes_linear(k6, hidden_dim, output_size + 3, mu_init, rho_init),
    }


# ---------------------------------------------------------------------------
# KL (deterministic function of mu/rho — identical for every MC run)
# ---------------------------------------------------------------------------

def kl_gauss(mu, rho, prior_mu=PRIOR_MU, prior_sigma=PRIOR_SIGMA):
    sigma = jax.nn.softplus(rho)
    kl = (jnp.log(prior_sigma) - jnp.log(sigma)
          + (sigma ** 2 + (mu - prior_mu) ** 2) / (2.0 * prior_sigma ** 2) - 0.5)
    return jnp.mean(kl)


def layer_kl(p):
    return kl_gauss(p['mu_w'], p['rho_w']) + kl_gauss(p['mu_b'], p['rho_b'])


def model_kl(params):
    kl_emb = layer_kl(params['embedding'])
    kl_lstm1 = layer_kl(params['lstm1']['ih']) + layer_kl(params['lstm1']['hh'])
    kl_lstm2 = layer_kl(params['lstm2']['ih']) + layer_kl(params['lstm2']['hh'])
    kl_dec = layer_kl(params['decoder'])
    # encode: kl_emb + (Tobs*kl_lstm1)/Tobs ; decode (only first step counted):
    # kl_emb + kl_lstm2 + kl_dec  — matches the reference accounting.
    return kl_emb + kl_lstm1 + kl_emb + kl_lstm2 + kl_dec


# ---------------------------------------------------------------------------
# Trajectory NLL — vectorized form of the per-step Gaussian2DLikelihood loop
# TODO(synk): Gaussian2DLikelihood is defined outside the reference module; the
# standard bivariate-Gaussian NLL of the trajectory repo is used here.
# ---------------------------------------------------------------------------

def traj_nll(pred_seq, sigma_seq, data_abs, target_abs):
    means = data_abs[:, -1:, :] + jnp.cumsum(pred_seq, axis=1)          # (B, Tpred, 2)
    sx = jnp.cumsum(jnp.exp(sigma_seq[:, :, 0]), axis=1)
    sy = jnp.cumsum(jnp.exp(sigma_seq[:, :, 1]), axis=1)
    corr = jnp.tanh(jnp.cumsum(sigma_seq[:, :, 2], axis=1))
    normx = target_abs[:, :, 0] - means[:, :, 0]
    normy = target_abs[:, :, 1] - means[:, :, 1]
    sxsy = sx * sy
    z = (normx / sx) ** 2 + (normy / sy) ** 2 - 2.0 * corr * normx * normy / sxsy
    neg_rho = 1.0 - corr ** 2
    pdf = jnp.exp(-z / (2.0 * neg_rho)) / (2.0 * math.pi * sxsy * jnp.sqrt(neg_rho))
    nll = -jnp.log(jnp.maximum(pdf, 1e-20))                             # (B, Tpred)
    return jnp.sum(jnp.mean(nll, axis=0))


# ---------------------------------------------------------------------------
# Forward (jitted; whole MC ensemble in ONE fused Pallas call)
# ---------------------------------------------------------------------------

@partial(jax.jit, static_argnames=("training", "num_mc"))
def forward(params, X, y, data_abs, target_abs, key, training=False, num_mc=1):
    X_tbi = jnp.transpose(X, (1, 0, 2))          # time-major for the kernel
    y_tbi = jnp.transpose(y, (1, 0, 2))
    x_last = X[:, -1, :]                         # (B, in)
    O = params['decoder']['mu_w'].shape[0]

    kl_loss = model_kl(params)                   # deterministic → same for all MC runs

    out = fused_encdec(params, X_tbi, y_tbi, x_last, key, training, num_mc)
    # out: (num_mc, Tpred, B, 128); real columns [:O]
    pred_mc = jnp.transpose(out[..., :2], (0, 2, 1, 3))       # (mc, B, Tpred, 2)
    sigma_mc = jnp.transpose(out[..., 2:O], (0, 2, 1, 3))     # (mc, B, Tpred, 3)

    nll_mc = jax.vmap(lambda p, s: traj_nll(p, s, data_abs, target_abs))(pred_mc, sigma_mc)
    nll_loss = jnp.sum(nll_mc) / num_mc
    pred = jnp.mean(pred_mc, axis=0)
    return pred, nll_loss, kl_loss


# ---------------------------------------------------------------------------
# Main
# ---------------------------------------------------------------------------

if __name__ == "__main__":
    key = jax.random.PRNGKey(0)
    B, Tobs, Tpred = 2, 8, 4
    in_size, emb_dim, hidden_dim, output_size = 2, 32, 32, 2

    k_param, k_data, k_fwd = jax.random.split(key, 3)
    params = init_model(k_param, in_size, emb_dim, hidden_dim, output_size,
                        POSTERIOR_MU_INIT, POSTERIOR_RHO_INIT)

    kx, ky, kta = jax.random.split(k_data, 3)
    X = jax.random.normal(kx, (B, Tobs, in_size), jnp.float32)            # relative displacements
    y = jax.random.normal(ky, (B, Tpred, in_size), jnp.float32)
    data_abs = jnp.cumsum(X, axis=1)                                      # absolute observed traj
    target_abs = jax.random.normal(kta, (B, Tpred, in_size), jnp.float32)

    pred, nll_loss, kl_loss = forward(params, X, y, data_abs, target_abs, k_fwd,
                                      training=False, num_mc=2)
    pred, nll_loss, kl_loss = jax.block_until_ready((pred, nll_loss, kl_loss))

    assert pred.shape == (B, Tpred, 2)
    assert jnp.isfinite(pred).all()
    assert jnp.isfinite(nll_loss)
    assert jnp.isfinite(kl_loss)
    print("KERNEL_OK")
</pallas_src>

<mosaic_0001>
module attributes {stable_mosaic.version = 11 : i64} {
  func.func @_encdec_kernel(%arg0: i32, %arg1: memref<8x2x2xf32, #tpu.memory_space<vmem>>, %arg2: memref<1x2x32xf32, #tpu.memory_space<vmem>>, %arg3: memref<1x1x32xf32, #tpu.memory_space<vmem>>, %arg4: memref<64x128xf32, #tpu.memory_space<vmem>>, %arg5: memref<64x128xf32, #tpu.memory_space<vmem>>, %arg6: memref<1x8x64x128xf32, #tpu.memory_space<vmem>>, %arg7: memref<1x8x1x128xf32, #tpu.memory_space<vmem>>, %arg8: memref<1x4x128x32xf32, #tpu.memory_space<vmem>>, %arg9: memref<1x4x1x32xf32, #tpu.memory_space<vmem>>, %arg10: memref<64x128xf32, #tpu.memory_space<vmem>>, %arg11: memref<64x128xf32, #tpu.memory_space<vmem>>, %arg12: memref<1x4x64x128xf32, #tpu.memory_space<vmem>>, %arg13: memref<1x4x1x128xf32, #tpu.memory_space<vmem>>, %arg14: memref<1x4x32x128xf32, #tpu.memory_space<vmem>>, %arg15: memref<1x4x1x128xf32, #tpu.memory_space<vmem>>, %arg16: memref<2x128xf32, #tpu.memory_space<vmem>>, %arg17: memref<4x2x128xf32, #tpu.memory_space<vmem>>, %arg18: memref<1x4x2x128xf32, #tpu.memory_space<vmem>>) attributes {dimension_semantics = [#tpu.dimension_semantics<parallel>], iteration_bounds = array<i64: 2>, scalar_prefetch = 0 : i64, scratch_operands = 0 : i64, tpu.core_type = #tpu.core_type<tc>, window_params = [{pipeline_mode = #tpu.pipeline_mode<synchronous>, transform_indices = @transform_0, window_bounds = array<i64: 8, 2, 2>}, {transform_indices = @transform_1, window_bounds = array<i64: 1, 2, 32>}, {transform_indices = @transform_2, window_bounds = array<i64: 1, 1, 32>}, {pipeline_mode = #tpu.pipeline_mode<synchronous>, transform_indices = @transform_3, window_bounds = array<i64: 64, 128>}, {pipeline_mode = #tpu.pipeline_mode<synchronous>, transform_indices = @transform_4, window_bounds = array<i64: 64, 128>}, {transform_indices = @transform_5, window_bounds = array<i64: 1, 8, 64, 128>}, {transform_indices = @transform_6, window_bounds = array<i64: 1, 8, 1, 128>}, {transform_indices = @transform_7, window_bounds = array<i64: 1, 4, 128, 32>}, {transform_indices = @transform_8, window_bounds = array<i64: 1, 4, 1, 32>}, {pipeline_mode = #tpu.pipeline_mode<synchronous>, transform_indices = @transform_9, window_bounds = array<i64: 64, 128>}, {pipeline_mode = #tpu.pipeline_mode<synchronous>, transform_indices = @transform_10, window_bounds = array<i64: 64, 128>}, {transform_indices = @transform_11, window_bounds = array<i64: 1, 4, 64, 128>}, {transform_indices = @transform_12, window_bounds = array<i64: 1, 4, 1, 128>}, {transform_indices = @transform_13, window_bounds = array<i64: 1, 4, 32, 128>}, {transform_indices = @transform_14, window_bounds = array<i64: 1, 4, 1, 128>}, {pipeline_mode = #tpu.pipeline_mode<synchronous>, transform_indices = @transform_15, window_bounds = array<i64: 2, 128>}, {pipeline_mode = #tpu.pipeline_mode<synchronous>, transform_indices = @transform_16, window_bounds = array<i64: 4, 2, 128>}, {transform_indices = @transform_17, window_bounds = array<i64: 1, 4, 2, 128>}]} {
    %c0 = arith.constant 0 : index
    %c0_0 = arith.constant 0 : index
    %c0_1 = arith.constant 0 : index
    %0 = vector.load %arg2[%c0, %c0_0, %c0_1] : memref<1x2x32xf32, #tpu.memory_space<vmem>>, vector<1x2x32xf32>
    %1 = vector.shape_cast %0 : vector<1x2x32xf32> to vector<2x32xf32>
    %c0_2 = arith.constant 0 : index
    %c0_3 = arith.constant 0 : index
    %c0_4 = arith.constant 0 : index
    %2 = vector.load %arg3[%c0_2, %c0_3, %c0_4] : memref<1x1x32xf32, #tpu.memory_space<vmem>>, vector<1x1x32xf32>
    %3 = vector.shape_cast %2 : vector<1x1x32xf32> to vector<1x32xf32>
    %c0_5 = arith.constant 0 : index
    %c0_6 = arith.constant 0 : index
    %4 = vector.load %arg4[%c0_5, %c0_6] : memref<64x128xf32, #tpu.memory_space<vmem>>, vector<64x128xf32>
    %c0_7 = arith.constant 0 : index
    %c0_8 = arith.constant 0 : index
    %5 = vector.load %arg5[%c0_7, %c0_8] : memref<64x128xf32, #tpu.memory_space<vmem>>, vector<64x128xf32>
    %cst = arith.constant 0.000000e+00 : f32
    %6 = vector.broadcast %cst : f32 to vector<2x32xf32>
    %cst_9 = arith.constant 0.000000e+00 : f32
    %7 = vector.broadcast %cst_9 : f32 to vector<2x32xf32>
    %c0_10 = arith.constant 0 : index
    %c0_11 = arith.constant 0 : index
    %c0_12 = arith.constant 0 : index
    %8 = vector.load %arg1[%c0_10, %c0_11, %c0_12] : memref<8x2x2xf32, #tpu.memory_space<vmem>>, vector<1x2x2xf32>
    %9 = vector.shape_cast %8 : vector<1x2x2xf32> to vector<2x2xf32>
    %cst_13 = arith.constant dense<0.000000e+00> : vector<2x32xf32>
    %10 = tpu.matmul %9, %1, %cst_13 {dimension_numbers = #tpu.dot_dimension_numbers<[1], [0], [0], [1], [0, 0, 1, 1], [], []>} : vector<2x2xf32>, vector<2x32xf32>, vector<2x32xf32> -> vector<2x32xf32>
    %11 = vector.broadcast %3 : vector<1x32xf32> to vector<2x32xf32>
    %12 = arith.addf %10, %11 : vector<2x32xf32>
    %c0_14 = arith.constant 0 : index
    %c0_15 = arith.constant 0 : index
    %c0_16 = arith.constant 0 : index
    %c0_17 = arith.constant 0 : index
    %13 = vector.load %arg6[%c0_14, %c0_15, %c0_16, %c0_17] : memref<1x8x64x128xf32, #tpu.memory_space<vmem>>, vector<1x1x64x128xf32>
    %14 = vector.shape_cast %13 : vector<1x1x64x128xf32> to vector<64x128xf32>
    %15 = arith.mulf %5, %14 : vector<64x128xf32>
    %16 = arith.addf %4, %15 : vector<64x128xf32>
    %c0_18 = arith.constant 0 : index
    %c0_19 = arith.constant 0 : index
    %c0_20 = arith.constant 0 : index
    %c0_21 = arith.constant 0 : index
    %17 = vector.load %arg7[%c0_18, %c0_19, %c0_20, %c0_21] : memref<1x8x1x128xf32, #tpu.memory_space<vmem>>, vector<1x1x1x128xf32>
    %18 = vector.shape_cast %17 : vector<1x1x1x128xf32> to vector<1x128xf32>
    %19 = vector.extract_strided_slice %16 {offsets = [0, 0], sizes = [32, 128], strides = [1, 1]} : vector<64x128xf32> to vector<32x128xf32>
    %cst_22 = arith.constant dense<0.000000e+00> : vector<2x128xf32>
    %20 = tpu.matmul %12, %19, %cst_22 {dimension_numbers = #tpu.dot_dimension_numbers<[1], [0], [0], [1], [0, 0, 1, 1], [], []>} : vector<2x32xf32>, vector<32x128xf32>, vector<2x128xf32> -> vector<2x128xf32>
    %21 = vector.extract_strided_slice %16 {offsets = [32, 0], sizes = [32, 128], strides = [1, 1]} : vector<64x128xf32> to vector<32x128xf32>
    %cst_23 = arith.constant dense<0.000000e+00> : vector<2x128xf32>
    %22 = tpu.matmul %6, %21, %cst_23 {dimension_numbers = #tpu.dot_dimension_numbers<[1], [0], [0], [1], [0, 0, 1, 1], [], []>} : vector<2x32xf32>, vector<32x128xf32>, vector<2x128xf32> -> vector<2x128xf32>
    %23 = arith.addf %20, %22 : vector<2x128xf32>
    %24 = vector.broadcast %18 : vector<1x128xf32> to vector<2x128xf32>
    %25 = arith.addf %23, %24 : vector<2x128xf32>
    %26 = arith.negf %25 : vector<2x128xf32>
    %27 = math.exp %26 : vector<2x128xf32>
    %cst_24 = arith.constant 1.000000e+00 : f32
    %28 = vector.broadcast %cst_24 : f32 to vector<2x128xf32>
    %29 = arith.addf %28, %27 : vector<2x128xf32>
    %30 = arith.divf %28, %29 : vector<2x128xf32>
    %31 = math.tanh %25 : vector<2x128xf32>
    %32 = vector.extract_strided_slice %30 {offsets = [0, 0], sizes = [2, 32], strides = [1, 1]} : vector<2x128xf32> to vector<2x32xf32>
    %33 = vector.extract_strided_slice %30 {offsets = [0, 32], sizes = [2, 32], strides = [1, 1]} : vector<2x128xf32> to vector<2x32xf32>
    %34 = vector.extract_strided_slice %31 {offsets = [0, 64], sizes = [2, 32], strides = [1, 1]} : vector<2x128xf32> to vector<2x32xf32>
    %35 = vector.extract_strided_slice %30 {offsets = [0, 96], sizes = [2, 32], strides = [1, 1]} : vector<2x128xf32> to vector<2x32xf32>
    %36 = arith.mulf %33, %7 : vector<2x32xf32>
    %37 = arith.mulf %32, %34 : vector<2x32xf32>
    %38 = arith.addf %36, %37 : vector<2x32xf32>
    %39 = math.tanh %38 : vector<2x32xf32>
    %40 = arith.mulf %35, %39 : vector<2x32xf32>
    %c1 = arith.constant 1 : index
    %c0_25 = arith.constant 0 : index
    %c0_26 = arith.constant 0 : index
    %41 = vector.load %arg1[%c1, %c0_25, %c0_26] : memref<8x2x2xf32, #tpu.memory_space<vmem>>, vector<1x2x2xf32>
    %42 = vector.shape_cast %41 : vector<1x2x2xf32> to vector<2x2xf32>
    %cst_27 = arith.constant dense<0.000000e+00> : vector<2x32xf32>
    %43 = tpu.matmul %42, %1, %cst_27 {dimension_numbers = #tpu.dot_dimension_numbers<[1], [0], [0], [1], [0, 0, 1, 1], [], []>} : vector<2x2xf32>, vector<2x32xf32>, vector<2x32xf32> -> vector<2x32xf32>
    %44 = vector.broadcast %3 : vector<1x32xf32> to vector<2x32xf32>
    %45 = arith.addf %43, %44 : vector<2x32xf32>
    %c0_28 = arith.constant 0 : index
    %c1_29 = arith.constant 1 : index
    %c0_30 = arith.constant 0 : index
    %c0_31 = arith.constant 0 : index
    %46 = vector.load %arg6[%c0_28, %c1_29, %c0_30, %c0_31] : memref<1x8x64x128xf32, #tpu.memory_space<vmem>>, vector<1x1x64x128xf32>
    %47 = vector.shape_cast %46 : vector<1x1x64x128xf32> to vector<64x128xf32>
    %48 = arith.mulf %5, %47 : vector<64x128xf32>
    %49 = arith.addf %4, %48 : vector<64x128xf32>
    %c0_32 = arith.constant 0 : index
    %c1_33 = arith.constant 1 : index
    %c0_34 = arith.constant 0 : index
    %c0_35 = arith.constant 0 : index
    %50 = vector.load %arg7[%c0_32, %c1_33, %c0_34, %c0_35] : memref<1x8x1x128xf32, #tpu.memory_space<vmem>>, vector<1x1x1x128xf32>
    %51 = vector.shape_cast %50 : vector<1x1x1x128xf32> to vector<1x128xf32>
    %52 = vector.extract_strided_slice %49 {offsets = [0, 0], sizes = [32, 128], strides = [1, 1]} : vector<64x128xf32> to vector<32x128xf32>
    %cst_36 = arith.constant dense<0.000000e+00> : vector<2x128xf32>
    %53 = tpu.matmul %45, %52, %cst_36 {dimension_numbers = #tpu.dot_dimension_numbers<[1], [0], [0], [1], [0, 0, 1, 1], [], []>} : vector<2x32xf32>, vector<32x128xf32>, vector<2x128xf32> -> vector<2x128xf32>
    %54 = vector.extract_strided_slice %49 {offsets = [32, 0], sizes = [32, 128], strides = [1, 1]} : vector<64x128xf32> to vector<32x128xf32>
    %cst_37 = arith.constant dense<0.000000e+00> : vector<2x128xf32>
    %55 = tpu.matmul %40, %54, %cst_37 {dimension_numbers = #tpu.dot_dimension_numbers<[1], [0], [0], [1], [0, 0, 1, 1], [], []>} : vector<2x32xf32>, vector<32x128xf32>, vector<2x128xf32> -> vector<2x128xf32>
    %56 = arith.addf %53, %55 : vector<2x128xf32>
    %57 = vector.broadcast %51 : vector<1x128xf32> to vector<2x128xf32>
    %58 = arith.addf %56, %57 : vector<2x128xf32>
    %59 = arith.negf %58 : vector<2x128xf32>
    %60 = math.exp %59 : vector<2x128xf32>
    %cst_38 = arith.constant 1.000000e+00 : f32
    %61 = vector.broadcast %cst_38 : f32 to vector<2x128xf32>
    %62 = arith.addf %61, %60 : vector<2x128xf32>
    %63 = arith.divf %61, %62 : vector<2x128xf32>
    %64 = math.tanh %58 : vector<2x128xf32>
    %65 = vector.extract_strided_slice %63 {offsets = [0, 0], sizes = [2, 32], strides = [1, 1]} : vector<2x128xf32> to vector<2x32xf32>
    %66 = vector.extract_strided_slice %63 {offsets = [0, 32], sizes = [2, 32], strides = [1, 1]} : vector<2x128xf32> to vector<2x32xf32>
    %67 = vector.extract_strided_slice %64 {offsets = [0, 64], sizes = [2, 32], strides = [1, 1]} : vector<2x128xf32> to vector<2x32xf32>
    %68 = vector.extract_strided_slice %63 {offsets = [0, 96], sizes = [2, 32], strides = [1, 1]} : vector<2x128xf32> to vector<2x32xf32>
    %69 = arith.mulf %66, %38 : vector<2x32xf32>
    %70 = arith.mulf %65, %67 : vector<2x32xf32>
    %71 = arith.addf %69, %70 : vector<2x32xf32>
    %72 = math.tanh %71 : vector<2x32xf32>
    %73 = arith.mulf %68, %72 : vector<2x32xf32>
    %c2 = arith.constant 2 : index
    %c0_39 = arith.constant 0 : index
    %c0_40 = arith.constant 0 : index
    %74 = vector.load %arg1[%c2, %c0_39, %c0_40] : memref<8x2x2xf32, #tpu.memory_space<vmem>>, vector<1x2x2xf32>
    %75 = vector.shape_cast %74 : vector<1x2x2xf32> to vector<2x2xf32>
    %cst_41 = arith.constant dense<0.000000e+00> : vector<2x32xf32>
    %76 = tpu.matmul %75, %1, %cst_41 {dimension_numbers = #tpu.dot_dimension_numbers<[1], [0], [0], [1], [0, 0, 1, 1], [], []>} : vector<2x2xf32>, vector<2x32xf32>, vector<2x32xf32> -> vector<2x32xf32>
    %77 = vector.broadcast %3 : vector<1x32xf32> to vector<2x32xf32>
    %78 = arith.addf %76, %77 : vector<2x32xf32>
    %c0_42 = arith.constant 0 : index
    %c2_43 = arith.constant 2 : index
    %c0_44 = arith.constant 0 : index
    %c0_45 = arith.constant 0 : index
    %79 = vector.load %arg6[%c0_42, %c2_43, %c0_44, %c0_45] : memref<1x8x64x128xf32, #tpu.memory_space<vmem>>, vector<1x1x64x128xf32>
    %80 = vector.shape_cast %79 : vector<1x1x64x128xf32> to vector<64x128xf32>
    %81 = arith.mulf %5, %80 : vector<64x128xf32>
    %82 = arith.addf %4, %81 : vector<64x128xf32>
    %c0_46 = arith.constant 0 : index
    %c2_47 = arith.constant 2 : index
    %c0_48 = arith.constant 0 : index
    %c0_49 = arith.constant 0 : index
    %83 = vector.load %arg7[%c0_46, %c2_47, %c0_48, %c0_49] : memref<1x8x1x128xf32, #tpu.memory_space<vmem>>, vector<1x1x1x128xf32>
    %84 = vector.shape_cast %83 : vector<1x1x1x128xf32> to vector<1x128xf32>
    %85 = vector.extract_strided_slice %82 {offsets = [0, 0], sizes = [32, 128], strides = [1, 1]} : vector<64x128xf32> to vector<32x128xf32>
    %cst_50 = arith.constant dense<0.000000e+00> : vector<2x128xf32>
    %86 = tpu.matmul %78, %85, %cst_50 {dimension_numbers = #tpu.dot_dimension_numbers<[1], [0], [0], [1], [0, 0, 1, 1], [], []>} : vector<2x32xf32>, vector<32x128xf32>, vector<2x128xf32> -> vector<2x128xf32>
    %87 = vector.extract_strided_slice %82 {offsets = [32, 0], sizes = [32, 128], strides = [1, 1]} : vector<64x128xf32> to vector<32x128xf32>
    %cst_51 = arith.constant dense<0.000000e+00> : vector<2x128xf32>
    %88 = tpu.matmul %73, %87, %cst_51 {dimension_numbers = #tpu.dot_dimension_numbers<[1], [0], [0], [1], [0, 0, 1, 1], [], []>} : vector<2x32xf32>, vector<32x128xf32>, vector<2x128xf32> -> vector<2x128xf32>
    %89 = arith.addf %86, %88 : vector<2x128xf32>
    %90 = vector.broadcast %84 : vector<1x128xf32> to vector<2x128xf32>
    %91 = arith.addf %89, %90 : vector<2x128xf32>
    %92 = arith.negf %91 : vector<2x128xf32>
    %93 = math.exp %92 : vector<2x128xf32>
    %cst_52 = arith.constant 1.000000e+00 : f32
    %94 = vector.broadcast %cst_52 : f32 to vector<2x128xf32>
    %95 = arith.addf %94, %93 : vector<2x128xf32>
    %96 = arith.divf %94, %95 : vector<2x128xf32>
    %97 = math.tanh %91 : vector<2x128xf32>
    %98 = vector.extract_strided_slice %96 {offsets = [0, 0], sizes = [2, 32], strides = [1, 1]} : vector<2x128xf32> to vector<2x32xf32>
    %99 = vector.extract_strided_slice %96 {offsets = [0, 32], sizes = [2, 32], strides = [1, 1]} : vector<2x128xf32> to vector<2x32xf32>
    %100 = vector.extract_strided_slice %97 {offsets = [0, 64], sizes = [2, 32], strides = [1, 1]} : vector<2x128xf32> to vector<2x32xf32>
    %101 = vector.extract_strided_slice %96 {offsets = [0, 96], sizes = [2, 32], strides = [1, 1]} : vector<2x128xf32> to vector<2x32xf32>
    %102 = arith.mulf %99, %71 : vector<2x32xf32>
    %103 = arith.mulf %98, %100 : vector<2x32xf32>
    %104 = arith.addf %102, %103 : vector<2x32xf32>
    %105 = math.tanh %104 : vector<2x32xf32>
    %106 = arith.mulf %101, %105 : vector<2x32xf32>
    %c3 = arith.constant 3 : index
    %c0_53 = arith.constant 0 : index
    %c0_54 = arith.constant 0 : index
    %107 = vector.load %arg1[%c3, %c0_53, %c0_54] : memref<8x2x2xf32, #tpu.memory_space<vmem>>, vector<1x2x2xf32>
    %108 = vector.shape_cast %107 : vector<1x2x2xf32> to vector<2x2xf32>
    %cst_55 = arith.constant dense<0.000000e+00> : vector<2x32xf32>
    %109 = tpu.matmul %108, %1, %cst_55 {dimension_numbers = #tpu.dot_dimension_numbers<[1], [0], [0], [1], [0, 0, 1, 1], [], []>} : vector<2x2xf32>, vector<2x32xf32>, vector<2x32xf32> -> vector<2x32xf32>
    %110 = vector.broadcast %3 : vector<1x32xf32> to vector<2x32xf32>
    %111 = arith.addf %109, %110 : vector<2x32xf32>
    %c0_56 = arith.constant 0 : index
    %c3_57 = arith.constant 3 : index
    %c0_58 = arith.constant 0 : index
    %c0_59 = arith.constant 0 : index
    %112 = vector.load %arg6[%c0_56, %c3_57, %c0_58, %c0_59] : memref<1x8x64x128xf32, #tpu.memory_space<vmem>>, vector<1x1x64x128xf32>
    %113 = vector.shape_cast %112 : vector<1x1x64x128xf32> to vector<64x128xf32>
    %114 = arith.mulf %5, %113 : vector<64x128xf32>
    %115 = arith.addf %4, %114 : vector<64x128xf32>
    %c0_60 = arith.constant 0 : index
    %c3_61 = arith.constant 3 : index
    %c0_62 = arith.constant 0 : index
    %c0_63 = arith.constant 0 : index
    %116 = vector.load %arg7[%c0_60, %c3_61, %c0_62, %c0_63] : memref<1x8x1x128xf32, #tpu.memory_space<vmem>>, vector<1x1x1x128xf32>
    %117 = vector.shape_cast %116 : vector<1x1x1x128xf32> to vector<1x128xf32>
    %118 = vector.extract_strided_slice %115 {offsets = [0, 0], sizes = [32, 128], strides = [1, 1]} : vector<64x128xf32> to vector<32x128xf32>
    %cst_64 = arith.constant dense<0.000000e+00> : vector<2x128xf32>
    %119 = tpu.matmul %111, %118, %cst_64 {dimension_numbers = #tpu.dot_dimension_numbers<[1], [0], [0], [1], [0, 0, 1, 1], [], []>} : vector<2x32xf32>, vector<32x128xf32>, vector<2x128xf32> -> vector<2x128xf32>
    %120 = vector.extract_strided_slice %115 {offsets = [32, 0], sizes = [32, 128], strides = [1, 1]} : vector<64x128xf32> to vector<32x128xf32>
    %cst_65 = arith.constant dense<0.000000e+00> : vector<2x128xf32>
    %121 = tpu.matmul %106, %120, %cst_65 {dimension_numbers = #tpu.dot_dimension_numbers<[1], [0], [0], [1], [0, 0, 1, 1], [], []>} : vector<2x32xf32>, vector<32x128xf32>, vector<2x128xf32> -> vector<2x128xf32>
    %122 = arith.addf %119, %121 : vector<2x128xf32>
    %123 = vector.broadcast %117 : vector<1x128xf32> to vector<2x128xf32>
    %124 = arith.addf %122, %123 : vector<2x128xf32>
    %125 = arith.negf %124 : vector<2x128xf32>
    %126 = math.exp %125 : vector<2x128xf32>
    %cst_66 = arith.constant 1.000000e+00 : f32
    %127 = vector.broadcast %cst_66 : f32 to vector<2x128xf32>
    %128 = arith.addf %127, %126 : vector<2x128xf32>
    %129 = arith.divf %127, %128 : vector<2x128xf32>
    %130 = math.tanh %124 : vector<2x128xf32>
    %131 = vector.extract_strided_slice %129 {offsets = [0, 0], sizes = [2, 32], strides = [1, 1]} : vector<2x128xf32> to vector<2x32xf32>
    %132 = vector.extract_strided_slice %129 {offsets = [0, 32], sizes = [2, 32], strides = [1, 1]} : vector<2x128xf32> to vector<2x32xf32>
    %133 = vector.extract_strided_slice %130 {offsets = [0, 64], sizes = [2, 32], strides = [1, 1]} : vector<2x128xf32> to vector<2x32xf32>
    %134 = vector.extract_strided_slice %129 {offsets = [0, 96], sizes = [2, 32], strides = [1, 1]} : vector<2x128xf32> to vector<2x32xf32>
    %135 = arith.mulf %132, %104 : vector<2x32xf32>
    %136 = arith.mulf %131, %133 : vector<2x32xf32>
    %137 = arith.addf %135, %136 : vector<2x32xf32>
    %138 = math.tanh %137 : vector<2x32xf32>
    %139 = arith.mulf %134, %138 : vector<2x32xf32>
    %c4 = arith.constant 4 : index
    %c0_67 = arith.constant 0 : index
    %c0_68 = arith.constant 0 : index
    %140 = vector.load %arg1[%c4, %c0_67, %c0_68] : memref<8x2x2xf32, #tpu.memory_space<vmem>>, vector<1x2x2xf32>
    %141 = vector.shape_cast %140 : vector<1x2x2xf32> to vector<2x2xf32>
    %cst_69 = arith.constant dense<0.000000e+00> : vector<2x32xf32>
    %142 = tpu.matmul %141, %1, %cst_69 {dimension_numbers = #tpu.dot_dimension_numbers<[1], [0], [0], [1], [0, 0, 1, 1], [], []>} : vector<2x2xf32>, vector<2x32xf32>, vector<2x32xf32> -> vector<2x32xf32>
    %143 = vector.broadcast %3 : vector<1x32xf32> to vector<2x32xf32>
    %144 = arith.addf %142, %143 : vector<2x32xf32>
    %c0_70 = arith.constant 0 : index
    %c4_71 = arith.constant 4 : index
    %c0_72 = arith.constant 0 : index
    %c0_73 = arith.constant 0 : index
    %145 = vector.load %arg6[%c0_70, %c4_71, %c0_72, %c0_73] : memref<1x8x64x128xf32, #tpu.memory_space<vmem>>, vector<1x1x64x128xf32>
    %146 = vector.shape_cast %145 : vector<1x1x64x128xf32> to vector<64x128xf32>
    %147 = arith.mulf %5, %146 : vector<64x128xf32>
    %148 = arith.addf %4, %147 : vector<64x128xf32>
    %c0_74 = arith.constant 0 : index
    %c4_75 = arith.constant 4 : index
    %c0_76 = arith.constant 0 : index
    %c0_77 = arith.constant 0 : index
    %149 = vector.load %arg7[%c0_74, %c4_75, %c0_76, %c0_77] : memref<1x8x1x128xf32, #tpu.memory_space<vmem>>, vector<1x1x1x128xf32>
    %150 = vector.shape_cast %149 : vector<1x1x1x128xf32> to vector<1x128xf32>
    %151 = vector.extract_strided_slice %148 {offsets = [0, 0], sizes = [32, 128], strides = [1, 1]} : vector<64x128xf32> to vector<32x128xf32>
    %cst_78 = arith.constant dense<0.000000e+00> : vector<2x128xf32>
    %152 = tpu.matmul %144, %151, %cst_78 {dimension_numbers = #tpu.dot_dimension_numbers<[1], [0], [0], [1], [0, 0, 1, 1], [], []>} : vector<2x32xf32>, vector<32x128xf32>, vector<2x128xf32> -> vector<2x128xf32>
    %153 = vector.extract_strided_slice %148 {offsets = [32, 0], sizes = [32, 128], strides = [1, 1]} : vector<64x128xf32> to vector<32x128xf32>
    %cst_79 = arith.constant dense<0.000000e+00> : vector<2x128xf32>
    %154 = tpu.matmul %139, %153, %cst_79 {dimension_numbers = #tpu.dot_dimension_numbers<[1], [0], [0], [1], [0, 0, 1, 1], [], []>} : vector<2x32xf32>, vector<32x128xf32>, vector<2x128xf32> -> vector<2x128xf32>
    %155 = arith.addf %152, %154 : vector<2x128xf32>
    %156 = vector.broadcast %150 : vector<1x128xf32> to vector<2x128xf32>
    %157 = arith.addf %155, %156 : vector<2x128xf32>
    %158 = arith.negf %157 : vector<2x128xf32>
    %159 = math.exp %158 : vector<2x128xf32>
    %cst_80 = arith.constant 1.000000e+00 : f32
    %160 = vector.broadcast %cst_80 : f32 to vector<2x128xf32>
    %161 = arith.addf %160, %159 : vector<2x128xf32>
    %162 = arith.divf %160, %161 : vector<2x128xf32>
    %163 = math.tanh %157 : vector<2x128xf32>
    %164 = vector.extract_strided_slice %162 {offsets = [0, 0], sizes = [2, 32], strides = [1, 1]} : vector<2x128xf32> to vector<2x32xf32>
    %165 = vector.extract_strided_slice %162 {offsets = [0, 32], sizes = [2, 32], strides = [1, 1]} : vector<2x128xf32> to vector<2x32xf32>
    %166 = vector.extract_strided_slice %163 {offsets = [0, 64], sizes = [2, 32], strides = [1, 1]} : vector<2x128xf32> to vector<2x32xf32>
    %167 = vector.extract_strided_slice %162 {offsets = [0, 96], sizes = [2, 32], strides = [1, 1]} : vector<2x128xf32> to vector<2x32xf32>
    %168 = arith.mulf %165, %137 : vector<2x32xf32>
    %169 = arith.mulf %164, %166 : vector<2x32xf32>
    %170 = arith.addf %168, %169 : vector<2x32xf32>
    %171 = math.tanh %170 : vector<2x32xf32>
    %172 = arith.mulf %167, %171 : vector<2x32xf32>
    %c5 = arith.constant 5 : index
    %c0_81 = arith.constant 0 : index
    %c0_82 = arith.constant 0 : index
    %173 = vector.load %arg1[%c5, %c0_81, %c0_82] : memref<8x2x2xf32, #tpu.memory_space<vmem>>, vector<1x2x2xf32>
    %174 = vector.shape_cast %173 : vector<1x2x2xf32> to vector<2x2xf32>
    %cst_83 = arith.constant dense<0.000000e+00> : vector<2x32xf32>
    %175 = tpu.matmul %174, %1, %cst_83 {dimension_numbers = #tpu.dot_dimension_numbers<[1], [0], [0], [1], [0, 0, 1, 1], [], []>} : vector<2x2xf32>, vector<2x32xf32>, vector<2x32xf32> -> vector<2x32xf32>
    %176 = vector.broadcast %3 : vector<1x32xf32> to vector<2x32xf32>
    %177 = arith.addf %175, %176 : vector<2x32xf32>
    %c0_84 = arith.constant 0 : index
    %c5_85 = arith.constant 5 : index
    %c0_86 = arith.constant 0 : index
    %c0_87 = arith.constant 0 : index
    %178 = vector.load %arg6[%c0_84, %c5_85, %c0_86, %c0_87] : memref<1x8x64x128xf32, #tpu.memory_space<vmem>>, vector<1x1x64x128xf32>
    %179 = vector.shape_cast %178 : vector<1x1x64x128xf32> to vector<64x128xf32>
    %180 = arith.mulf %5, %179 : vector<64x128xf32>
    %181 = arith.addf %4, %180 : vector<64x128xf32>
    %c0_88 = arith.constant 0 : index
    %c5_89 = arith.constant 5 : index
    %c0_90 = arith.constant 0 : index
    %c0_91 = arith.constant 0 : index
    %182 = vector.load %arg7[%c0_88, %c5_89, %c0_90, %c0_91] : memref<1x8x1x128xf32, #tpu.memory_space<vmem>>, vector<1x1x1x128xf32>
    %183 = vector.shape_cast %182 : vector<1x1x1x128xf32> to vector<1x128xf32>
    %184 = vector.extract_strided_slice %181 {offsets = [0, 0], sizes = [32, 128], strides = [1, 1]} : vector<64x128xf32> to vector<32x128xf32>
    %cst_92 = arith.constant dense<0.000000e+00> : vector<2x128xf32>
    %185 = tpu.matmul %177, %184, %cst_92 {dimension_numbers = #tpu.dot_dimension_numbers<[1], [0], [0], [1], [0, 0, 1, 1], [], []>} : vector<2x32xf32>, vector<32x128xf32>, vector<2x128xf32> -> vector<2x128xf32>
    %186 = vector.extract_strided_slice %181 {offsets = [32, 0], sizes = [32, 128], strides = [1, 1]} : vector<64x128xf32> to vector<32x128xf32>
    %cst_93 = arith.constant dense<0.000000e+00> : vector<2x128xf32>
    %187 = tpu.matmul %172, %186, %cst_93 {dimension_numbers = #tpu.dot_dimension_numbers<[1], [0], [0], [1], [0, 0, 1, 1], [], []>} : vector<2x32xf32>, vector<32x128xf32>, vector<2x128xf32> -> vector<2x128xf32>
    %188 = arith.addf %185, %187 : vector<2x128xf32>
    %189 = vector.broadcast %183 : vector<1x128xf32> to vector<2x128xf32>
    %190 = arith.addf %188, %189 : vector<2x128xf32>
    %191 = arith.negf %190 : vector<2x128xf32>
    %192 = math.exp %191 : vector<2x128xf32>
    %cst_94 = arith.constant 1.000000e+00 : f32
    %193 = vector.broadcast %cst_94 : f32 to vector<2x128xf32>
    %194 = arith.addf %193, %192 : vector<2x128xf32>
    %195 = arith.divf %193, %194 : vector<2x128xf32>
    %196 = math.tanh %190 : vector<2x128xf32>
    %197 = vector.extract_strided_slice %195 {offsets = [0, 0], sizes = [2, 32], strides = [1, 1]} : vector<2x128xf32> to vector<2x32xf32>
    %198 = vector.extract_strided_slice %195 {offsets = [0, 32], sizes = [2, 32], strides = [1, 1]} : vector<2x128xf32> to vector<2x32xf32>
    %199 = vector.extract_strided_slice %196 {offsets = [0, 64], sizes = [2, 32], strides = [1, 1]} : vector<2x128xf32> to vector<2x32xf32>
    %200 = vector.extract_strided_slice %195 {offsets = [0, 96], sizes = [2, 32], strides = [1, 1]} : vector<2x128xf32> to vector<2x32xf32>
    %201 = arith.mulf %198, %170 : vector<2x32xf32>
    %202 = arith.mulf %197, %199 : vector<2x32xf32>
    %203 = arith.addf %201, %202 : vector<2x32xf32>
    %204 = math.tanh %203 : vector<2x32xf32>
    %205 = arith.mulf %200, %204 : vector<2x32xf32>
    %c6 = arith.constant 6 : index
    %c0_95 = arith.constant 0 : index
    %c0_96 = arith.constant 0 : index
    %206 = vector.load %arg1[%c6, %c0_95, %c0_96] : memref<8x2x2xf32, #tpu.memory_space<vmem>>, vector<1x2x2xf32>
    %207 = vector.shape_cast %206 : vector<1x2x2xf32> to vector<2x2xf32>
    %cst_97 = arith.constant dense<0.000000e+00> : vector<2x32xf32>
    %208 = tpu.matmul %207, %1, %cst_97 {dimension_numbers = #tpu.dot_dimension_numbers<[1], [0], [0], [1], [0, 0, 1, 1], [], []>} : vector<2x2xf32>, vector<2x32xf32>, vector<2x32xf32> -> vector<2x32xf32>
    %209 = vector.broadcast %3 : vector<1x32xf32> to vector<2x32xf32>
    %210 = arith.addf %208, %209 : vector<2x32xf32>
    %c0_98 = arith.constant 0 : index
    %c6_99 = arith.constant 6 : index
    %c0_100 = arith.constant 0 : index
    %c0_101 = arith.constant 0 : index
    %211 = vector.load %arg6[%c0_98, %c6_99, %c0_100, %c0_101] : memref<1x8x64x128xf32, #tpu.memory_space<vmem>>, vector<1x1x64x128xf32>
    %212 = vector.shape_cast %211 : vector<1x1x64x128xf32> to vector<64x128xf32>
    %213 = arith.mulf %5, %212 : vector<64x128xf32>
    %214 = arith.addf %4, %213 : vector<64x128xf32>
    %c0_102 = arith.constant 0 : index
    %c6_103 = arith.constant 6 : index
    %c0_104 = arith.constant 0 : index
    %c0_105 = arith.constant 0 : index
    %215 = vector.load %arg7[%c0_102, %c6_103, %c0_104, %c0_105] : memref<1x8x1x128xf32, #tpu.memory_space<vmem>>, vector<1x1x1x128xf32>
    %216 = vector.shape_cast %215 : vector<1x1x1x128xf32> to vector<1x128xf32>
    %217 = vector.extract_strided_slice %214 {offsets = [0, 0], sizes = [32, 128], strides = [1, 1]} : vector<64x128xf32> to vector<32x128xf32>
    %cst_106 = arith.constant dense<0.000000e+00> : vector<2x128xf32>
    %218 = tpu.matmul %210, %217, %cst_106 {dimension_numbers = #tpu.dot_dimension_numbers<[1], [0], [0], [1], [0, 0, 1, 1], [], []>} : vector<2x32xf32>, vector<32x128xf32>, vector<2x128xf32> -> vector<2x128xf32>
    %219 = vector.extract_strided_slice %214 {offsets = [32, 0], sizes = [32, 128], strides = [1, 1]} : vector<64x128xf32> to vector<32x128xf32>
    %cst_107 = arith.constant dense<0.000000e+00> : vector<2x128xf32>
    %220 = tpu.matmul %205, %219, %cst_107 {dimension_numbers = #tpu.dot_dimension_numbers<[1], [0], [0], [1], [0, 0, 1, 1], [], []>} : vector<2x32xf32>, vector<32x128xf32>, vector<2x128xf32> -> vector<2x128xf32>
    %221 = arith.addf %218, %220 : vector<2x128xf32>
    %222 = vector.broadcast %216 : vector<1x128xf32> to vector<2x128xf32>
    %223 = arith.addf %221, %222 : vector<2x128xf32>
    %224 = arith.negf %223 : vector<2x128xf32>
    %225 = math.exp %224 : vector<2x128xf32>
    %cst_108 = arith.constant 1.000000e+00 : f32
    %226 = vector.broadcast %cst_108 : f32 to vector<2x128xf32>
    %227 = arith.addf %226, %225 : vector<2x128xf32>
    %228 = arith.divf %226, %227 : vector<2x128xf32>
    %229 = math.tanh %223 : vector<2x128xf32>
    %230 = vector.extract_strided_slice %228 {offsets = [0, 0], sizes = [2, 32], strides = [1, 1]} : vector<2x128xf32> to vector<2x32xf32>
    %231 = vector.extract_strided_slice %228 {offsets = [0, 32], sizes = [2, 32], strides = [1, 1]} : vector<2x128xf32> to vector<2x32xf32>
    %232 = vector.extract_strided_slice %229 {offsets = [0, 64], sizes = [2, 32], strides = [1, 1]} : vector<2x128xf32> to vector<2x32xf32>
    %233 = vector.extract_strided_slice %228 {offsets = [0, 96], sizes = [2, 32], strides = [1, 1]} : vector<2x128xf32> to vector<2x32xf32>
    %234 = arith.mulf %231, %203 : vector<2x32xf32>
    %235 = arith.mulf %230, %232 : vector<2x32xf32>
    %236 = arith.addf %234, %235 : vector<2x32xf32>
    %237 = math.tanh %236 : vector<2x32xf32>
    %238 = arith.mulf %233, %237 : vector<2x32xf32>
    %c7 = arith.constant 7 : index
    %c0_109 = arith.constant 0 : index
    %c0_110 = arith.constant 0 : index
    %239 = vector.load %arg1[%c7, %c0_109, %c0_110] : memref<8x2x2xf32, #tpu.memory_space<vmem>>, vector<1x2x2xf32>
    %240 = vector.shape_cast %239 : vector<1x2x2xf32> to vector<2x2xf32>
    %cst_111 = arith.constant dense<0.000000e+00> : vector<2x32xf32>
    %241 = tpu.matmul %240, %1, %cst_111 {dimension_numbers = #tpu.dot_dimension_numbers<[1], [0], [0], [1], [0, 0, 1, 1], [], []>} : vector<2x2xf32>, vector<2x32xf32>, vector<2x32xf32> -> vector<2x32xf32>
    %242 = vector.broadcast %3 : vector<1x32xf32> to vector<2x32xf32>
    %243 = arith.addf %241, %242 : vector<2x32xf32>
    %c0_112 = arith.constant 0 : index
    %c7_113 = arith.constant 7 : index
    %c0_114 = arith.constant 0 : index
    %c0_115 = arith.constant 0 : index
    %244 = vector.load %arg6[%c0_112, %c7_113, %c0_114, %c0_115] : memref<1x8x64x128xf32, #tpu.memory_space<vmem>>, vector<1x1x64x128xf32>
    %245 = vector.shape_cast %244 : vector<1x1x64x128xf32> to vector<64x128xf32>
    %246 = arith.mulf %5, %245 : vector<64x128xf32>
    %247 = arith.addf %4, %246 : vector<64x128xf32>
    %c0_116 = arith.constant 0 : index
    %c7_117 = arith.constant 7 : index
    %c0_118 = arith.constant 0 : index
    %c0_119 = arith.constant 0 : index
    %248 = vector.load %arg7[%c0_116, %c7_117, %c0_118, %c0_119] : memref<1x8x1x128xf32, #tpu.memory_space<vmem>>, vector<1x1x1x128xf32>
    %249 = vector.shape_cast %248 : vector<1x1x1x128xf32> to vector<1x128xf32>
    %250 = vector.extract_strided_slice %247 {offsets = [0, 0], sizes = [32, 128], strides = [1, 1]} : vector<64x128xf32> to vector<32x128xf32>
    %cst_120 = arith.constant dense<0.000000e+00> : vector<2x128xf32>
    %251 = tpu.matmul %243, %250, %cst_120 {dimension_numbers = #tpu.dot_dimension_numbers<[1], [0], [0], [1], [0, 0, 1, 1], [], []>} : vector<2x32xf32>, vector<32x128xf32>, vector<2x128xf32> -> vector<2x128xf32>
    %252 = vector.extract_strided_slice %247 {offsets = [32, 0], sizes = [32, 128], strides = [1, 1]} : vector<64x128xf32> to vector<32x128xf32>
    %cst_121 = arith.constant dense<0.000000e+00> : vector<2x128xf32>
    %253 = tpu.matmul %238, %252, %cst_121 {dimension_numbers = #tpu.dot_dimension_numbers<[1], [0], [0], [1], [0, 0, 1, 1], [], []>} : vector<2x32xf32>, vector<32x128xf32>, vector<2x128xf32> -> vector<2x128xf32>
    %254 = arith.addf %251, %253 : vector<2x128xf32>
    %255 = vector.broadcast %249 : vector<1x128xf32> to vector<2x128xf32>
    %256 = arith.addf %254, %255 : vector<2x128xf32>
    %257 = arith.negf %256 : vector<2x128xf32>
    %258 = math.exp %257 : vector<2x128xf32>
    %cst_122 = arith.constant 1.000000e+00 : f32
    %259 = vector.broadcast %cst_122 : f32 to vector<2x128xf32>
    %260 = arith.addf %259, %258 : vector<2x128xf32>
    %261 = arith.divf %259, %260 : vector<2x128xf32>
    %262 = math.tanh %256 : vector<2x128xf32>
    %263 = vector.extract_strided_slice %261 {offsets = [0, 0], sizes = [2, 32], strides = [1, 1]} : vector<2x128xf32> to vector<2x32xf32>
    %264 = vector.extract_strided_slice %261 {offsets = [0, 32], sizes = [2, 32], strides = [1, 1]} : vector<2x128xf32> to vector<2x32xf32>
    %265 = vector.extract_strided_slice %262 {offsets = [0, 64], sizes = [2, 32], strides = [1, 1]} : vector<2x128xf32> to vector<2x32xf32>
    %266 = vector.extract_strided_slice %261 {offsets = [0, 96], sizes = [2, 32], strides = [1, 1]} : vector<2x128xf32> to vector<2x32xf32>
    %267 = arith.mulf %264, %236 : vector<2x32xf32>
    %268 = arith.mulf %263, %265 : vector<2x32xf32>
    %269 = arith.addf %267, %268 : vector<2x32xf32>
    %270 = math.tanh %269 : vector<2x32xf32>
    %271 = arith.mulf %266, %270 : vector<2x32xf32>
    %c0_123 = arith.constant 0 : index
    %c0_124 = arith.constant 0 : index
    %272 = vector.load %arg10[%c0_123, %c0_124] : memref<64x128xf32, #tpu.memory_space<vmem>>, vector<64x128xf32>
    %c0_125 = arith.constant 0 : index
    %c0_126 = arith.constant 0 : index
    %273 = vector.load %arg11[%c0_125, %c0_126] : memref<64x128xf32, #tpu.memory_space<vmem>>, vector<64x128xf32>
    %274 = tpu.iota {dimensions = array<i32: 1>} : vector<1x128xi32>
    %c2_i32 = arith.constant 2 : i32
    %275 = vector.broadcast %c2_i32 : i32 to vector<1x128xi32>
    %276 = arith.cmpi slt, %274, %275 : vector<1x128xi32>
    %277 = arith.extui %276 : vector<1x128xi1> to vector<1x128xi32>
    %278 = arith.sitofp %277 : vector<1x128xi32> to vector<1x128xf32>
    %c0_127 = arith.constant 0 : index
    %c0_128 = arith.constant 0 : index
    %279 = vector.load %arg16[%c0_127, %c0_128] : memref<2x128xf32, #tpu.memory_space<vmem>>, vector<2x128xf32>
    %c0_129 = arith.constant 0 : index
    %c0_130 = arith.constant 0 : index
    %c0_131 = arith.constant 0 : index
    %c0_132 = arith.constant 0 : index
    %280 = vector.load %arg8[%c0_129, %c0_130, %c0_131, %c0_132] : memref<1x4x128x32xf32, #tpu.memory_space<vmem>>, vector<1x1x128x32xf32>
    %281 = vector.shape_cast %280 : vector<1x1x128x32xf32> to vector<128x32xf32>
    %cst_133 = arith.constant dense<0.000000e+00> : vector<2x32xf32>
    %282 = tpu.matmul %279, %281, %cst_133 {dimension_numbers = #tpu.dot_dimension_numbers<[1], [0], [0], [1], [0, 0, 1, 1], [], []>} : vector<2x128xf32>, vector<128x32xf32>, vector<2x32xf32> -> vector<2x32xf32>
    %c0_134 = arith.constant 0 : index
    %c0_135 = arith.constant 0 : index
    %c0_136 = arith.constant 0 : index
    %c0_137 = arith.constant 0 : index
    %283 = vector.load %arg9[%c0_134, %c0_135, %c0_136, %c0_137] : memref<1x4x1x32xf32, #tpu.memory_space<vmem>>, vector<1x1x1x32xf32>
    %284 = vector.shape_cast %283 : vector<1x1x1x32xf32> to vector<1x32xf32>
    %285 = vector.broadcast %284 : vector<1x32xf32> to vector<2x32xf32>
    %286 = arith.addf %282, %285 : vector<2x32xf32>
    %c0_138 = arith.constant 0 : index
    %c0_139 = arith.constant 0 : index
    %c0_140 = arith.constant 0 : index
    %c0_141 = arith.constant 0 : index
    %287 = vector.load %arg12[%c0_138, %c0_139, %c0_140, %c0_141] : memref<1x4x64x128xf32, #tpu.memory_space<vmem>>, vector<1x1x64x128xf32>
    %288 = vector.shape_cast %287 : vector<1x1x64x128xf32> to vector<64x128xf32>
    %289 = arith.mulf %273, %288 : vector<64x128xf32>
    %290 = arith.addf %272, %289 : vector<64x128xf32>
    %c0_142 = arith.constant 0 : index
    %c0_143 = arith.constant 0 : index
    %c0_144 = arith.constant 0 : index
    %c0_145 = arith.constant 0 : index
    %291 = vector.load %arg13[%c0_142, %c0_143, %c0_144, %c0_145] : memref<1x4x1x128xf32, #tpu.memory_space<vmem>>, vector<1x1x1x128xf32>
    %292 = vector.shape_cast %291 : vector<1x1x1x128xf32> to vector<1x128xf32>
    %293 = vector.extract_strided_slice %290 {offsets = [0, 0], sizes = [32, 128], strides = [1, 1]} : vector<64x128xf32> to vector<32x128xf32>
    %cst_146 = arith.constant dense<0.000000e+00> : vector<2x128xf32>
    %294 = tpu.matmul %286, %293, %cst_146 {dimension_numbers = #tpu.dot_dimension_numbers<[1], [0], [0], [1], [0, 0, 1, 1], [], []>} : vector<2x32xf32>, vector<32x128xf32>, vector<2x128xf32> -> vector<2x128xf32>
    %295 = vector.extract_strided_slice %290 {offsets = [32, 0], sizes = [32, 128], strides = [1, 1]} : vector<64x128xf32> to vector<32x128xf32>
    %cst_147 = arith.constant dense<0.000000e+00> : vector<2x128xf32>
    %296 = tpu.matmul %271, %295, %cst_147 {dimension_numbers = #tpu.dot_dimension_numbers<[1], [0], [0], [1], [0, 0, 1, 1], [], []>} : vector<2x32xf32>, vector<32x128xf32>, vector<2x128xf32> -> vector<2x128xf32>
    %297 = arith.addf %294, %296 : vector<2x128xf32>
    %298 = vector.broadcast %292 : vector<1x128xf32> to vector<2x128xf32>
    %299 = arith.addf %297, %298 : vector<2x128xf32>
    %300 = arith.negf %299 : vector<2x128xf32>
    %301 = math.exp %300 : vector<2x128xf32>
    %cst_148 = arith.constant 1.000000e+00 : f32
    %302 = vector.broadcast %cst_148 : f32 to vector<2x128xf32>
    %303 = arith.addf %302, %301 : vector<2x128xf32>
    %304 = arith.divf %302, %303 : vector<2x128xf32>
    %305 = math.tanh %299 : vector<2x128xf32>
    %306 = vector.extract_strided_slice %304 {offsets = [0, 0], sizes = [2, 32], strides = [1, 1]} : vector<2x128xf32> to vector<2x32xf32>
    %307 = vector.extract_strided_slice %304 {offsets = [0, 32], sizes = [2, 32], strides = [1, 1]} : vector<2x128xf32> to vector<2x32xf32>
    %308 = vector.extract_strided_slice %305 {offsets = [0, 64], sizes = [2, 32], strides = [1, 1]} : vector<2x128xf32> to vector<2x32xf32>
    %309 = vector.extract_strided_slice %304 {offsets = [0, 96], sizes = [2, 32], strides = [1, 1]} : vector<2x128xf32> to vector<2x32xf32>
    %310 = arith.mulf %307, %269 : vector<2x32xf32>
    %311 = arith.mulf %306, %308 : vector<2x32xf32>
    %312 = arith.addf %310, %311 : vector<2x32xf32>
    %313 = math.tanh %312 : vector<2x32xf32>
    %314 = arith.mulf %309, %313 : vector<2x32xf32>
    %c0_149 = arith.constant 0 : index
    %c0_150 = arith.constant 0 : index
    %c0_151 = arith.constant 0 : index
    %c0_152 = arith.constant 0 : index
    %315 = vector.load %arg14[%c0_149, %c0_150, %c0_151, %c0_152] : memref<1x4x32x128xf32, #tpu.memory_space<vmem>>, vector<1x1x32x128xf32>
    %316 = vector.shape_cast %315 : vector<1x1x32x128xf32> to vector<32x128xf32>
    %cst_153 = arith.constant dense<0.000000e+00> : vector<2x128xf32>
    %317 = tpu.matmul %314, %316, %cst_153 {dimension_numbers = #tpu.dot_dimension_numbers<[1], [0], [0], [1], [0, 0, 1, 1], [], []>} : vector<2x32xf32>, vector<32x128xf32>, vector<2x128xf32> -> vector<2x128xf32>
    %c0_154 = arith.constant 0 : index
    %c0_155 = arith.constant 0 : index
    %c0_156 = arith.constant 0 : index
    %c0_157 = arith.constant 0 : index
    %318 = vector.load %arg15[%c0_154, %c0_155, %c0_156, %c0_157] : memref<1x4x1x128xf32, #tpu.memory_space<vmem>>, vector<1x1x1x128xf32>
    %319 = vector.shape_cast %318 : vector<1x1x1x128xf32> to vector<1x128xf32>
    %320 = vector.broadcast %319 : vector<1x128xf32> to vector<2x128xf32>
    %321 = arith.addf %317, %320 : vector<2x128xf32>
    %322 = arith.addf %321, %279 : vector<2x128xf32>
    %c0_158 = arith.constant 0 : index
    %c0_159 = arith.constant 0 : index
    %c0_160 = arith.constant 0 : index
    %c0_161 = arith.constant 0 : index
    %323 = vector.load %arg18[%c0_158, %c0_159, %c0_160, %c0_161] : memref<1x4x2x128xf32, #tpu.memory_space<vmem>>, vector<1x1x2x128xf32>
    %324 = vector.shape_cast %323 : vector<1x1x2x128xf32> to vector<2x128xf32>
    %325 = vector.shape_cast %322 : vector<2x128xf32> to vector<1x1x2x128xf32>
    tpu.vector_store %arg18[%c0_158, %c0_159, %c0_160, %c0_161], %325 {strides = array<i32>} : memref<1x4x2x128xf32, #tpu.memory_space<vmem>>, vector<1x1x2x128xf32>,
    %326 = vector.broadcast %278 : vector<1x128xf32> to vector<2x128xf32>
    %327 = arith.mulf %322, %326 : vector<2x128xf32>
    %c0_162 = arith.constant 0 : index
    %c1_163 = arith.constant 1 : index
    %c0_164 = arith.constant 0 : index
    %c0_165 = arith.constant 0 : index
    %328 = vector.load %arg8[%c0_162, %c1_163, %c0_164, %c0_165] : memref<1x4x128x32xf32, #tpu.memory_space<vmem>>, vector<1x1x128x32xf32>
    %329 = vector.shape_cast %328 : vector<1x1x128x32xf32> to vector<128x32xf32>
    %cst_166 = arith.constant dense<0.000000e+00> : vector<2x32xf32>
    %330 = tpu.matmul %327, %329, %cst_166 {dimension_numbers = #tpu.dot_dimension_numbers<[1], [0], [0], [1], [0, 0, 1, 1], [], []>} : vector<2x128xf32>, vector<128x32xf32>, vector<2x32xf32> -> vector<2x32xf32>
    %c0_167 = arith.constant 0 : index
    %c1_168 = arith.constant 1 : index
    %c0_169 = arith.constant 0 : index
    %c0_170 = arith.constant 0 : index
    %331 = vector.load %arg9[%c0_167, %c1_168, %c0_169, %c0_170] : memref<1x4x1x32xf32, #tpu.memory_space<vmem>>, vector<1x1x1x32xf32>
    %332 = vector.shape_cast %331 : vector<1x1x1x32xf32> to vector<1x32xf32>
    %333 = vector.broadcast %332 : vector<1x32xf32> to vector<2x32xf32>
    %334 = arith.addf %330, %333 : vector<2x32xf32>
    %c0_171 = arith.constant 0 : index
    %c1_172 = arith.constant 1 : index
    %c0_173 = arith.constant 0 : index
    %c0_174 = arith.constant 0 : index
    %335 = vector.load %arg12[%c0_171, %c1_172, %c0_173, %c0_174] : memref<1x4x64x128xf32, #tpu.memory_space<vmem>>, vector<1x1x64x128xf32>
    %336 = vector.shape_cast %335 : vector<1x1x64x128xf32> to vector<64x128xf32>
    %337 = arith.mulf %273, %336 : vector<64x128xf32>
    %338 = arith.addf %272, %337 : vector<64x128xf32>
    %c0_175 = arith.constant 0 : index
    %c1_176 = arith.constant 1 : index
    %c0_177 = arith.constant 0 : index
    %c0_178 = arith.constant 0 : index
    %339 = vector.load %arg13[%c0_175, %c1_176, %c0_177, %c0_178] : memref<1x4x1x128xf32, #tpu.memory_space<vmem>>, vector<1x1x1x128xf32>
    %340 = vector.shape_cast %339 : vector<1x1x1x128xf32> to vector<1x128xf32>
    %341 = vector.extract_strided_slice %338 {offsets = [0, 0], sizes = [32, 128], strides = [1, 1]} : vector<64x128xf32> to vector<32x128xf32>
    %cst_179 = arith.constant dense<0.000000e+00> : vector<2x128xf32>
    %342 = tpu.matmul %334, %341, %cst_179 {dimension_numbers = #tpu.dot_dimension_numbers<[1], [0], [0], [1], [0, 0, 1, 1], [], []>} : vector<2x32xf32>, vector<32x128xf32>, vector<2x128xf32> -> vector<2x128xf32>
    %343 = vector.extract_strided_slice %338 {offsets = [32, 0], sizes = [32, 128], strides = [1, 1]} : vector<64x128xf32> to vector<32x128xf32>
    %cst_180 = arith.constant dense<0.000000e+00> : vector<2x128xf32>
    %344 = tpu.matmul %314, %343, %cst_180 {dimension_numbers = #tpu.dot_dimension_numbers<[1], [0], [0], [1], [0, 0, 1, 1], [], []>} : vector<2x32xf32>, vector<32x128xf32>, vector<2x128xf32> -> vector<2x128xf32>
    %345 = arith.addf %342, %344 : vector<2x128xf32>
    %346 = vector.broadcast %340 : vector<1x128xf32> to vector<2x128xf32>
    %347 = arith.addf %345, %346 : vector<2x128xf32>
    %348 = arith.negf %347 : vector<2x128xf32>
    %349 = math.exp %348 : vector<2x128xf32>
    %cst_181 = arith.constant 1.000000e+00 : f32
    %350 = vector.broadcast %cst_181 : f32 to vector<2x128xf32>
    %351 = arith.addf %350, %349 : vector<2x128xf32>
    %352 = arith.divf %350, %351 : vector<2x128xf32>
    %353 = math.tanh %347 : vector<2x128xf32>
    %354 = vector.extract_strided_slice %352 {offsets = [0, 0], sizes = [2, 32], strides = [1, 1]} : vector<2x128xf32> to vector<2x32xf32>
    %355 = vector.extract_strided_slice %352 {offsets = [0, 32], sizes = [2, 32], strides = [1, 1]} : vector<2x128xf32> to vector<2x32xf32>
    %356 = vector.extract_strided_slice %353 {offsets = [0, 64], sizes = [2, 32], strides = [1, 1]} : vector<2x128xf32> to vector<2x32xf32>
    %357 = vector.extract_strided_slice %352 {offsets = [0, 96], sizes = [2, 32], strides = [1, 1]} : vector<2x128xf32> to vector<2x32xf32>
    %358 = arith.mulf %355, %312 : vector<2x32xf32>
    %359 = arith.mulf %354, %356 : vector<2x32xf32>
    %360 = arith.addf %358, %359 : vector<2x32xf32>
    %361 = math.tanh %360 : vector<2x32xf32>
    %362 = arith.mulf %357, %361 : vector<2x32xf32>
    %c0_182 = arith.constant 0 : index
    %c1_183 = arith.constant 1 : index
    %c0_184 = arith.constant 0 : index
    %c0_185 = arith.constant 0 : index
    %363 = vector.load %arg14[%c0_182, %c1_183, %c0_184, %c0_185] : memref<1x4x32x128xf32, #tpu.memory_space<vmem>>, vector<1x1x32x128xf32>
    %364 = vector.shape_cast %363 : vector<1x1x32x128xf32> to vector<32x128xf32>
    %cst_186 = arith.constant dense<0.000000e+00> : vector<2x128xf32>
    %365 = tpu.matmul %362, %364, %cst_186 {dimension_numbers = #tpu.dot_dimension_numbers<[1], [0], [0], [1], [0, 0, 1, 1], [], []>} : vector<2x32xf32>, vector<32x128xf32>, vector<2x128xf32> -> vector<2x128xf32>
    %c0_187 = arith.constant 0 : index
    %c1_188 = arith.constant 1 : index
    %c0_189 = arith.constant 0 : index
    %c0_190 = arith.constant 0 : index
    %366 = vector.load %arg15[%c0_187, %c1_188, %c0_189, %c0_190] : memref<1x4x1x128xf32, #tpu.memory_space<vmem>>, vector<1x1x1x128xf32>
    %367 = vector.shape_cast %366 : vector<1x1x1x128xf32> to vector<1x128xf32>
    %368 = vector.broadcast %367 : vector<1x128xf32> to vector<2x128xf32>
    %369 = arith.addf %365, %368 : vector<2x128xf32>
    %370 = arith.addf %369, %327 : vector<2x128xf32>
    %c0_191 = arith.constant 0 : index
    %c1_192 = arith.constant 1 : index
    %c0_193 = arith.constant 0 : index
    %c0_194 = arith.constant 0 : index
    %371 = vector.load %arg18[%c0_191, %c1_192, %c0_193, %c0_194] : memref<1x4x2x128xf32, #tpu.memory_space<vmem>>, vector<1x1x2x128xf32>
    %372 = vector.shape_cast %371 : vector<1x1x2x128xf32> to vector<2x128xf32>
    %373 = vector.shape_cast %370 : vector<2x128xf32> to vector<1x1x2x128xf32>
    tpu.vector_store %arg18[%c0_191, %c1_192, %c0_193, %c0_194], %373 {strides = array<i32>} : memref<1x4x2x128xf32, #tpu.memory_space<vmem>>, vector<1x1x2x128xf32>,
    %374 = vector.broadcast %278 : vector<1x128xf32> to vector<2x128xf32>
    %375 = arith.mulf %370, %374 : vector<2x128xf32>
    %c0_195 = arith.constant 0 : index
    %c2_196 = arith.constant 2 : index
    %c0_197 = arith.constant 0 : index
    %c0_198 = arith.constant 0 : index
    %376 = vector.load %arg8[%c0_195, %c2_196, %c0_197, %c0_198] : memref<1x4x128x32xf32, #tpu.memory_space<vmem>>, vector<1x1x128x32xf32>
    %377 = vector.shape_cast %376 : vector<1x1x128x32xf32> to vector<128x32xf32>
    %cst_199 = arith.constant dense<0.000000e+00> : vector<2x32xf32>
    %378 = tpu.matmul %375, %377, %cst_199 {dimension_numbers = #tpu.dot_dimension_numbers<[1], [0], [0], [1], [0, 0, 1, 1], [], []>} : vector<2x128xf32>, vector<128x32xf32>, vector<2x32xf32> -> vector<2x32xf32>
    %c0_200 = arith.constant 0 : index
    %c2_201 = arith.constant 2 : index
    %c0_202 = arith.constant 0 : index
    %c0_203 = arith.constant 0 : index
    %379 = vector.load %arg9[%c0_200, %c2_201, %c0_202, %c0_203] : memref<1x4x1x32xf32, #tpu.memory_space<vmem>>, vector<1x1x1x32xf32>
    %380 = vector.shape_cast %379 : vector<1x1x1x32xf32> to vector<1x32xf32>
    %381 = vector.broadcast %380 : vector<1x32xf32> to vector<2x32xf32>
    %382 = arith.addf %378, %381 : vector<2x32xf32>
    %c0_204 = arith.constant 0 : index
    %c2_205 = arith.constant 2 : index
    %c0_206 = arith.constant 0 : index
    %c0_207 = arith.constant 0 : index
    %383 = vector.load %arg12[%c0_204, %c2_205, %c0_206, %c0_207] : memref<1x4x64x128xf32, #tpu.memory_space<vmem>>, vector<1x1x64x128xf32>
    %384 = vector.shape_cast %383 : vector<1x1x64x128xf32> to vector<64x128xf32>
    %385 = arith.mulf %273, %384 : vector<64x128xf32>
    %386 = arith.addf %272, %385 : vector<64x128xf32>
    %c0_208 = arith.constant 0 : index
    %c2_209 = arith.constant 2 : index
    %c0_210 = arith.constant 0 : index
    %c0_211 = arith.constant 0 : index
    %387 = vector.load %arg13[%c0_208, %c2_209, %c0_210, %c0_211] : memref<1x4x1x128xf32, #tpu.memory_space<vmem>>, vector<1x1x1x128xf32>
    %388 = vector.shape_cast %387 : vector<1x1x1x128xf32> to vector<1x128xf32>
    %389 = vector.extract_strided_slice %386 {offsets = [0, 0], sizes = [32, 128], strides = [1, 1]} : vector<64x128xf32> to vector<32x128xf32>
    %cst_212 = arith.constant dense<0.000000e+00> : vector<2x128xf32>
    %390 = tpu.matmul %382, %389, %cst_212 {dimension_numbers = #tpu.dot_dimension_numbers<[1], [0], [0], [1], [0, 0, 1, 1], [], []>} : vector<2x32xf32>, vector<32x128xf32>, vector<2x128xf32> -> vector<2x128xf32>
    %391 = vector.extract_strided_slice %386 {offsets = [32, 0], sizes = [32, 128], strides = [1, 1]} : vector<64x128xf32> to vector<32x128xf32>
    %cst_213 = arith.constant dense<0.000000e+00> : vector<2x128xf32>
    %392 = tpu.matmul %362, %391, %cst_213 {dimension_numbers = #tpu.dot_dimension_numbers<[1], [0], [0], [1], [0, 0, 1, 1], [], []>} : vector<2x32xf32>, vector<32x128xf32>, vector<2x128xf32> -> vector<2x128xf32>
    %393 = arith.addf %390, %392 : vector<2x128xf32>
    %394 = vector.broadcast %388 : vector<1x128xf32> to vector<2x128xf32>
    %395 = arith.addf %393, %394 : vector<2x128xf32>
    %396 = arith.negf %395 : vector<2x128xf32>
    %397 = math.exp %396 : vector<2x128xf32>
    %cst_214 = arith.constant 1.000000e+00 : f32
    %398 = vector.broadcast %cst_214 : f32 to vector<2x128xf32>
    %399 = arith.addf %398, %397 : vector<2x128xf32>
    %400 = arith.divf %398, %399 : vector<2x128xf32>
    %401 = math.tanh %395 : vector<2x128xf32>
    %402 = vector.extract_strided_slice %400 {offsets = [0, 0], sizes = [2, 32], strides = [1, 1]} : vector<2x128xf32> to vector<2x32xf32>
    %403 = vector.extract_strided_slice %400 {offsets = [0, 32], sizes = [2, 32], strides = [1, 1]} : vector<2x128xf32> to vector<2x32xf32>
    %404 = vector.extract_strided_slice %401 {offsets = [0, 64], sizes = [2, 32], strides = [1, 1]} : vector<2x128xf32> to vector<2x32xf32>
    %405 = vector.extract_strided_slice %400 {offsets = [0, 96], sizes = [2, 32], strides = [1, 1]} : vector<2x128xf32> to vector<2x32xf32>
    %406 = arith.mulf %403, %360 : vector<2x32xf32>
    %407 = arith.mulf %402, %404 : vector<2x32xf32>
    %408 = arith.addf %406, %407 : vector<2x32xf32>
    %409 = math.tanh %408 : vector<2x32xf32>
    %410 = arith.mulf %405, %409 : vector<2x32xf32>
    %c0_215 = arith.constant 0 : index
    %c2_216 = arith.constant 2 : index
    %c0_217 = arith.constant 0 : index
    %c0_218 = arith.constant 0 : index
    %411 = vector.load %arg14[%c0_215, %c2_216, %c0_217, %c0_218] : memref<1x4x32x128xf32, #tpu.memory_space<vmem>>, vector<1x1x32x128xf32>
    %412 = vector.shape_cast %411 : vector<1x1x32x128xf32> to vector<32x128xf32>
    %cst_219 = arith.constant dense<0.000000e+00> : vector<2x128xf32>
    %413 = tpu.matmul %410, %412, %cst_219 {dimension_numbers = #tpu.dot_dimension_numbers<[1], [0], [0], [1], [0, 0, 1, 1], [], []>} : vector<2x32xf32>, vector<32x128xf32>, vector<2x128xf32> -> vector<2x128xf32>
    %c0_220 = arith.constant 0 : index
    %c2_221 = arith.constant 2 : index
    %c0_222 = arith.constant 0 : index
    %c0_223 = arith.constant 0 : index
    %414 = vector.load %arg15[%c0_220, %c2_221, %c0_222, %c0_223] : memref<1x4x1x128xf32, #tpu.memory_space<vmem>>, vector<1x1x1x128xf32>
    %415 = vector.shape_cast %414 : vector<1x1x1x128xf32> to vector<1x128xf32>
    %416 = vector.broadcast %415 : vector<1x128xf32> to vector<2x128xf32>
    %417 = arith.addf %413, %416 : vector<2x128xf32>
    %418 = arith.addf %417, %375 : vector<2x128xf32>
    %c0_224 = arith.constant 0 : index
    %c2_225 = arith.constant 2 : index
    %c0_226 = arith.constant 0 : index
    %c0_227 = arith.constant 0 : index
    %419 = vector.load %arg18[%c0_224, %c2_225, %c0_226, %c0_227] : memref<1x4x2x128xf32, #tpu.memory_space<vmem>>, vector<1x1x2x128xf32>
    %420 = vector.shape_cast %419 : vector<1x1x2x128xf32> to vector<2x128xf32>
    %421 = vector.shape_cast %418 : vector<2x128xf32> to vector<1x1x2x128xf32>
    tpu.vector_store %arg18[%c0_224, %c2_225, %c0_226, %c0_227], %421 {strides = array<i32>} : memref<1x4x2x128xf32, #tpu.memory_space<vmem>>, vector<1x1x2x128xf32>,
    %422 = vector.broadcast %278 : vector<1x128xf32> to vector<2x128xf32>
    %423 = arith.mulf %418, %422 : vector<2x128xf32>
    %c0_228 = arith.constant 0 : index
    %c3_229 = arith.constant 3 : index
    %c0_230 = arith.constant 0 : index
    %c0_231 = arith.constant 0 : index
    %424 = vector.load %arg8[%c0_228, %c3_229, %c0_230, %c0_231] : memref<1x4x128x32xf32, #tpu.memory_space<vmem>>, vector<1x1x128x32xf32>
    %425 = vector.shape_cast %424 : vector<1x1x128x32xf32> to vector<128x32xf32>
    %cst_232 = arith.constant dense<0.000000e+00> : vector<2x32xf32>
    %426 = tpu.matmul %423, %425, %cst_232 {dimension_numbers = #tpu.dot_dimension_numbers<[1], [0], [0], [1], [0, 0, 1, 1], [], []>} : vector<2x128xf32>, vector<128x32xf32>, vector<2x32xf32> -> vector<2x32xf32>
    %c0_233 = arith.constant 0 : index
    %c3_234 = arith.constant 3 : index
    %c0_235 = arith.constant 0 : index
    %c0_236 = arith.constant 0 : index
    %427 = vector.load %arg9[%c0_233, %c3_234, %c0_235, %c0_236] : memref<1x4x1x32xf32, #tpu.memory_space<vmem>>, vector<1x1x1x32xf32>
    %428 = vector.shape_cast %427 : vector<1x1x1x32xf32> to vector<1x32xf32>
    %429 = vector.broadcast %428 : vector<1x32xf32> to vector<2x32xf32>
    %430 = arith.addf %426, %429 : vector<2x32xf32>
    %c0_237 = arith.constant 0 : index
    %c3_238 = arith.constant 3 : index
    %c0_239 = arith.constant 0 : index
    %c0_240 = arith.constant 0 : index
    %431 = vector.load %arg12[%c0_237, %c3_238, %c0_239, %c0_240] : memref<1x4x64x128xf32, #tpu.memory_space<vmem>>, vector<1x1x64x128xf32>
    %432 = vector.shape_cast %431 : vector<1x1x64x128xf32> to vector<64x128xf32>
    %433 = arith.mulf %273, %432 : vector<64x128xf32>
    %434 = arith.addf %272, %433 : vector<64x128xf32>
    %c0_241 = arith.constant 0 : index
    %c3_242 = arith.constant 3 : index
    %c0_243 = arith.constant 0 : index
    %c0_244 = arith.constant 0 : index
    %435 = vector.load %arg13[%c0_241, %c3_242, %c0_243, %c0_244] : memref<1x4x1x128xf32, #tpu.memory_space<vmem>>, vector<1x1x1x128xf32>
    %436 = vector.shape_cast %435 : vector<1x1x1x128xf32> to vector<1x128xf32>
    %437 = vector.extract_strided_slice %434 {offsets = [0, 0], sizes = [32, 128], strides = [1, 1]} : vector<64x128xf32> to vector<32x128xf32>
    %cst_245 = arith.constant dense<0.000000e+00> : vector<2x128xf32>
    %438 = tpu.matmul %430, %437, %cst_245 {dimension_numbers = #tpu.dot_dimension_numbers<[1], [0], [0], [1], [0, 0, 1, 1], [], []>} : vector<2x32xf32>, vector<32x128xf32>, vector<2x128xf32> -> vector<2x128xf32>
    %439 = vector.extract_strided_slice %434 {offsets = [32, 0], sizes = [32, 128], strides = [1, 1]} : vector<64x128xf32> to vector<32x128xf32>
    %cst_246 = arith.constant dense<0.000000e+00> : vector<2x128xf32>
    %440 = tpu.matmul %410, %439, %cst_246 {dimension_numbers = #tpu.dot_dimension_numbers<[1], [0], [0], [1], [0, 0, 1, 1], [], []>} : vector<2x32xf32>, vector<32x128xf32>, vector<2x128xf32> -> vector<2x128xf32>
    %441 = arith.addf %438, %440 : vector<2x128xf32>
    %442 = vector.broadcast %436 : vector<1x128xf32> to vector<2x128xf32>
    %443 = arith.addf %441, %442 : vector<2x128xf32>
    %444 = arith.negf %443 : vector<2x128xf32>
    %445 = math.exp %444 : vector<2x128xf32>
    %cst_247 = arith.constant 1.000000e+00 : f32
    %446 = vector.broadcast %cst_247 : f32 to vector<2x128xf32>
    %447 = arith.addf %446, %445 : vector<2x128xf32>
    %448 = arith.divf %446, %447 : vector<2x128xf32>
    %449 = math.tanh %443 : vector<2x128xf32>
    %450 = vector.extract_strided_slice %448 {offsets = [0, 0], sizes = [2, 32], strides = [1, 1]} : vector<2x128xf32> to vector<2x32xf32>
    %451 = vector.extract_strided_slice %448 {offsets = [0, 32], sizes = [2, 32], strides = [1, 1]} : vector<2x128xf32> to vector<2x32xf32>
    %452 = vector.extract_strided_slice %449 {offsets = [0, 64], sizes = [2, 32], strides = [1, 1]} : vector<2x128xf32> to vector<2x32xf32>
    %453 = vector.extract_strided_slice %448 {offsets = [0, 96], sizes = [2, 32], strides = [1, 1]} : vector<2x128xf32> to vector<2x32xf32>
    %454 = arith.mulf %451, %408 : vector<2x32xf32>
    %455 = arith.mulf %450, %452 : vector<2x32xf32>
    %456 = arith.addf %454, %455 : vector<2x32xf32>
    %457 = math.tanh %456 : vector<2x32xf32>
    %458 = arith.mulf %453, %457 : vector<2x32xf32>
    %c0_248 = arith.constant 0 : index
    %c3_249 = arith.constant 3 : index
    %c0_250 = arith.constant 0 : index
    %c0_251 = arith.constant 0 : index
    %459 = vector.load %arg14[%c0_248, %c3_249, %c0_250, %c0_251] : memref<1x4x32x128xf32, #tpu.memory_space<vmem>>, vector<1x1x32x128xf32>
    %460 = vector.shape_cast %459 : vector<1x1x32x128xf32> to vector<32x128xf32>
    %cst_252 = arith.constant dense<0.000000e+00> : vector<2x128xf32>
    %461 = tpu.matmul %458, %460, %cst_252 {dimension_numbers = #tpu.dot_dimension_numbers<[1], [0], [0], [1], [0, 0, 1, 1], [], []>} : vector<2x32xf32>, vector<32x128xf32>, vector<2x128xf32> -> vector<2x128xf32>
    %c0_253 = arith.constant 0 : index
    %c3_254 = arith.constant 3 : index
    %c0_255 = arith.constant 0 : index
    %c0_256 = arith.constant 0 : index
    %462 = vector.load %arg15[%c0_253, %c3_254, %c0_255, %c0_256] : memref<1x4x1x128xf32, #tpu.memory_space<vmem>>, vector<1x1x1x128xf32>
    %463 = vector.shape_cast %462 : vector<1x1x1x128xf32> to vector<1x128xf32>
    %464 = vector.broadcast %463 : vector<1x128xf32> to vector<2x128xf32>
    %465 = arith.addf %461, %464 : vector<2x128xf32>
    %466 = arith.addf %465, %423 : vector<2x128xf32>
    %c0_257 = arith.constant 0 : index
    %c3_258 = arith.constant 3 : index
    %c0_259 = arith.constant 0 : index
    %c0_260 = arith.constant 0 : index
    %467 = vector.load %arg18[%c0_257, %c3_258, %c0_259, %c0_260] : memref<1x4x2x128xf32, #tpu.memory_space<vmem>>, vector<1x1x2x128xf32>
    %468 = vector.shape_cast %467 : vector<1x1x2x128xf32> to vector<2x128xf32>
    %469 = vector.shape_cast %466 : vector<2x128xf32> to vector<1x1x2x128xf32>
    tpu.vector_store %arg18[%c0_257, %c3_258, %c0_259, %c0_260], %469 {strides = array<i32>} : memref<1x4x2x128xf32, #tpu.memory_space<vmem>>, vector<1x1x2x128xf32>,
    return
  }
  func.func @transform_0(%arg0: i32) -> (i32, i32, i32) {
    %c0_i32 = arith.constant 0 : i32
    %c0_i32_0 = arith.constant 0 : i32
    %c0_i32_1 = arith.constant 0 : i32
    %c0_i32_2 = arith.constant 0 : i32
    return %c0_i32, %c0_i32_0, %c0_i32_1 : i32, i32, i32
  }
  func.func @transform_1(%arg0: i32) -> (i32, i32, i32) {
    %c0_i32 = arith.constant 0 : i32
    %c0_i32_0 = arith.constant 0 : i32
    %c0_i32_1 = arith.constant 0 : i32
    return %arg0, %c0_i32, %c0_i32_0 : i32, i32, i32
  }
  func.func @transform_2(%arg0: i32) -> (i32, i32, i32) {
    %c0_i32 = arith.constant 0 : i32
    %c0_i32_0 = arith.constant 0 : i32
    %c0_i32_1 = arith.constant 0 : i32
    return %arg0, %c0_i32, %c0_i32_0 : i32, i32, i32
  }
  func.func @transform_3(%arg0: i32) -> (i32, i32) {
    %c0_i32 = arith.constant 0 : i32
    %c0_i32_0 = arith.constant 0 : i32
    %c0_i32_1 = arith.constant 0 : i32
    return %c0_i32, %c0_i32_0 : i32, i32
  }
  func.func @transform_4(%arg0: i32) -> (i32, i32) {
    %c0_i32 = arith.constant 0 : i32
    %c0_i32_0 = arith.constant 0 : i32
    %c0_i32_1 = arith.constant 0 : i32
    return %c0_i32, %c0_i32_0 : i32, i32
  }
  func.func @transform_5(%arg0: i32) -> (i32, i32, i32, i32) {
    %c0_i32 = arith.constant 0 : i32
    %c0_i32_0 = arith.constant 0 : i32
    %c0_i32_1 = arith.constant 0 : i32
    %c0_i32_2 = arith.constant 0 : i32
    return %arg0, %c0_i32, %c0_i32_0, %c0_i32_1 : i32, i32, i32, i32
  }
  func.func @transform_6(%arg0: i32) -> (i32, i32, i32, i32) {
    %c0_i32 = arith.constant 0 : i32
    %c0_i32_0 = arith.constant 0 : i32
    %c0_i32_1 = arith.constant 0 : i32
    %c0_i32_2 = arith.constant 0 : i32
    return %arg0, %c0_i32, %c0_i32_0, %c0_i32_1 : i32, i32, i32, i32
  }
  func.func @transform_7(%arg0: i32) -> (i32, i32, i32, i32) {
    %c0_i32 = arith.constant 0 : i32
    %c0_i32_0 = arith.constant 0 : i32
    %c0_i32_1 = arith.constant 0 : i32
    %c0_i32_2 = arith.constant 0 : i32
    return %arg0, %c0_i32, %c0_i32_0, %c0_i32_1 : i32, i32, i32, i32
  }
  func.func @transform_8(%arg0: i32) -> (i32, i32, i32, i32) {
    %c0_i32 = arith.constant 0 : i32
    %c0_i32_0 = arith.constant 0 : i32
    %c0_i32_1 = arith.constant 0 : i32
    %c0_i32_2 = arith.constant 0 : i32
    return %arg0, %c0_i32, %c0_i32_0, %c0_i32_1 : i32, i32, i32, i32
  }
  func.func @transform_9(%arg0: i32) -> (i32, i32) {
    %c0_i32 = arith.constant 0 : i32
    %c0_i32_0 = arith.constant 0 : i32
    %c0_i32_1 = arith.constant 0 : i32
    return %c0_i32, %c0_i32_0 : i32, i32
  }
  func.func @transform_10(%arg0: i32) -> (i32, i32) {
    %c0_i32 = arith.constant 0 : i32
    %c0_i32_0 = arith.constant 0 : i32
    %c0_i32_1 = arith.constant 0 : i32
    return %c0_i32, %c0_i32_0 : i32, i32
  }
  func.func @transform_11(%arg0: i32) -> (i32, i32, i32, i32) {
    %c0_i32 = arith.constant 0 : i32
    %c0_i32_0 = arith.constant 0 : i32
    %c0_i32_1 = arith.constant 0 : i32
    %c0_i32_2 = arith.constant 0 : i32
    return %arg0, %c0_i32, %c0_i32_0, %c0_i32_1 : i32, i32, i32, i32
  }
  func.func @transform_12(%arg0: i32) -> (i32, i32, i32, i32) {
    %c0_i32 = arith.constant 0 : i32
    %c0_i32_0 = arith.constant 0 : i32
    %c0_i32_1 = arith.constant 0 : i32
    %c0_i32_2 = arith.constant 0 : i32
    return %arg0, %c0_i32, %c0_i32_0, %c0_i32_1 : i32, i32, i32, i32
  }
  func.func @transform_13(%arg0: i32) -> (i32, i32, i32, i32) {
    %c0_i32 = arith.constant 0 : i32
    %c0_i32_0 = arith.constant 0 : i32
    %c0_i32_1 = arith.constant 0 : i32
    %c0_i32_2 = arith.constant 0 : i32
    return %arg0, %c0_i32, %c0_i32_0, %c0_i32_1 : i32, i32, i32, i32
  }
  func.func @transform_14(%arg0: i32) -> (i32, i32, i32, i32) {
    %c0_i32 = arith.constant 0 : i32
    %c0_i32_0 = arith.constant 0 : i32
    %c0_i32_1 = arith.constant 0 : i32
    %c0_i32_2 = arith.constant 0 : i32
    return %arg0, %c0_i32, %c0_i32_0, %c0_i32_1 : i32, i32, i32, i32
  }
  func.func @transform_15(%arg0: i32) -> (i32, i32) {
    %c0_i32 = arith.constant 0 : i32
    %c0_i32_0 = arith.constant 0 : i32
    %c0_i32_1 = arith.constant 0 : i32
    return %c0_i32, %c0_i32_0 : i32, i32
  }
  func.func @transform_16(%arg0: i32) -> (i32, i32, i32) {
    %c0_i32 = arith.constant 0 : i32
    %c0_i32_0 = arith.constant 0 : i32
    %c0_i32_1 = arith.constant 0 : i32
    %c0_i32_2 = arith.constant 0 : i32
    return %c0_i32, %c0_i32_0, %c0_i32_1 : i32, i32, i32
  }
  func.func @transform_17(%arg0: i32) -> (i32, i32, i32, i32) {
    %c0_i32 = arith.constant 0 : i32
    %c0_i32_0 = arith.constant 0 : i32
    %c0_i32_1 = arith.constant 0 : i32
    %c0_i32_2 = arith.constant 0 : i32
    return %arg0, %c0_i32, %c0_i32_0, %c0_i32_1 : i32, i32, i32, i32
  }
}

</mosaic_0001>

<bundles_post_ra>
// kernel: forward.1
= control target key start
LH: loop header
LB: loop body
LE: loop exit
PB: predicated region body
PF: predicated region fallthrough
CT: control target
= control target key end

     0   :  { %s6188_s24 = smov 0   ;;  %s7249_s0 = inlined_call_operand.vmem [shape: f32[8,2,2], index: 0, kind: input, shape index: {}]   ;;  %s7250_s1 = inlined_call_operand.vmem [shape: f32[2,2,32], index: 1, kind: input, shape index: {}]   ;;  %s7251_s2 = inlined_call_operand.vmem [shape: f32[2,1,32], index: 2, kind: input, shape index: {}]   ;;  %s7252_s3 = inlined_call_operand.vmem [shape: f32[64,128], index: 3, kind: input, shape index: {}]   ;;  %s7253_s4 = inlined_call_operand.vmem [shape: f32[64,128], index: 4, kind: input, shape index: {}]   ;;  %s7254_s5 = inlined_call_operand.vmem [shape: f32[2,8,64,128], index: 5, kind: input, shape index: {}]   ;;  %s7255_s6 = inlined_call_operand.vmem [shape: f32[2,8,1,128], index: 6, kind: input, shape index: {}]   ;;  %s7256_s7 = inlined_call_operand.vmem [shape: f32[2,4,128,32], index: 7, kind: input, shape index: {}]   ;;  %s7257_s8 = inlined_call_operand.vmem [shape: f32[2,4,1,32], index: 8, kind: input, shape index: {}]   ;;  %s7258_s9 = inlined_call_operand.vmem [shape: f32[64,128], index: 9, kind: input, shape index: {}]   ;;  %s7259_s10 = inlined_call_operand.vmem [shape: f32[64,128], index: 10, kind: input, shape index: {}]   ;;  %s7260_s11 = inlined_call_operand.vmem [shape: f32[2,4,64,128], index: 11, kind: input, shape index: {}]   ;;  %s7261_s12 = inlined_call_operand.vmem [shape: f32[2,4,1,128], index: 12, kind: input, shape index: {}]   ;;  %s7262_s13 = inlined_call_operand.vmem [shape: f32[2,4,32,128], index: 13, kind: input, shape index: {}]   ;;  %s7263_s14 = inlined_call_operand.vmem [shape: f32[2,4,1,128], index: 14, kind: input, shape index: {}]   ;;  %s7264_s15 = inlined_call_operand.vmem [shape: f32[2,128], index: 15, kind: input, shape index: {}]   ;;  %s7265_s16 = inlined_call_operand.vmem [shape: f32[4,2,128], index: 16, kind: input, shape index: {}]   ;;  %s7266_s17 = inlined_call_operand.vmem [shape: f32[2,4,2,128], index: 17, kind: output, shape index: {}]  }
   0x1   :  { %7274 = sst [smem:[#allocation2_spill]] %s7249_s0 }
   0x2   :  { %7275 = sst [smem:[#allocation3_spill]] %s7250_s1 }
   0x3   :  { %7276 = sst [smem:[#allocation4_spill]] %s7251_s2 }
   0x4 LB: > { %s4712_s25 = sadd.s32 4294967295, %s6091_s24   ;;  %p4716_p0 = scmp.ge.s32.totalorder %s6091_s24, 1  ;;  %s6091_s24 = sphi %s6188_s24, %s27_s24  }
   0x5   : > { %p570_p1 = scmp.lt.s32.totalorder %s6091_s24, 3 }
   0x7   : > { %p571_p2 = pnand %p4716_p0, %p570_p1 }
   0x8   : > { %p660_p3 = scmp.lt.s32.totalorder (!%p571_p2), %s4712_s25, 1  ;;  %v6093_v0 = vmov (!%p571_p2), 0.0   ;;  %vm6094_vm0 = vmmov (!%p571_p2), 0   ;;  %v6095_v1 = vmov (!%p571_p2), 0.0|0.0   ;;  %s7277_s27 = sld [smem:[#allocation2_spill]] (!%p571_p2)  ;;  %v6210_v3 = vld [vmem:[%s7253_s4 + $0x20] sm:$0xff] (!%p571_p2) }
   0x9   : > { %574 = sbr.rel (%p571_p2) target bundleno = 10204 (0x27dc), region = 88  ;;  %5206 = vmatprep.subr.mxu0 (!%p571_p2), %v6093_v0  ;;  %5208 = vmatprep.mubr.msk.f32.mxu0 (!%p571_p2), %vm6094_vm0, %v6093_v0  ;;  %vm737_vm1 = vcmask (!%p571_p2), 1041408   ;;  %v6217_v4 = vld [vmem:[%s7252_s3 + $0x20] sm:$0xff] (!%p571_p2)  ;;  %v6222_v5 = vld [vmem:[%s7252_s3 + $0x28] sm:$0xff] (!%p571_p2)  ;;  %s7278_s19 = sld [smem:[#allocation3_spill]] (!%p571_p2)  ;;  %vm733_vm2 = vcmask (!%p571_p2), 15360  }
   0xa   : > { %5694 = vmatprep.subr.bf16.mxu1 (!%p571_p2), %v6095_v1  ;;  %5219 = vmatprep.mubr.msk.f32.mxu1 (!%p571_p2), %vm6094_vm0, %v6093_v0  ;;  %v6227_v6 = vld [vmem:[%s7253_s4 + $0x28] sm:$0xff] (!%p571_p2)  ;;  %v6232_v7 = vld [vmem:[%s7253_s4] sm:$0xff] (!%p571_p2)  ;;  %v6264_v11 = vld [vmem:[%s7252_s3 + $0x30] sm:$0xff] (!%p571_p2)  ;;  %s7279_s2 = sld [smem:[#allocation4_spill]] (!%p571_p2)  ;;  %vm836_vm3 = vcmask (!%p571_p2), 261120   ;;  %s7270_s20 = smov (!%p571_p2), 32  }
   0xb   : > { %v6237_v8 = vld [vmem:[%s7253_s4 + $0x8] sm:$0xff] (!%p571_p2)  ;;  %v6254_v9 = vld [vmem:[%s7252_s3] sm:$0xff] (!%p571_p2)  ;;  %v6269_v12 = vld [vmem:[%s7253_s4 + $0x30] sm:$0xff] (!%p571_p2) }
   0xc   : > { %v6259_v10 = vld [vmem:[%s7252_s3 + $0x8] sm:$0xff] (!%p571_p2)  ;;  %v6274_v13 = vld [vmem:[%s7253_s4 + $0x38] sm:$0xff] (!%p571_p2)  ;;  %v6320_v37 = vld [vmem:[%s7253_s4 + $0x10] sm:$0xff] (!%p571_p2) }
   0xd   : > { %v6295_v24 = vld [vmem:[%s7252_s3 + $0x38] sm:$0xff] (!%p571_p2)  ;;  %v6333_v42 = vld [vmem:[%s7252_s3 + $0x10] sm:$0xff] (!%p571_p2) }
   0xe   : > { %v726_v2 = vld [vmem:[%s7277_s27] sm:$0x3] (!%p571_p2)  ;;  %v6325_v38 = vld [vmem:[%s7253_s4 + $0x18] sm:$0xff] (!%p571_p2) }
   0xf   : > { %v6338_v43 = vld [vmem:[%s7252_s3 + $0x18] sm:$0xff] (!%p571_p2) }
  0x10   : > { %s7285_s25 = smov (!%p660_p3, %s4712_s25), 1 }
  0x11   : > { %s4717_s0 = sshll.u32 %s7285_s25, 1  ;;  %s7269_s30 = sshll.u32 %s7285_s25, 9 }
  0x12   : > { %s6242_s1 = scalar_lea.vmem %s7278_s19, %s4717_s0  ;;  %s6249_s22 = scalar_lea.vmem %s7254_s5, %s7269_s30 }
  0x13   : > { %v6277_v14 = vld [vmem:[%s6242_s1] sm:$0x3]  ;;  %v816_v16 = vld [vmem:[%s6249_s22 + $0x28] sm:$0xff]  ;;  %v817_v21 = vld [vmem:[%s6249_s22 + $0x30] sm:$0xff]  ;;  %s6348_s0 = scalar_lea.vmem %s7279_s2, %s7285_s25  ;;  %s7268_s26 = sshll.u32 %s7285_s25, 3 }
  0x14   : > { %v815_v15 = vld [vmem:[%s6249_s22 + $0x20] sm:$0xff]  ;;  %5207 = vmatpush3.msk.msra.mxu0 %vm737_vm1, %v6277_v14  ;;  %v824_v18 = vmul.f32 %v816_v16, %v6227_v6  ;;  %v812_v20 = vld [vmem:[%s6249_s22 + $0x8] sm:$0xff]  ;;  %v818_v25 = vld [vmem:[%s6249_s22 + $0x38] sm:$0xff]  ;;  %v825_v26 = vmul.f32 %v817_v21, %v6269_v12  ;;  %s6363_s18 = scalar_lea.vmem %s7255_s6, %s7268_s26  ;;  %s7272_s19 = smov 64  }
  0x15   : > { %v823_v17 = vmul.f32 %v815_v15, %v6210_v3  ;;  %v811_v19 = vld [vmem:[%s6249_s22] sm:$0xff]  ;;  %5209 = vmatmul.mubr.msk.f32.vlgmr.msra.gmra.mrb[0].mxu0 %vm733_vm2, %v726_v2  ;;  %5700 = vmatprep.subr.bf16.mxu0 %v6095_v1  ;;  %v820_v23 = vmul.f32 %v812_v20, %v6237_v8  ;;  %v826_v29 = vmul.f32 %v818_v25, %v6274_v13  ;;  %v813_v39 = vld [vmem:[%s6249_s22 + $0x10] sm:$0xff]  ;;  %v814_v40 = vld [vmem:[%s6249_s22 + $0x18] sm:$0xff]  ;;  %s4979_s29 = sshll.u32 %s7285_s25, 8  ;;  %s6933_s28 = sshll.u32 %s7285_s25, 2 }
  0x16   : > { %v819_v22 = vmul.f32 %v811_v19, %v6232_v7  ;;  %v832_v28 = vadd.f32 %v824_v18, %v6222_v5  ;;  %5230 = vmatprep.mubr.msk.f32.mxu0 %vm6094_vm0, %v6093_v0  ;;  %v833_v32 = vadd.f32 %v825_v26, %v6264_v11  ;;  %v821_v41 = vmul.f32 %v813_v39, %v6320_v37  ;;  %v6351_v48 = vld [vmem:[%s6348_s0] ss:$0 sm:$0xff]  ;;  %v4738_v16 = vld [vmem:[%s7277_s27 + $0x2] sm:$0x3]  ;;  %v4742_v21 = vld [vmem:[%s6249_s22 + $0x48] sm:$0xff]  ;;  %s6820_s23 = scalar_lea.vmem %s7260_s11, %s4979_s29  ;;  %s6956_s16 = scalar_lea.vmem %s7261_s12, %s6933_s28 }
  0x17   : > { %v831_v27 = vadd.f32 %v823_v17, %v6217_v4  ;;  %v828_v31 = vadd.f32 %v820_v23, %v6259_v10  ;;  %v834_v34 = vadd.f32 %v826_v29, %v6295_v24  ;;  %v822_v44 = vmul.f32 %v814_v40, %v6325_v38  ;;  %v4736_v54 = vld [vmem:[%s6363_s18] ss:$0 sm:$0xff]  ;;  %v4746_v26 = vld [vmem:[%s6249_s22 + $0x68] sm:$0xff]  ;;  %v4744_v29 = vld [vmem:[%s6249_s22 + $0x58] sm:$0xff]  ;;  %s4980_s30 = sshll.u32 %s7285_s25, 7 }
  0x18   : > { %v827_v30 = vadd.f32 %v819_v22, %v6254_v9  ;;  %v829_v45 = vadd.f32 %v821_v41, %v6333_v42  ;;  %v4741_v20 = vld [vmem:[%s6249_s22 + $0x40] sm:$0xff]  ;;  %v1099_v25 = vmul.f32 %v4742_v21, %v6237_v8  ;;  %s6966_s21 = scalar_lea.vmem %s7262_s13, %s4980_s30  ;;  %s7034_s30 = scalar_lea.vmem %s7263_s14, %s6933_s28 }
  0x19   : > { %v5695_v33 = vpack.c.bf16 %v832_v28, %v831_v27  ;;  %v5698_v36 = vpack.c.bf16 %v834_v34, %v833_v32  ;;  %v830_v46 = vadd.f32 %v822_v44, %v6338_v43  ;;  %v4745_v22 = vld [vmem:[%s6249_s22 + $0x60] sm:$0xff]  ;;  %v1098_v23 = vmul.f32 %v4741_v20, %v6232_v7  ;;  %v4743_v28 = vld [vmem:[%s6249_s22 + $0x50] sm:$0xff]  ;;  %v4748_v34 = vld [vmem:[%s6249_s22 + $0x78] sm:$0xff] }
  0x1a   : > { %v5701_v35 = vpack.c.bf16 %v828_v31, %v827_v30  ;;  %v1102_v27 = vmul.f32 %v4745_v22, %v6210_v3  ;;  %v1103_v30 = vmul.f32 %v4746_v26, %v6227_v6  ;;  %v1100_v31 = vmul.f32 %v4743_v28, %v6320_v37 }
  0x1b   : > { %5696 = vmatpush3.bf16.msra.mxu1 %v5695_v33  ;;  %v5704_v47 = vpack.c.bf16 %v830_v46, %v829_v45  ;;  %v1101_v32 = vmul.f32 %v4744_v29, %v6325_v38  ;;  %v4747_v33 = vld [vmem:[%s6249_s22 + $0x70] sm:$0xff]  ;;  %v1105_v46 = vmul.f32 %v4748_v34, %v6274_v13 }
  0x1c   : > { %5702 = vmatpush3.bf16.msra.mxu0 %v5701_v35  ;;  %5697 = vmatprep.subr.bf16.mxu1 %v6095_v1  ;;  %v1106_v35 = vadd.f32 %v1098_v23, %v6254_v9  ;;  %v1110_v39 = vadd.f32 %v1102_v27, %v6217_v4  ;;  %v1104_v40 = vmul.f32 %v4747_v33, %v6269_v12  ;;  %v4754_v27 = vld [vmem:[%s7277_s27 + $0x4] sm:$0x3] }
  0x1d   : > { %5703 = vmatprep.subr.bf16.mxu0 %v6095_v1  ;;  %v1111_v41 = vadd.f32 %v1103_v30, %v6222_v5  ;;  %v1108_v44 = vadd.f32 %v1100_v31, %v6333_v42  ;;  %v1109_v45 = vadd.f32 %v1101_v32, %v6338_v43  ;;  %v4757_v31 = vld [vmem:[%s6249_s22 + $0x80] sm:$0xff]  ;;  %v4758_v32 = vld [vmem:[%s6249_s22 + $0x88] sm:$0xff] }
  0x1e   : > { %v4761_v33 = vld [vmem:[%s6249_s22 + $0xa0] sm:$0xff]  ;;  %v1379_v34 = vmul.f32 %v4757_v31, %v6232_v7 }
  0x1f   : > { %5699 = vmatpush3.bf16.msra.mxu1 %v5698_v36  ;;  %v1107_v36 = vadd.f32 %v1099_v25, %v6259_v10 }
  0x20   : > { %5233 = vmatprep.subr.mxu1 %v6093_v0  ;;  %5705 = vmatpush3.bf16.msra.mxu0 %v5704_v47 }
  0x21   : > { %5706 = vmatprep.subr.bf16.mxu0 %v6095_v1  ;;  %v5713_v47 = vpack.c.bf16 %v1107_v36, %v1106_v35  ;;  %v1380_v35 = vmul.f32 %v4758_v32, %v6237_v8  ;;  %v4762_v36 = vld [vmem:[%s6249_s22 + $0xa8] sm:$0xff] }
  0x22   : > { %5220 = vmatmul.mubr.f32.vlgmr.msra.gmra.mrb[0].mxu1 %v6093_v0 }
  0x23   : > { %5234 = vmatpush3.msk.msra.mxu1 %vm737_vm1, %v6277_v14  ;;  %5235 = vmatprep.mubr.msk.f32.mxu1 %vm6094_vm0, %v6093_v0 }
  0x24   : > { %5712 = vmatprep.subr.bf16.mxu1 %v6095_v1 }
  0x26   : > { %5236 = vmatmul.mubr.msk.f32.vlgmr.msra.gmra.mrb[2].mxu1 %vm733_vm2, %v4738_v16 }
  0x27   : > { %5257 = vmatprep.mubr.msk.f32.mxu1 %vm6094_vm0, %v6093_v0  ;;  %5714 = vmatpush3.bf16.msra.mxu1 %v5713_v47  ;;  %v4764_v47 = vld [vmem:[%s6249_s22 + $0xb8] sm:$0xff] }
  0x28   : > { %5715 = vmatprep.subr.bf16.mxu1 %v6095_v1 }
  0xe8   : > { %v807_v49 = vpop.f32.mrb[0].mxu0 }
  0xe9   : > { %v808_v50 = vadd.f32 %v6351_v48, %v807_v49  ;;  %v5210_v51 = vpop.f32.mrb[1].mxu0  ;;  %v1112_v49 = vadd.f32 %v1104_v40, %v6264_v11  ;;  %v4759_v40 = vld [vmem:[%s6249_s22 + $0x90] sm:$0xff] }
  0xea   : > { %v1113_v51 = vadd.f32 %v1105_v46, %v6295_v24  ;;  %v4763_v46 = vld [vmem:[%s6249_s22 + $0xb0] sm:$0xff] }
  0xeb   : > { %5231 = vmatmul.mubr.msk.f32.vlgmr.msra.gmra.mrb[2].mxu0 %vm836_vm3, %v808_v50  ;;  %v5707_v50 = vpack.c.bf16 %v1111_v41, %v1110_v39  ;;  %v1383_v39 = vmul.f32 %v4761_v33, %v6210_v3  ;;  %v4760_v41 = vld [vmem:[%s6249_s22 + $0x98] sm:$0xff] }
  0xec   : > { %5246 = vmatprep.mubr.msk.f32.mxu0 %vm6094_vm0, %v6093_v0 }
  0xed   : > { %5708 = vmatpush3.bf16.msra.mxu0 %v5707_v50  ;;  %v1388_v50 = vadd.f32 %v1380_v35, %v6259_v10 }
  0xee   : > { %5709 = vmatprep.subr.bf16.mxu0 %v6095_v1 }
  0xf5   : > { %v906_v52 = vpop.f32.mrb[0].mxu1 }
  0xf6   : > { %v5221_v53 = vpop.f32.mrb[1].mxu1 }
  0xf7   : > { %v5710_v53 = vpack.c.bf16 %v1113_v51, %v1112_v49  ;;  %v1387_v49 = vadd.f32 %v1379_v34, %v6254_v9  ;;  %v1391_v51 = vadd.f32 %v1383_v39, %v6217_v4  ;;  %v4770_v39 = vld [vmem:[%s7277_s27 + $0x6] sm:$0x3] }
  0xf9   : > { %5711 = vmatpush3.bf16.msra.mxu0 %v5710_v53 }
  0xfa   : > { %5260 = vmatprep.subr.mxu0 %v6093_v0 }
 0x1be   : > { %v979_v55 = vpop.f32.mrb[2].mxu0 }
 0x1bf   : > { %v980_v56 = vadd.f32 %v979_v55, %v906_v52  ;;  %v5232_v57 = vpop.f32.mrb[3].mxu0  ;;  %v5716_v52 = vpack.c.bf16 %v1109_v45, %v1108_v44  ;;  %v1085_v55 = vpop.f32.mrb[2].mxu1  ;;  %v1381_v44 = vmul.f32 %v4759_v40, %v6320_v37  ;;  %v1382_v45 = vmul.f32 %v4760_v41, %v6325_v38 }
 0x1c0   : > { %v5237_v57 = vpop.f32.mrb[3].mxu1 }
 0x1c1   : > { %v989_v58 = vadd.f32 %v4736_v54, %v980_v56  ;;  %5717 = vmatpush3.bf16.msra.mxu1 %v5716_v52  ;;  %v1086_v56 = vadd.f32 %v6351_v48, %v1085_v55  ;;  %v1385_v52 = vmul.f32 %v4763_v46, %v6269_v12  ;;  %v1390_v55 = vadd.f32 %v1382_v45, %v6338_v43  ;;  %v4774_v45 = vld [vmem:[%s6249_s22 + $0xc8] sm:$0xff]  ;;  %v4777_v46 = vld [vmem:[%s6249_s22 + $0xe0] sm:$0xff] }
 0x1c2   : > { %5718 = vmatprep.subr.bf16.mxu1 %v6095_v1  ;;  %v5725_v57 = vpack.c.bf16 %v1388_v50, %v1387_v49  ;;  %v1661_v49 = vmul.f32 %v4774_v45, %v6237_v8  ;;  %v4778_v50 = vld [vmem:[%s6249_s22 + $0xe8] sm:$0xff] }
 0x1c3   : > { %5971 = vtanh.f32 %v989_v58  ;;  %v4737_v60 = vmul.f32 -1.442695, %v989_v58 }
 0x1c4   : > { %5258 = vmatmul.mubr.msk.f32.vlgmr.msra.gmra.mrb[4].mxu1 %vm836_vm3, %v1086_v56  ;;  %v1386_v56 = vmul.f32 %v4764_v47, %v6274_v13 }
 0x1c5   : > { %5973 = vpow2.f32 %v4737_v60  ;;  %5273 = vmatprep.mubr.msk.f32.mxu1 %vm6094_vm0, %v6093_v0 }
 0x1cd   : > { %v5972_v59 = vpop.eup %5971 }
 0x1ce   : > { %999 = vrot.lane.b32.xlu0 %v5972_v59, %s7272_s19 }
 0x1cf   : > { %v5974_v61 = vpop.eup %5973 }
 0x1d0   : > { %v993_v62 = vadd.f32 1.0, %v5974_v61 }
 0x1d2   : > { %5975 = vrcp.f32 %v993_v62 }
 0x1dc   : > { %v5976_v63 = vpop.eup %5975 }
 0x1dd   : > { %v997_v17 = vmul.f32 0.0, %v5976_v63 }
 0x240   : > { %v1000_v2 = vpop.permute.xlu0 %999 }
 0x241   : > { %v1002_v15 = vmul.f32 %v5976_v63, %v1000_v2  ;;  %v4752_v2 = vld [vmem:[%s6363_s18 + $0x1] ss:$0 sm:$0xff] }
 0x243   : > { %1004 = vrot.lane.b32.xlu0 %v1002_v15, %s7270_s20 }
 0x297   : > { %v1260_v61 = vpop.f32.mrb[4].mxu1 }
 0x298   : > { %v5259_v62 = vpop.f32.mrb[5].mxu1 }
 0x2b5   : > { %v1005_v18 = vpop.permute.xlu0 %1004 }
 0x2b6   : > { %v6374_v19 = vadd.f32 %v1005_v18, %v997_v17 }
 0x2b8   : > { %5977 = vtanh.f32 %v6374_v19 }
 0x2c2   : > { %v5978_v54 = vpop.eup %5977 }
 0x2c3   : > { %1010 = vrot.lane.b32.xlu1 %v5978_v54, %s7272_s19  ;;  %v1389_v54 = vadd.f32 %v1381_v44, %v6333_v42  ;;  %v4773_v44 = vld [vmem:[%s6249_s22 + $0xc0] sm:$0xff] }
 0x2c4   : > { %v1660_v47 = vmul.f32 %v4773_v44, %v6232_v7 }
 0x335   : > { %v1011_v58 = vpop.permute.xlu1 %1010 }
 0x336   : > { %v1013_v59 = vmul.f32 %v5976_v63, %v1011_v58  ;;  %v1393_v58 = vadd.f32 %v1385_v52, %v6264_v11  ;;  %v4775_v52 = vld [vmem:[%s6249_s22 + $0xd0] sm:$0xff] }
 0x338   : > { %1117 = vrot.lane.b32.xlu1 %v1013_v59, %s7270_s20 }
 0x3aa   : > { %v1118_v60 = vpop.permute.xlu1 %1117 }
 0x3ab   : > { %5247 = vmatmul.mubr.msk.f32.vlgmr.msra.gmra.mrb[4].mxu0 %vm836_vm3, %v1118_v60  ;;  %v1394_v60 = vadd.f32 %v1386_v56, %v6295_v24  ;;  %v4779_v56 = vld [vmem:[%s6249_s22 + $0xf0] sm:$0xff] }
 0x3ac   : > { %5261 = vmatpush3.msk.msra.mxu0 %vm737_vm1, %v6277_v14  ;;  %5262 = vmatprep.mubr.msk.f32.mxu0 %vm6094_vm0, %v6093_v0 }
 0x3ad   : > { %5724 = vmatprep.subr.bf16.mxu0 %v6095_v1  ;;  %v5722_v62 = vpack.c.bf16 %v1394_v60, %v1393_v58  ;;  %v1668_v58 = vadd.f32 %v1660_v47, %v6254_v9 }
 0x3af   : > { %5263 = vmatmul.mubr.msk.f32.vlgmr.msra.gmra.mrb[6].mxu0 %vm733_vm2, %v4754_v27 }
 0x3b0   : > { %5284 = vmatprep.mubr.msk.f32.mxu0 %vm6094_vm0, %v6093_v0  ;;  %5726 = vmatpush3.bf16.msra.mxu0 %v5725_v57  ;;  %v4780_v57 = vld [vmem:[%s6249_s22 + $0xf8] sm:$0xff] }
 0x3b1   : > { %5727 = vmatprep.subr.bf16.mxu0 %v6095_v1 }
 0x47e   : > { %v1187_v15 = vpop.f32.mrb[4].mxu0 }
 0x47f   : > { %v1261_v16 = vadd.f32 %v1260_v61, %v1187_v15  ;;  %v5248_v17 = vpop.f32.mrb[5].mxu0  ;;  %v5728_v61 = vpack.c.bf16 %v1390_v55, %v1389_v54  ;;  %v1662_v54 = vmul.f32 %v4775_v52, %v6320_v37 }
 0x481   : > { %v1270_v63 = vadd.f32 %v4752_v2, %v1261_v16  ;;  %5729 = vmatpush3.bf16.msra.mxu0 %v5728_v61  ;;  %v1666_v61 = vmul.f32 %v4779_v56, %v6269_v12  ;;  %v4793_v56 = vld [vmem:[%s6249_s22 + $0x120] sm:$0xff] }
 0x482   : > { %5730 = vmatprep.subr.bf16.mxu0 %v6095_v1  ;;  %v1366_v15 = vpop.f32.mrb[6].mxu0 }
 0x483   : > { %5979 = vtanh.f32 %v1270_v63  ;;  %v4753_v20 = vmul.f32 -1.442695, %v1270_v63  ;;  %v1367_v16 = vadd.f32 %v6351_v48, %v1366_v15  ;;  %v5264_v17 = vpop.f32.mrb[7].mxu0 }
 0x485   : > { %5981 = vpow2.f32 %v4753_v20  ;;  %5285 = vmatmul.mubr.msk.f32.vlgmr.msra.gmra.mrb[8].mxu0 %vm836_vm3, %v1367_v16  ;;  %v1667_v16 = vmul.f32 %v4780_v57, %v6274_v13 }
 0x486   : > { %5300 = vmatprep.mubr.msk.f32.mxu0 %vm6094_vm0, %v6093_v0 }
 0x48d   : > { %v5980_v18 = vpop.eup %5979 }
 0x48e   : > { %1280 = vrot.lane.b32.xlu0 %v5980_v18, %s7272_s19 }
 0x48f   : > { %v5982_v21 = vpop.eup %5981 }
 0x490   : > { %v1274_v22 = vadd.f32 1.0, %v5982_v21 }
 0x492   : > { %5983 = vrcp.f32 %v1274_v22 }
 0x49c   : > { %v5984_v23 = vpop.eup %5983 }
 0x49d   : > { %v1278_v28 = vmul.f32 %v5984_v23, %v6374_v19  ;;  %v1384_v19 = vmul.f32 %v4762_v36, %v6227_v6 }
 0x49f   : > { %v1392_v53 = vadd.f32 %v1384_v19, %v6222_v5 }
 0x4a1   : > { %v5719_v59 = vpack.c.bf16 %v1392_v53, %v1391_v51  ;;  %v1664_v51 = vmul.f32 %v4777_v46, %v6210_v3  ;;  %v4776_v53 = vld [vmem:[%s6249_s22 + $0xd8] sm:$0xff] }
 0x4a2   : > { %v1663_v55 = vmul.f32 %v4776_v53, %v6325_v38 }
 0x4a3   : > { %5720 = vmatpush3.bf16.msra.mxu1 %v5719_v59  ;;  %v1669_v59 = vadd.f32 %v1661_v49, %v6259_v10  ;;  %v1672_v60 = vadd.f32 %v1664_v51, %v6217_v4  ;;  %v4786_v51 = vld [vmem:[%s7277_s27 + $0x8] sm:$0x3] }
 0x4a4   : > { %5721 = vmatprep.subr.bf16.mxu1 %v6095_v1  ;;  %v1671_v15 = vadd.f32 %v1663_v55, %v6338_v43  ;;  %v4790_v55 = vld [vmem:[%s6249_s22 + $0x108] sm:$0xff] }
 0x4a5   : > { %v5737_v17 = vpack.c.bf16 %v1669_v59, %v1668_v58  ;;  %v1942_v58 = vmul.f32 %v4790_v55, %v6237_v8  ;;  %v4794_v59 = vld [vmem:[%s6249_s22 + $0x128] sm:$0xff] }
 0x4a7   : > { %5723 = vmatpush3.bf16.msra.mxu1 %v5722_v62 }
 0x4a8   : > { %5287 = vmatprep.subr.mxu1 %v6093_v0 }
 0x500   : > { %v1281_v25 = vpop.permute.xlu0 %1280 }
 0x501   : > { %v1283_v26 = vmul.f32 %v5984_v23, %v1281_v25  ;;  %v4768_v25 = vld [vmem:[%s6363_s18 + $0x2] ss:$0 sm:$0xff] }
 0x503   : > { %1285 = vrot.lane.b32.xlu1 %v1283_v26, %s7270_s20 }
 0x558   : > { %v1541_v21 = vpop.f32.mrb[8].mxu0 }
 0x559   : > { %v5286_v22 = vpop.f32.mrb[9].mxu0 }
 0x575   : > { %v1286_v29 = vpop.permute.xlu1 %1285 }
 0x576   : > { %v6427_v30 = vadd.f32 %v1286_v29, %v1278_v28 }
 0x578   : > { %5985 = vtanh.f32 %v6427_v30 }
 0x582   : > { %v5986_v2 = vpop.eup %5985 }
 0x583   : > { %1291 = vrot.lane.b32.xlu0 %v5986_v2, %s7272_s19  ;;  %v1670_v2 = vadd.f32 %v1662_v54, %v6333_v42  ;;  %v4789_v54 = vld [vmem:[%s6249_s22 + $0x100] sm:$0xff] }
 0x584   : > { %v1941_v57 = vmul.f32 %v4789_v54, %v6232_v7 }
 0x5f5   : > { %v1292_v63 = vpop.permute.xlu0 %1291 }
 0x5f6   : > { %v1294_v18 = vmul.f32 %v5984_v23, %v1292_v63  ;;  %v1674_v63 = vadd.f32 %v1666_v61, %v6264_v11  ;;  %v4791_v61 = vld [vmem:[%s6249_s22 + $0x110] sm:$0xff] }
 0x5f8   : > { %1398 = vrot.lane.b32.xlu1 %v1294_v18, %s7270_s20 }
 0x66a   : > { %v1399_v20 = vpop.permute.xlu1 %1398 }
 0x66b   : > { %5274 = vmatmul.mubr.msk.f32.vlgmr.msra.gmra.mrb[6].mxu1 %vm836_vm3, %v1399_v20  ;;  %v1675_v20 = vadd.f32 %v1667_v16, %v6295_v24  ;;  %v4795_v16 = vld [vmem:[%s6249_s22 + $0x130] sm:$0xff] }
 0x66c   : > { %5288 = vmatpush3.msk.msra.mxu1 %vm737_vm1, %v6277_v14  ;;  %5289 = vmatprep.mubr.msk.f32.mxu1 %vm6094_vm0, %v6093_v0 }
 0x66d   : > { %5736 = vmatprep.subr.bf16.mxu1 %v6095_v1  ;;  %v5734_v22 = vpack.c.bf16 %v1675_v20, %v1674_v63  ;;  %v1949_v63 = vadd.f32 %v1941_v57, %v6254_v9 }
 0x66f   : > { %5290 = vmatmul.mubr.msk.f32.vlgmr.msra.gmra.mrb[8].mxu1 %vm733_vm2, %v4770_v39 }
 0x670   : > { %5311 = vmatprep.mubr.msk.f32.mxu1 %vm6094_vm0, %v6093_v0  ;;  %5738 = vmatpush3.bf16.msra.mxu1 %v5737_v17  ;;  %v4796_v17 = vld [vmem:[%s6249_s22 + $0x138] sm:$0xff] }
 0x671   : > { %5739 = vmatprep.subr.bf16.mxu1 %v6095_v1 }
 0x73e   : > { %v1468_v26 = vpop.f32.mrb[6].mxu1 }
 0x73f   : > { %v1542_v27 = vadd.f32 %v1541_v21, %v1468_v26  ;;  %v5275_v28 = vpop.f32.mrb[7].mxu1  ;;  %v5740_v21 = vpack.c.bf16 %v1671_v15, %v1670_v2  ;;  %v1943_v2 = vmul.f32 %v4791_v61, %v6320_v37 }
 0x741   : > { %v1551_v23 = vadd.f32 %v4768_v25, %v1542_v27  ;;  %5741 = vmatpush3.bf16.msra.mxu1 %v5740_v21  ;;  %v1947_v21 = vmul.f32 %v4795_v16, %v6269_v12  ;;  %v4809_v16 = vld [vmem:[%s6249_s22 + $0x160] sm:$0xff] }
 0x742   : > { %5742 = vmatprep.subr.bf16.mxu1 %v6095_v1  ;;  %v1647_v26 = vpop.f32.mrb[8].mxu1 }
 0x743   : > { %5987 = vtanh.f32 %v1551_v23  ;;  %v4769_v31 = vmul.f32 -1.442695, %v1551_v23  ;;  %v1648_v27 = vadd.f32 %v6351_v48, %v1647_v26  ;;  %v5291_v28 = vpop.f32.mrb[9].mxu1 }
 0x745   : > { %5989 = vpow2.f32 %v4769_v31  ;;  %5312 = vmatmul.mubr.msk.f32.vlgmr.msra.gmra.mrb[10].mxu1 %vm836_vm3, %v1648_v27  ;;  %v1948_v27 = vmul.f32 %v4796_v17, %v6274_v13 }
 0x746   : > { %5327 = vmatprep.mubr.msk.f32.mxu1 %vm6094_vm0, %v6093_v0 }
 0x74d   : > { %v5988_v29 = vpop.eup %5987 }
 0x74e   : > { %1561 = vrot.lane.b32.xlu0 %v5988_v29, %s7272_s19 }
 0x74f   : > { %v5990_v32 = vpop.eup %5989 }
 0x750   : > { %v1555_v33 = vadd.f32 1.0, %v5990_v32 }
 0x752   : > { %5991 = vrcp.f32 %v1555_v33 }
 0x75c   : > { %v5992_v34 = vpop.eup %5991 }
 0x75d   : > { %v1559_v40 = vmul.f32 %v5992_v34, %v6427_v30  ;;  %v1665_v30 = vmul.f32 %v4778_v50, %v6227_v6 }
 0x75f   : > { %v1673_v62 = vadd.f32 %v1665_v30, %v6222_v5 }
 0x761   : > { %v5731_v18 = vpack.c.bf16 %v1673_v62, %v1672_v60  ;;  %v1945_v60 = vmul.f32 %v4793_v56, %v6210_v3  ;;  %v4792_v62 = vld [vmem:[%s6249_s22 + $0x118] sm:$0xff] }
 0x762   : > { %v1944_v15 = vmul.f32 %v4792_v62, %v6325_v38 }
 0x763   : > { %5732 = vmatpush3.bf16.msra.mxu0 %v5731_v18  ;;  %v1950_v18 = vadd.f32 %v1942_v58, %v6259_v10  ;;  %v1953_v20 = vadd.f32 %v1945_v60, %v6217_v4  ;;  %v4802_v60 = vld [vmem:[%s7277_s27 + $0xa] sm:$0x3] }
 0x764   : > { %5733 = vmatprep.subr.bf16.mxu0 %v6095_v1  ;;  %v1952_v26 = vadd.f32 %v1944_v15, %v6338_v43  ;;  %v4806_v15 = vld [vmem:[%s6249_s22 + $0x148] sm:$0xff] }
 0x765   : > { %v5749_v28 = vpack.c.bf16 %v1950_v18, %v1949_v63  ;;  %v2223_v63 = vmul.f32 %v4806_v15, %v6237_v8  ;;  %v4810_v18 = vld [vmem:[%s6249_s22 + $0x168] sm:$0xff] }
 0x767   : > { %5735 = vmatpush3.bf16.msra.mxu0 %v5734_v22 }
 0x768   : > { %5314 = vmatprep.subr.mxu0 %v6093_v0 }
 0x7c0   : > { %v1562_v35 = vpop.permute.xlu0 %1561 }
 0x7c1   : > { %v1564_v36 = vmul.f32 %v5992_v34, %v1562_v35  ;;  %v4784_v35 = vld [vmem:[%s6363_s18 + $0x3] ss:$0 sm:$0xff] }
 0x7c3   : > { %1566 = vrot.lane.b32.xlu1 %v1564_v36, %s7270_s20 }
 0x818   : > { %v1822_v32 = vpop.f32.mrb[10].mxu1 }
 0x819   : > { %v5313_v33 = vpop.f32.mrb[11].mxu1 }
 0x835   : > { %v1567_v41 = vpop.permute.xlu1 %1566 }
 0x836   : > { %v6480_v19 = vadd.f32 %v1567_v41, %v1559_v40 }
 0x838   : > { %5993 = vtanh.f32 %v6480_v19 }
 0x842   : > { %v5994_v25 = vpop.eup %5993 }
 0x843   : > { %1572 = vrot.lane.b32.xlu0 %v5994_v25, %s7272_s19  ;;  %v1951_v25 = vadd.f32 %v1943_v2, %v6333_v42  ;;  %v4805_v2 = vld [vmem:[%s6249_s22 + $0x140] sm:$0xff] }
 0x844   : > { %v2222_v17 = vmul.f32 %v4805_v2, %v6232_v7 }
 0x8b5   : > { %v1573_v23 = vpop.permute.xlu0 %1572 }
 0x8b6   : > { %v1575_v29 = vmul.f32 %v5992_v34, %v1573_v23  ;;  %v1955_v23 = vadd.f32 %v1947_v21, %v6264_v11  ;;  %v4807_v21 = vld [vmem:[%s6249_s22 + $0x150] sm:$0xff] }
 0x8b8   : > { %1679 = vrot.lane.b32.xlu1 %v1575_v29, %s7270_s20 }
 0x92a   : > { %v1680_v31 = vpop.permute.xlu1 %1679 }
 0x92b   : > { %5301 = vmatmul.mubr.msk.f32.vlgmr.msra.gmra.mrb[10].mxu0 %vm836_vm3, %v1680_v31  ;;  %v1956_v31 = vadd.f32 %v1948_v27, %v6295_v24  ;;  %v4811_v27 = vld [vmem:[%s6249_s22 + $0x170] sm:$0xff] }
 0x92c   : > { %5315 = vmatpush3.msk.msra.mxu0 %vm737_vm1, %v6277_v14  ;;  %5316 = vmatprep.mubr.msk.f32.mxu0 %vm6094_vm0, %v6093_v0 }
 0x92d   : > { %5748 = vmatprep.subr.bf16.mxu0 %v6095_v1  ;;  %v5746_v33 = vpack.c.bf16 %v1956_v31, %v1955_v23  ;;  %v2230_v23 = vadd.f32 %v2222_v17, %v6254_v9 }
 0x92f   : > { %5317 = vmatmul.mubr.msk.f32.vlgmr.msra.gmra.mrb[12].mxu0 %vm733_vm2, %v4786_v51 }
 0x930   : > { %5338 = vmatprep.mubr.msk.f32.mxu0 %vm6094_vm0, %v6093_v0  ;;  %5750 = vmatpush3.bf16.msra.mxu0 %v5749_v28  ;;  %v4812_v28 = vld [vmem:[%s6249_s22 + $0x178] sm:$0xff] }
 0x931   : > { %5751 = vmatprep.subr.bf16.mxu0 %v6095_v1 }
 0x9fe   : > { %v1749_v36 = vpop.f32.mrb[10].mxu0 }
 0x9ff   : > { %v1823_v39 = vadd.f32 %v1822_v32, %v1749_v36  ;;  %v5302_v40 = vpop.f32.mrb[11].mxu0  ;;  %v5752_v32 = vpack.c.bf16 %v1952_v26, %v1951_v25  ;;  %v2224_v25 = vmul.f32 %v4807_v21, %v6320_v37 }
 0xa01   : > { %v1832_v34 = vadd.f32 %v4784_v35, %v1823_v39  ;;  %5753 = vmatpush3.bf16.msra.mxu0 %v5752_v32  ;;  %v2228_v32 = vmul.f32 %v4811_v27, %v6269_v12 }
 0xa02   : > { %5754 = vmatprep.subr.bf16.mxu0 %v6095_v1  ;;  %v1928_v36 = vpop.f32.mrb[12].mxu0 }
 0xa03   : > { %5995 = vtanh.f32 %v1832_v34  ;;  %v4785_v44 = vmul.f32 -1.442695, %v1832_v34  ;;  %v1929_v39 = vadd.f32 %v6351_v48, %v1928_v36  ;;  %v5318_v40 = vpop.f32.mrb[13].mxu0 }
 0xa05   : > { %5997 = vpow2.f32 %v4785_v44  ;;  %5339 = vmatmul.mubr.msk.f32.vlgmr.msra.gmra.mrb[14].mxu0 %vm836_vm3, %v1929_v39  ;;  %v2229_v39 = vmul.f32 %v4812_v28, %v6274_v13 }
 0xa06   : > { %5354 = vmatprep.mubr.msk.f32.mxu0 %vm6094_vm0, %v6093_v0 }
 0xa0d   : > { %v5996_v41 = vpop.eup %5995 }
 0xa0e   : > { %1842 = vrot.lane.b32.xlu0 %v5996_v41, %s7272_s19 }
 0xa0f   : > { %v5998_v45 = vpop.eup %5997 }
 0xa10   : > { %v1836_v46 = vadd.f32 1.0, %v5998_v45 }
 0xa12   : > { %5999 = vrcp.f32 %v1836_v46 }
 0xa1c   : > { %v6000_v47 = vpop.eup %5999 }
 0xa1d   : > { %v1840_v52 = vmul.f32 %v6000_v47, %v6480_v19  ;;  %v1946_v19 = vmul.f32 %v4794_v59, %v6227_v6 }
 0xa1f   : > { %v1954_v22 = vadd.f32 %v1946_v19, %v6222_v5 }
 0xa21   : > { %v5743_v29 = vpack.c.bf16 %v1954_v22, %v1953_v20  ;;  %v2226_v20 = vmul.f32 %v4809_v16, %v6210_v3  ;;  %v4808_v22 = vld [vmem:[%s6249_s22 + $0x158] sm:$0xff] }
 0xa22   : > { %v2225_v26 = vmul.f32 %v4808_v22, %v6325_v38 }
 0xa23   : > { %5744 = vmatpush3.bf16.msra.mxu1 %v5743_v29  ;;  %v2231_v29 = vadd.f32 %v2223_v63, %v6259_v10  ;;  %v2234_v31 = vadd.f32 %v2226_v20, %v6217_v4 }
 0xa24   : > { %5745 = vmatprep.subr.bf16.mxu1 %v6095_v1  ;;  %v2233_v36 = vadd.f32 %v2225_v26, %v6338_v43  ;;  %v4825_v26 = vld [vmem:[%s6249_s22 + $0x1a0] sm:$0xff] }
 0xa25   : > { %v5761_v40 = vpack.c.bf16 %v2231_v29, %v2230_v23  ;;  %v4826_v23 = vld [vmem:[%s6249_s22 + $0x1a8] sm:$0xff]  ;;  %v2507_v29 = vmul.f32 %v4825_v26, %v6210_v3  ;;  %v4839_v26 = vld [vmem:[%s6249_s22 + $0x1d0] sm:$0xff] }
 0xa27   : > { %5747 = vmatpush3.bf16.msra.mxu1 %v5746_v33 }
 0xa28   : > { %5341 = vmatprep.subr.mxu1 %v6093_v0 }
 0xa80   : > { %v1843_v49 = vpop.permute.xlu0 %1842 }
 0xa81   : > { %v1845_v50 = vmul.f32 %v6000_v47, %v1843_v49  ;;  %v4800_v49 = vld [vmem:[%s6363_s18 + $0x4] ss:$0 sm:$0xff] }
 0xa83   : > { %1847 = vrot.lane.b32.xlu1 %v1845_v50, %s7270_s20 }
 0xad8   : > { %v2103_v45 = vpop.f32.mrb[14].mxu0 }
 0xad9   : > { %v5340_v46 = vpop.f32.mrb[15].mxu0 }
 0xaf5   : > { %v1848_v53 = vpop.permute.xlu1 %1847 }
 0xaf6   : > { %v6533_v30 = vadd.f32 %v1848_v53, %v1840_v52 }
 0xaf8   : > { %6001 = vtanh.f32 %v6533_v30 }
 0xb02   : > { %v6002_v35 = vpop.eup %6001 }
 0xb03   : > { %1853 = vrot.lane.b32.xlu0 %v6002_v35, %s7272_s19  ;;  %v2232_v35 = vadd.f32 %v2224_v25, %v6333_v42  ;;  %v4822_v25 = vld [vmem:[%s6249_s22 + $0x188] sm:$0xff] }
 0xb04   : > { %v2504_v28 = vmul.f32 %v4822_v25, %v6237_v8 }
 0xb75   : > { %v1854_v34 = vpop.permute.xlu0 %1853 }
 0xb76   : > { %v1856_v41 = vmul.f32 %v6000_v47, %v1854_v34  ;;  %v2236_v34 = vadd.f32 %v2228_v32, %v6264_v11  ;;  %v4824_v32 = vld [vmem:[%s6249_s22 + $0x198] sm:$0xff] }
 0xb78   : > { %1960 = vrot.lane.b32.xlu1 %v1856_v41, %s7270_s20 }
 0xbea   : > { %v1961_v44 = vpop.permute.xlu1 %1960 }
 0xbeb   : > { %5328 = vmatmul.mubr.msk.f32.vlgmr.msra.gmra.mrb[12].mxu1 %vm836_vm3, %v1961_v44  ;;  %v2237_v44 = vadd.f32 %v2229_v39, %v6295_v24  ;;  %v4828_v39 = vld [vmem:[%s6249_s22 + $0x1b8] sm:$0xff] }
 0xbec   : > { %5342 = vmatpush3.msk.msra.mxu1 %vm737_vm1, %v6277_v14  ;;  %5343 = vmatprep.mubr.msk.f32.mxu1 %vm6094_vm0, %v6093_v0 }
 0xbed   : > { %5760 = vmatprep.subr.bf16.mxu1 %v6095_v1  ;;  %v5758_v46 = vpack.c.bf16 %v2237_v44, %v2236_v34  ;;  %v2512_v34 = vadd.f32 %v2504_v28, %v6259_v10  ;;  %v6071_v28 = vld [vmem:[%s7253_s4 + $0x28] sm:$0xff] }
 0xbef   : > { %5344 = vmatmul.mubr.msk.f32.vlgmr.msra.gmra.mrb[14].mxu1 %vm733_vm2, %v4802_v60 }
 0xbf0   : > { %5365 = vmatprep.mubr.msk.f32.mxu1 %vm6094_vm0, %v6093_v0  ;;  %5762 = vmatpush3.bf16.msra.mxu1 %v5761_v40 }
 0xbf1   : > { %5763 = vmatprep.subr.bf16.mxu1 %v6095_v1 }
 0xcbe   : > { %v2030_v50 = vpop.f32.mrb[12].mxu1 }
 0xcbf   : > { %v2104_v51 = vadd.f32 %v2103_v45, %v2030_v50  ;;  %v5329_v52 = vpop.f32.mrb[13].mxu1  ;;  %v5764_v45 = vpack.c.bf16 %v2233_v36, %v2232_v35  ;;  %v2506_v35 = vmul.f32 %v4824_v32, %v6325_v38  ;;  %v4827_v36 = vld [vmem:[%s6249_s22 + $0x1b0] sm:$0xff]  ;;  %v6073_v32 = vld [vmem:[%s7253_s4 + $0x18] sm:$0xff] }
 0xcc0   : > { %v2509_v8 = vmul.f32 %v4827_v36, %v6269_v12  ;;  %v6074_v36 = vld [vmem:[%s7252_s3] sm:$0xff] }
 0xcc1   : > { %v2113_v47 = vadd.f32 %v4800_v49, %v2104_v51  ;;  %5765 = vmatpush3.bf16.msra.mxu1 %v5764_v45 }
 0xcc2   : > { %5766 = vmatprep.subr.bf16.mxu1 %v6095_v1  ;;  %v2209_v50 = vpop.f32.mrb[14].mxu1  ;;  %v2517_v38 = vadd.f32 %v2509_v8, %v6264_v11 }
 0xcc3   : > { %6003 = vtanh.f32 %v2113_v47  ;;  %v4801_v54 = vmul.f32 -1.442695, %v2113_v47  ;;  %v2210_v51 = vadd.f32 %v6351_v48, %v2209_v50  ;;  %v5345_v52 = vpop.f32.mrb[15].mxu1  ;;  %v4832_v50 = vld [vmem:[%s6363_s18 + $0x6] ss:$0 sm:$0xff] }
 0xcc5   : > { %6005 = vpow2.f32 %v4801_v54  ;;  %5366 = vmatmul.mubr.msk.f32.vlgmr.msra.gmra.mrb[16].mxu1 %vm836_vm3, %v2210_v51 }
 0xcc6   : > { %5381 = vmatprep.mubr.msk.f32.mxu1 %vm6094_vm0, %v6093_v0 }
 0xccd   : > { %v6004_v53 = vpop.eup %6003 }
 0xcce   : > { %2123 = vrot.lane.b32.xlu0 %v6004_v53, %s7272_s19 }
 0xccf   : > { %v6006_v55 = vpop.eup %6005 }
 0xcd0   : > { %v2117_v56 = vadd.f32 1.0, %v6006_v55 }
 0xcd2   : > { %6007 = vrcp.f32 %v2117_v56 }
 0xcdc   : > { %v6008_v57 = vpop.eup %6007 }
 0xcdd   : > { %v2121_v61 = vmul.f32 %v6008_v57, %v6533_v30  ;;  %v2227_v30 = vmul.f32 %v4810_v18, %v6227_v6  ;;  %v4818_v18 = vld [vmem:[%s7277_s27 + $0xc] sm:$0x3] }
 0xcdf   : > { %v2235_v33 = vadd.f32 %v2227_v30, %v6222_v5  ;;  %v4821_v30 = vld [vmem:[%s6249_s22 + $0x180] sm:$0xff] }
 0xce0   : > { %v2503_v27 = vmul.f32 %v4821_v30, %v6232_v7  ;;  %v2515_v7 = vadd.f32 %v2507_v29, %v6217_v4  ;;  %v6070_v30 = vld [vmem:[%s7253_s4 + $0x20] sm:$0xff]  ;;  %v6072_v29 = vld [vmem:[%s7253_s4 + $0x10] sm:$0xff] }
 0xce1   : > { %v5755_v41 = vpack.c.bf16 %v2235_v33, %v2234_v31  ;;  %v4823_v31 = vld [vmem:[%s6249_s22 + $0x190] sm:$0xff] }
 0xce2   : > { %v2505_v33 = vmul.f32 %v4823_v31, %v6320_v37  ;;  %v2511_v40 = vadd.f32 %v2503_v27, %v6254_v9  ;;  %v2510_v37 = vmul.f32 %v4828_v39, %v6274_v13  ;;  %v4840_v27 = vld [vmem:[%s6249_s22 + $0x1d8] sm:$0xff]  ;;  %v2786_v31 = vmul.f32 %v6072_v29, %v4839_v26 }
 0xce3   : > { %5756 = vmatpush3.bf16.msra.mxu0 %v5755_v41 }
 0xce4   : > { %5757 = vmatprep.subr.bf16.mxu0 %v6095_v1  ;;  %v2513_v41 = vadd.f32 %v2505_v33, %v6333_v42  ;;  %v5773_v44 = vpack.c.bf16 %v2512_v34, %v2511_v40  ;;  %v2518_v9 = vadd.f32 %v2510_v37, %v6295_v24  ;;  %v4843_v33 = vld [vmem:[%s6249_s22 + $0x1f0] sm:$0xff]  ;;  %v6075_v40 = vld [vmem:[%s7252_s3 + $0x8] sm:$0xff] }
 0xce6   : > { %v5770_v4 = vpack.c.bf16 %v2518_v9, %v2517_v38 }
 0xce7   : > { %5759 = vmatpush3.bf16.msra.mxu0 %v5758_v46  ;;  %v6067_v46 = vld [vmem:[%s6242_s1] sm:$0x3]  ;;  %s7280_s1 = smov 32  }
 0xce8   : > { %5368 = vmatprep.subr.mxu0 %v6093_v0 }
 0xd40   : > { %v2124_v58 = vpop.permute.xlu0 %2123 }
 0xd41   : > { %v2126_v59 = vmul.f32 %v6008_v57, %v2124_v58  ;;  %v4816_v58 = vld [vmem:[%s6363_s18 + $0x5] ss:$0 sm:$0xff] }
 0xd43   : > { %2128 = vrot.lane.b32.xlu1 %v2126_v59, %s7270_s20 }
 0xd98   : > { %v2384_v55 = vpop.f32.mrb[16].mxu1 }
 0xd99   : > { %v5367_v56 = vpop.f32.mrb[17].mxu1 }
 0xdb5   : > { %v2129_v62 = vpop.permute.xlu1 %2128 }
 0xdb6   : > { %v6586_v19 = vadd.f32 %v2129_v62, %v2121_v61 }
 0xdb8   : > { %6009 = vtanh.f32 %v6586_v19 }
 0xdc2   : > { %v6010_v49 = vpop.eup %6009 }
 0xdc3   : > { %2134 = vrot.lane.b32.xlu0 %v6010_v49, %s7272_s19 }
 0xe35   : > { %v2135_v47 = vpop.permute.xlu0 %2134 }
 0xe36   : > { %v2137_v53 = vmul.f32 %v6008_v57, %v2135_v47 }
 0xe38   : > { %2241 = vrot.lane.b32.xlu1 %v2137_v53, %s7270_s20 }
 0xeaa   : > { %v2242_v54 = vpop.permute.xlu1 %2241 }
 0xeab   : > { %5355 = vmatmul.mubr.msk.f32.vlgmr.msra.gmra.mrb[16].mxu0 %vm836_vm3, %v2242_v54 }
 0xeac   : > { %5369 = vmatpush3.msk.msra.mxu0 %vm737_vm1, %v6277_v14  ;;  %5370 = vmatprep.mubr.msk.f32.mxu0 %vm6094_vm0, %v6093_v0 }
 0xead   : > { %5772 = vmatprep.subr.bf16.mxu0 %v6095_v1 }
 0xeaf   : > { %5371 = vmatmul.mubr.msk.f32.vlgmr.msra.gmra.mrb[18].mxu0 %vm733_vm2, %v4818_v18 }
 0xeb0   : > { %5392 = vmatprep.mubr.msk.f32.mxu0 %vm6094_vm0, %v6093_v0  ;;  %5774 = vmatpush3.bf16.msra.mxu0 %v5773_v44  ;;  %v6079_v44 = vld [vmem:[%s7252_s3 + $0x10] sm:$0xff] }
 0xeb1   : > { %5775 = vmatprep.subr.bf16.mxu0 %v6095_v1  ;;  %v2794_v38 = vadd.f32 %v6079_v44, %v2786_v31 }
 0xf7e   : > { %v2311_v59 = vpop.f32.mrb[16].mxu0 }
 0xf7f   : > { %v2385_v60 = vadd.f32 %v2384_v55, %v2311_v59  ;;  %v5356_v61 = vpop.f32.mrb[17].mxu0 }
 0xf81   : > { %v2394_v57 = vadd.f32 %v4816_v58, %v2385_v60 }
 0xf82   : > { %v2490_v11 = vpop.f32.mrb[18].mxu0 }
 0xf83   : > { %6011 = vtanh.f32 %v2394_v57  ;;  %v4817_v2 = vmul.f32 -1.442695, %v2394_v57  ;;  %v2491_v12 = vadd.f32 %v6351_v48, %v2490_v11  ;;  %v5372_v13 = vpop.f32.mrb[19].mxu0  ;;  %v4834_v57 = vld [vmem:[%s7277_s27 + $0xe] sm:$0x3]  ;;  %v6082_v11 = vld [vmem:[%s7252_s3 + $0x30] sm:$0xff] }
 0xf85   : > { %6013 = vpow2.f32 %v4817_v2 }
 0xf8d   : > { %v6012_v62 = vpop.eup %6011 }
 0xf8e   : > { %2404 = vrot.lane.b32.xlu0 %v6012_v62, %s7272_s19 }
 0xf8f   : > { %v6014_v14 = vpop.eup %6013 }
 0xf90   : > { %v2398_v15 = vadd.f32 1.0, %v6014_v14 }
 0xf92   : > { %6015 = vrcp.f32 %v2398_v15  ;;  %v4837_v15 = vld [vmem:[%s6249_s22 + $0x1c0] sm:$0xff] }
 0xf9c   : > { %v6016_v16 = vpop.eup %6015 }
 0xf9d   : > { %v2402_v20 = vmul.f32 %v6016_v16, %v6586_v19  ;;  %v2508_v19 = vmul.f32 %v4826_v23, %v6227_v6  ;;  %v2514_v6 = vadd.f32 %v2506_v35, %v6338_v43  ;;  %v4844_v35 = vld [vmem:[%s6249_s22 + $0x1f8] sm:$0xff] }
 0xf9f   : > { %v2516_v3 = vadd.f32 %v2508_v19, %v6222_v5  ;;  %v5776_v10 = vpack.c.bf16 %v2514_v6, %v2513_v41  ;;  %v2787_v19 = vmul.f32 %v6073_v32, %v4840_v27  ;;  %v6078_v6 = vld [vmem:[%s7252_s3 + $0x28] sm:$0xff] }
 0xfa1   : > { %v5767_v45 = vpack.c.bf16 %v2516_v3, %v2515_v7  ;;  %5777 = vmatpush3.bf16.msra.mxu0 %v5776_v10  ;;  %v6076_v7 = vld [vmem:[%s7252_s3 + $0x20] sm:$0xff]  ;;  %v6077_v3 = vld [vmem:[%s7253_s4 + $0x30] sm:$0xff]  ;;  %v6081_v10 = vld [vmem:[%s7253_s4 + $0x38] sm:$0xff] }
 0xfa2   : > { %5778 = vmatprep.subr.bf16.mxu0 %v6095_v1  ;;  %v2790_v41 = vmul.f32 %v6077_v3, %v4843_v33 }
 0xfa3   : > { %5768 = vmatpush3.bf16.msra.mxu1 %v5767_v45  ;;  %v6080_v45 = vld [vmem:[%s7252_s3 + $0x18] sm:$0xff] }
 0xfa4   : > { %5769 = vmatprep.subr.bf16.mxu1 %v6095_v1  ;;  %5393 = vmatmul.mubr.msk.f32.vlgmr.msra.gmra.mrb[20].mxu0 %vm836_vm3, %v2491_v12  ;;  %v2795_v9 = vadd.f32 %v6080_v45, %v2787_v19  ;;  %v2798_v12 = vadd.f32 %v6082_v11, %v2790_v41  ;;  %v3101_v11 = vld [vmem:[%s6820_s23 + $0x28] sm:$0xff] }
 0xfa5   : > { %5408 = vmatprep.mubr.msk.f32.mxu0 %vm6094_vm0, %v6093_v0 }
 0xfa7   : > { %5771 = vmatpush3.bf16.msra.mxu1 %v5770_v4  ;;  %v2791_v4 = vmul.f32 %v6081_v10, %v4844_v35  ;;  %v6838_v10 = vld [vmem:[%s7259_s10 + $0x20] sm:$0xff] }
 0xfa8   : > { %5395 = vmatprep.subr.mxu1 %v6093_v0 }
0x1000   : > { %v2405_v17 = vpop.permute.xlu0 %2404 }
0x1001   : > { %v2407_v63 = vmul.f32 %v6016_v16, %v2405_v17  ;;  %v4841_v17 = vld [vmem:[%s6249_s22 + $0x1e0] sm:$0xff] }
0x1002   : > { %v2788_v25 = vmul.f32 %v6070_v30, %v4841_v17 }
0x1003   : > { %2409 = vrot.lane.b32.xlu1 %v2407_v63, %s7270_s20  ;;  %v6068_v63 = vld [vmem:[%s7253_s4] sm:$0xff] }
0x1004   : > { %v2784_v18 = vmul.f32 %v6068_v63, %v4837_v15  ;;  %v2796_v8 = vadd.f32 %v6076_v7, %v2788_v25 }
0x1006   : > { %v2792_v39 = vadd.f32 %v6074_v36, %v2784_v18 }
0x1075   : > { %v2410_v21 = vpop.permute.xlu1 %2409 }
0x1076   : > { %v6639_v22 = vadd.f32 %v2410_v21, %v2402_v20  ;;  %v6069_v20 = vld [vmem:[%s7253_s4 + $0x8] sm:$0xff] }
0x1077   : > { %v2665_v48 = vpop.f32.mrb[20].mxu0 }
0x1078   : > { %6017 = vtanh.f32 %v6639_v22  ;;  %v5394_v49 = vpop.f32.mrb[21].mxu0 }
0x1082   : > { %v6018_v5 = vpop.eup %6017 }
0x1083   : > { %2415 = vrot.lane.b32.xlu0 %v6018_v5, %s7272_s19 }
0x10f5   : > { %v2416_v24 = vpop.permute.xlu0 %2415 }
0x10f6   : > { %v2418_v42 = vmul.f32 %v6016_v16, %v2416_v24  ;;  %v4838_v16 = vld [vmem:[%s6249_s22 + $0x1c8] sm:$0xff]  ;;  %v6083_v24 = vld [vmem:[%s7252_s3 + $0x38] sm:$0xff] }
0x10f7   : > { %v2785_v21 = vmul.f32 %v6069_v20, %v4838_v16 }
0x10f8   : > { %2522 = vrot.lane.b32.xlu1 %v2418_v42, %s7270_s20  ;;  %v2799_v42 = vadd.f32 %v6083_v24, %v2791_v4  ;;  %v6843_v4 = vld [vmem:[%s7259_s10 + $0x28] sm:$0xff]  ;;  %v6852_v24 = vld [vmem:[%s7258_s9 + $0x30] sm:$0xff] }
0x10f9   : > { %v2793_v34 = vadd.f32 %v6075_v40, %v2785_v21 }
0x10fb   : > { %v5785_v5 = vpack.c.bf16 %v2793_v34, %v2792_v39 }
0x116a   : > { %v2523_v43 = vpop.permute.xlu1 %2522 }
0x116b   : > { %5382 = vmatmul.mubr.msk.f32.vlgmr.msra.gmra.mrb[18].mxu1 %vm836_vm3, %v2523_v43  ;;  %v5788_v43 = vpack.c.bf16 %v2795_v9, %v2794_v38  ;;  %v6828_v9 = vld [vmem:[%s7258_s9 + $0x20] sm:$0xff] }
0x116c   : > { %5396 = vmatpush3.msk.msra.mxu1 %vm737_vm1, %v6067_v46  ;;  %5397 = vmatprep.mubr.msk.f32.mxu1 %vm6094_vm0, %v6093_v0  ;;  %v5782_v46 = vpack.c.bf16 %v2799_v42, %v2798_v12  ;;  %v6857_v42 = vld [vmem:[%s7258_s9 + $0x38] sm:$0xff] }
0x116d   : > { %5784 = vmatprep.subr.bf16.mxu1 %v6095_v1 }
0x116f   : > { %5398 = vmatmul.mubr.msk.f32.vlgmr.msra.gmra.mrb[20].mxu1 %vm733_vm2, %v4834_v57 }
0x1170   : > { %5419 = vmatprep.mubr.msk.f32.mxu1 %vm6094_vm0, %v6093_v0  ;;  %5786 = vmatpush3.bf16.msra.mxu1 %v5785_v5  ;;  %v3100_v5 = vld [vmem:[%s6820_s23 + $0x20] sm:$0xff] }
0x1171   : > { %5787 = vmatprep.subr.bf16.mxu1 %v6095_v1  ;;  %v3108_v12 = vmul.f32 %v3100_v5, %v6838_v10 }
0x1174   : > { %5789 = vmatpush3.bf16.msra.mxu1 %v5788_v43  ;;  %v6862_v43 = vld [vmem:[%s7259_s10 + $0x30] sm:$0xff] }
0x1175   : > { %5814 = vmatprep.subr.bf16.mxu1 %v6095_v1 }
0x123e   : > { %v2592_v51 = vpop.f32.mrb[18].mxu1 }
0x123f   : > { %v2666_v52 = vadd.f32 %v2665_v48, %v2592_v51  ;;  %v5383_v47 = vpop.f32.mrb[19].mxu1 }
0x1241   : > { %v2675_v53 = vadd.f32 %v4832_v50, %v2666_v52  ;;  %v6084_v50 = vld [vmem:[%s6348_s0] ss:$0 sm:$0xff]  ;;  %s7281_s0 = sshll.u32 %s7285_s25, 9 }
0x1242   : > { %v2771_v49 = vpop.f32.mrb[20].mxu1  ;;  %s6776_s26 = scalar_lea.vmem %s7256_s7, %s7281_s0 }
0x1243   : > { %6019 = vtanh.f32 %v2675_v53  ;;  %v4833_v55 = vmul.f32 -1.442695, %v2675_v53  ;;  %v2772_v51 = vadd.f32 %v6084_v50, %v2771_v49  ;;  %v5399_v52 = vpop.f32.mrb[21].mxu1  ;;  %v3003_v17 = vld [vmem:[%s6776_s26] sm:$0xff]  ;;  %v3004_v63 = vld [vmem:[%s6776_s26 + $0x8] sm:$0xff]  ;;  %v3005_v18 = vld [vmem:[%s6776_s26 + $0x10] sm:$0xff]  ;;  %v3116_v50 = vadd.f32 %v3108_v12, %v6828_v9 }
0x1244   : > { %v5791_v20 = vpack.c.bf16 %v3004_v63, %v3003_v17  ;;  %v3006_v21 = vld [vmem:[%s6776_s26 + $0x18] sm:$0xff]  ;;  %v3007_v27 = vld [vmem:[%s6776_s26 + $0x20] sm:$0xff]  ;;  %v3009_v29 = vld [vmem:[%s6776_s26 + $0x30] sm:$0xff] }
0x1245   : > { %6021 = vpow2.f32 %v4833_v55  ;;  %5420 = vmatmul.mubr.msk.f32.vlgmr.msra.gmra.mrb[22].mxu1 %vm836_vm3, %v2772_v51  ;;  %v3010_v31 = vld [vmem:[%s6776_s26 + $0x38] sm:$0xff]  ;;  %v3011_v19 = vld [vmem:[%s6776_s26 + $0x40] sm:$0xff]  ;;  %v3012_v33 = vld [vmem:[%s6776_s26 + $0x48] sm:$0xff] }
0x1246   : > { %5465 = vmatprep.mubr.msk.f32.mxu1 %vm6094_vm0, %v6093_v0  ;;  %v5800_v32 = vpack.c.bf16 %v3010_v31, %v3009_v29  ;;  %v5803_v35 = vpack.c.bf16 %v3012_v33, %v3011_v19  ;;  %v3013_v36 = vld [vmem:[%s6776_s26 + $0x50] sm:$0xff]  ;;  %v3014_v39 = vld [vmem:[%s6776_s26 + $0x58] sm:$0xff]  ;;  %v3015_v34 = vld [vmem:[%s6776_s26 + $0x60] sm:$0xff] }
0x1247   : > { %v5806_v40 = vpack.c.bf16 %v3014_v39, %v3013_v36  ;;  %v3016_v7 = vld [vmem:[%s6776_s26 + $0x68] sm:$0xff]  ;;  %v3017_v3 = vld [vmem:[%s6776_s26 + $0x70] sm:$0xff]  ;;  %v3018_v41 = vld [vmem:[%s6776_s26 + $0x78] sm:$0xff] }
0x1248   : > { %v3103_v49 = vld [vmem:[%s6820_s23 + $0x38] sm:$0xff]  ;;  %v6897_v17 = vld [vmem:[%s7258_s9] sm:$0xff]  ;;  %v6902_v63 = vld [vmem:[%s7258_s9 + $0x8] sm:$0xff] }
0x1249   : > { %v6925_v29 = vld [vmem:[%s7258_s9 + $0x10] sm:$0xff]  ;;  %v6930_v31 = vld [vmem:[%s7258_s9 + $0x18] sm:$0xff] }
0x124d   : > { %v6020_v54 = vpop.eup %6019 }
0x124e   : > { %2685 = vrot.lane.b32.xlu0 %v6020_v54, %s7272_s19 }
0x124f   : > { %v6022_v56 = vpop.eup %6021 }
0x1250   : > { %v2679_v58 = vadd.f32 1.0, %v6022_v56 }
0x1252   : > { %6023 = vrcp.f32 %v2679_v58  ;;  %v4848_v58 = vld [vmem:[%s6363_s18 + $0x7] ss:$0 sm:$0xff]  ;;  %s7282_s18 = sshll.u32 %s7285_s25, 3  ;;  %s7283_s25 = smov 64  }
0x1253   : > { %s7042_s2 = scalar_lea.vmem %s7266_s17, %s7282_s18 }
0x125c   : > { %v6684_v59 = vpop.eup %6023 }
0x125d   : > { %v2683_v62 = vmul.f32 %v6684_v59, %v6639_v22  ;;  %v4842_v22 = vld [vmem:[%s6249_s22 + $0x1e8] sm:$0xff] }
0x125e   : > { %v2789_v23 = vmul.f32 %v6071_v28, %v4842_v22  ;;  %v5794_v22 = vpack.c.bf16 %v3006_v21, %v3005_v18  ;;  %v3008_v28 = vld [vmem:[%s6776_s26 + $0x28] sm:$0xff]  ;;  %v6909_v21 = vld [vmem:[%s7259_s10 + $0x10] sm:$0xff] }
0x1260   : > { %v2797_v37 = vadd.f32 %v6078_v6, %v2789_v23  ;;  %v5797_v23 = vpack.c.bf16 %v3008_v28, %v3007_v27  ;;  %v5812_v6 = vpack.c.bf16 %v3018_v41, %v3017_v3 }
0x1262   : > { %v5779_v13 = vpack.c.bf16 %v2797_v37, %v2796_v8  ;;  %v5809_v8 = vpack.c.bf16 %v3016_v7, %v3015_v34  ;;  %v6808_v37 = vld [vmem:[%s7264_s15] sm:$0x3] }
0x1264   : > { %5780 = vmatpush3.bf16.msra.mxu0 %v5779_v13  ;;  %v3109_v13 = vmul.f32 %v3101_v11, %v6843_v4 }
0x1265   : > { %5781 = vmatprep.subr.bf16.mxu0 %v6095_v1 }
0x1268   : > { %5783 = vmatpush3.bf16.msra.mxu0 %v5782_v46  ;;  %v6867_v46 = vld [vmem:[%s7259_s10 + $0x38] sm:$0xff] }
0x1269   : > { %5790 = vmatprep.subr.bf16.mxu0 %v6095_v1 }
0x12c0   : > { %v2686_v60 = vpop.permute.xlu0 %2685 }
0x12c1   : > { %v2688_v61 = vmul.f32 %v6684_v59, %v2686_v60 }
0x12c3   : > { %2690 = vrot.lane.b32.xlu1 %v2688_v61, %s7270_s20  ;;  %s6941_s20 = scalar_lea.vmem %s7257_s8, %s6933_s28 }
0x12c4   : > { %v4851_v36 = vld [vmem:[%s6941_s20] ss:$0 sm:$0xff] }
0x1318   : > { %v2946_v55 = vpop.f32.mrb[22].mxu1 }
0x1319   : > { %v5421_v56 = vpop.f32.mrb[23].mxu1 }
0x1335   : > { %v2691_v2 = vpop.permute.xlu1 %2690 }
0x1336   : > { %v6696_v14 = vadd.f32 %v2691_v2, %v2683_v62 }
0x1338   : > { %6025 = vtanh.f32 %v6696_v14 }
0x1342   : > { %v6026_v48 = vpop.eup %6025 }
0x1343   : > { %2696 = vrot.lane.b32.xlu0 %v6026_v48, %s7272_s19  ;;  %v3102_v48 = vld [vmem:[%s6820_s23 + $0x30] sm:$0xff] }
0x1344   : > { %v3110_v52 = vmul.f32 %v3102_v48, %v6862_v43 }
0x13b5   : > { %v2697_v47 = vpop.permute.xlu0 %2696 }
0x13b6   : > { %v2699_v53 = vmul.f32 %v6684_v59, %v2697_v47  ;;  %v3111_v47 = vmul.f32 %v3103_v49, %v6867_v46 }
0x13b8   : > { %2803 = vrot.lane.b32.xlu1 %v2699_v53, %s7280_s1 }
0x142a   : > { %v2804_v54 = vpop.permute.xlu1 %2803 }
0x142b   : > { %5409 = vmatmul.mubr.msk.f32.vlgmr.msra.gmra.mrb[22].mxu0 %vm836_vm3, %v2804_v54  ;;  %v3118_v54 = vadd.f32 %v3110_v52, %v6852_v24 }
0x142c   : > { %5454 = vmatprep.mubr.msk.f32.mxu0 %vm6094_vm0, %v6093_v0  ;;  %5792 = vmatpush3.bf16.msra.mxu0 %v5791_v20 }
0x142d   : > { %5793 = vmatprep.subr.bf16.mxu0 %v6095_v1 }
0x1430   : > { %5795 = vmatpush3.bf16.msra.mxu0 %v5794_v22  ;;  %v6914_v22 = vld [vmem:[%s7259_s10 + $0x18] sm:$0xff] }
0x1431   : > { %5796 = vmatprep.subr.bf16.mxu0 %v6095_v1 }
0x1434   : > { %5798 = vmatpush3.bf16.msra.mxu0 %v5797_v23 }
0x1435   : > { %5799 = vmatprep.subr.bf16.mxu0 %v6095_v1 }
0x1438   : > { %5801 = vmatpush3.bf16.msra.mxu0 %v5800_v32 }
0x1439   : > { %5802 = vmatprep.subr.bf16.mxu0 %v6095_v1 }
0x143c   : > { %5804 = vmatpush3.bf16.msra.mxu0 %v5803_v35 }
0x143d   : > { %5805 = vmatprep.subr.bf16.mxu0 %v6095_v1 }
0x1440   : > { %5807 = vmatpush3.bf16.msra.mxu0 %v5806_v40 }
0x1441   : > { %5808 = vmatprep.subr.bf16.mxu0 %v6095_v1 }
0x1444   : > { %5810 = vmatpush3.bf16.msra.mxu0 %v5809_v8  ;;  %v4854_v8 = vld [vmem:[%s6956_s16] ss:$0 sm:$0xff] }
0x1445   : > { %5811 = vmatprep.subr.bf16.mxu0 %v6095_v1 }
0x1448   : > { %5813 = vmatpush3.bf16.msra.mxu0 %v5812_v6 }
0x1449   : > { %5856 = vmatprep.subr.bf16.mxu0 %v6095_v1 }
0x144b   : > { %5455 = vmatmul.mubr.f32.vlgmr.msra.gmra.mrb[24].mxu0 %v6808_v37 }
0x144c   : > { %5533 = vmatprep.mubr.msk.f32.mxu0 %vm6094_vm0, %v6093_v0 }
0x14fe   : > { %v2873_v60 = vpop.f32.mrb[22].mxu0 }
0x14ff   : > { %v2947_v61 = vadd.f32 %v2946_v55, %v2873_v60  ;;  %v5410_v57 = vpop.f32.mrb[23].mxu0  ;;  %v3119_v55 = vadd.f32 %v3111_v47, %v6857_v42  ;;  %v3300_v47 = vld [vmem:[%s6966_s21] sm:$0xff] }
0x1501   : > { %v2956_v62 = vadd.f32 %v4848_v58, %v2947_v61  ;;  %v5818_v56 = vpack.c.bf16 %v3119_v55, %v3118_v54  ;;  %v4880_v54 = vld [vmem:[%s6820_s23 + $0x60] sm:$0xff] }
0x1503   : > { %6027 = vtanh.f32 %v2956_v62  ;;  %v4849_v59 = vmul.f32 -1.442695, %v2956_v62 }
0x1505   : > { %6029 = vpow2.f32 %v4849_v59  ;;  %v6890_v59 = vld [vmem:[%s7259_s10 + $0x8] sm:$0xff] }
0x150d   : > { %v6028_v2 = vpop.eup %6027 }
0x150e   : > { %2966 = vrot.lane.b32.xlu0 %v6028_v2, %s7272_s19  ;;  %v6885_v2 = vld [vmem:[%s7259_s10] sm:$0xff] }
0x150f   : > { %v6030_v15 = vpop.eup %6029 }
0x1510   : > { %v2960_v16 = vadd.f32 1.0, %v6030_v15  ;;  %v3096_v15 = vld [vmem:[%s6820_s23] sm:$0xff] }
0x1511   : > { %v3104_v18 = vmul.f32 %v3096_v15, %v6885_v2 }
0x1512   : > { %6031 = vrcp.f32 %v2960_v16  ;;  %v3097_v16 = vld [vmem:[%s6820_s23 + $0x8] sm:$0xff] }
0x1513   : > { %v3105_v20 = vmul.f32 %v3097_v16, %v6890_v59 }
0x1515   : > { %v3113_v27 = vadd.f32 %v3105_v20, %v6902_v63 }
0x151c   : > { %v6783_v30 = vpop.eup %6031 }
0x151d   : > { %v2964_v44 = vmul.f32 %v6783_v30, %v6696_v14  ;;  %v6833_v14 = vld [vmem:[%s7258_s9 + $0x28] sm:$0xff] }
0x151e   : > { %v3117_v51 = vadd.f32 %v3109_v13, %v6833_v14  ;;  %v3092_v60 = vpop.f32.mrb[24].mxu0 }
0x151f   : > { %v5456_v61 = vpop.f32.mrb[25].mxu0  ;;  %v3093_v40 = vadd.f32 %v4851_v36, %v3092_v60  ;;  %v3303_v60 = vld [vmem:[%s6966_s21 + $0x18] sm:$0xff] }
0x1520   : > { %v5815_v53 = vpack.c.bf16 %v3117_v51, %v3116_v50 }
0x1522   : > { %5816 = vmatpush3.bf16.msra.mxu1 %v5815_v53  ;;  %v3301_v53 = vld [vmem:[%s6966_s21 + $0x8] sm:$0xff] }
0x1523   : > { %5817 = vmatprep.subr.bf16.mxu1 %v6095_v1  ;;  %v5827_v55 = vpack.c.bf16 %v3301_v53, %v3300_v47  ;;  %v4872_v53 = vld [vmem:[%s6776_s26 + $0xf0] sm:$0xff] }
0x1526   : > { %5819 = vmatpush3.bf16.msra.mxu1 %v5818_v56  ;;  %v4881_v56 = vld [vmem:[%s6820_s23 + $0x68] sm:$0xff] }
0x1527   : > { %5820 = vmatprep.subr.bf16.mxu1 %v6095_v1  ;;  %v3498_v61 = vmul.f32 %v4881_v56, %v6843_v4  ;;  %v4876_v56 = vld [vmem:[%s6820_s23 + $0x40] sm:$0xff] }
0x1580   : > { %v2967_v25 = vpop.permute.xlu0 %2966 }
0x1581   : > { %v2969_v26 = vmul.f32 %v6783_v30, %v2967_v25  ;;  %v3099_v25 = vld [vmem:[%s6820_s23 + $0x18] sm:$0xff] }
0x1582   : > { %v3107_v23 = vmul.f32 %v3099_v25, %v6914_v22 }
0x1583   : > { %2971 = vrot.lane.b32.xlu1 %v2969_v26, %s7280_s1  ;;  %v3112_v26 = vadd.f32 %v3104_v18, %v6897_v17 }
0x1584   : > { %v3115_v33 = vadd.f32 %v3107_v23, %v6930_v31 }
0x1585   : > { %v5821_v32 = vpack.c.bf16 %v3113_v27, %v3112_v26 }
0x15f5   : > { %v2972_v38 = vpop.permute.xlu1 %2971 }
0x15f6   : > { %v6822_v45 = vadd.f32 %v2972_v38, %v2964_v44 }
0x15f8   : > { %6033 = vtanh.f32 %v6822_v45 }
0x1602   : > { %v6034_v58 = vpop.eup %6033 }
0x1603   : > { %2977 = vrot.lane.b32.xlu0 %v6034_v58, %s7272_s19  ;;  %v3302_v58 = vld [vmem:[%s6966_s21 + $0x10] sm:$0xff] }
0x1604   : > { %v5830_v16 = vpack.c.bf16 %v3303_v60, %v3302_v58  ;;  %v3493_v58 = vmul.f32 %v4876_v56, %v6885_v2  ;;  %v4890_v56 = vld [vmem:[%s6966_s21 + $0x28] sm:$0xff] }
0x1675   : > { %v2978_v57 = vpop.permute.xlu0 %2977 }
0x1676   : > { %v2980_v62 = vmul.f32 %v6783_v30, %v2978_v57  ;;  %v3098_v30 = vld [vmem:[%s6820_s23 + $0x10] sm:$0xff] }
0x1677   : > { %v3106_v28 = vmul.f32 %v3098_v30, %v6909_v21  ;;  %v4882_v57 = vld [vmem:[%s6820_s23 + $0x70] sm:$0xff]  ;;  %v3506_v30 = vadd.f32 %v3498_v61, %v6833_v14  ;;  %v3501_v61 = vadd.f32 %v3493_v58, %v6897_v17 }
0x1678   : > { %3122 = vrot.lane.b32.xlu1 %v2980_v62, %s7280_s1  ;;  %v4883_v62 = vld [vmem:[%s6820_s23 + $0x78] sm:$0xff]  ;;  %v3499_v18 = vmul.f32 %v4882_v57, %v6862_v43 }
0x1679   : > { %v3114_v19 = vadd.f32 %v3106_v28, %v6925_v29  ;;  %v3500_v20 = vmul.f32 %v4883_v62, %v6867_v46 }
0x167a   : > { %v3507_v25 = vadd.f32 %v3499_v18, %v6852_v24  ;;  %v4856_v18 = vld [vmem:[%s7034_s30] ss:$0 sm:$0xff] }
0x167b   : > { %v5824_v39 = vpack.c.bf16 %v3115_v33, %v3114_v19  ;;  %v3508_v26 = vadd.f32 %v3500_v20, %v6857_v42  ;;  %v4858_v33 = vld [vmem:[%s6776_s26 + $0x80] sm:$0xff] }
0x167d   : > { %v5860_v28 = vpack.c.bf16 %v3508_v26, %v3507_v25 }
0x16ea   : > { %v3123_v35 = vpop.permute.xlu1 %3122 }
0x16eb   : > { %5466 = vmatmul.mubr.msk.f32.vlgmr.msra.gmra.mrb[24].mxu1 %vm836_vm3, %v3123_v35  ;;  %v4859_v35 = vld [vmem:[%s6776_s26 + $0x88] sm:$0xff] }
0x16ec   : > { %5822 = vmatpush3.bf16.msra.mxu1 %v5821_v32  ;;  %5476 = vmatprep.mubr.msk.f32.mxu1 %vm6094_vm0, %v6093_v0  ;;  %v5833_v36 = vpack.c.bf16 %v4859_v35, %v4858_v33  ;;  %v4879_v33 = vld [vmem:[%s6820_s23 + $0x58] sm:$0xff] }
0x16ed   : > { %5823 = vmatprep.subr.bf16.mxu1 %v6095_v1 }
0x16f0   : > { %5825 = vmatpush3.bf16.msra.mxu1 %v5824_v39  ;;  %v4860_v39 = vld [vmem:[%s6776_s26 + $0x90] sm:$0xff] }
0x16f1   : > { %5826 = vmatprep.subr.bf16.mxu1 %v6095_v1 }
0x16f3   : > { %5477 = vmatmul.mubr.msk.f32.vlgmr.msra.gmra.mrb[26].mxu1 %vm836_vm3, %v3093_v40  ;;  %v4861_v40 = vld [vmem:[%s6776_s26 + $0x98] sm:$0xff] }
0x16f4   : > { %5487 = vmatprep.mubr.msk.f32.mxu1 %vm6094_vm0, %v6093_v0  ;;  %5828 = vmatpush3.bf16.msra.mxu1 %v5827_v55 }
0x16f5   : > { %5829 = vmatprep.subr.bf16.mxu1 %v6095_v1 }
0x16f8   : > { %5831 = vmatpush3.bf16.msra.mxu1 %v5830_v16 }
0x16f9   : > { %5832 = vmatprep.subr.bf16.mxu1 %v6095_v1 }
0x17be   : > { %v3192_v34 = vpop.f32.mrb[24].mxu1 }
0x17bf   : > { %v5467_v7 = vpop.f32.mrb[25].mxu1 }
0x17c0   : > { %v5836_v7 = vpack.c.bf16 %v4861_v40, %v4860_v39 }
0x17c6   : > { %v3265_v3 = vpop.f32.mrb[26].mxu1 }
0x17c7   : > { %v3266_v41 = vadd.f32 %v3265_v3, %v3192_v34  ;;  %v5478_v6 = vpop.f32.mrb[27].mxu1  ;;  %v4863_v3 = vld [vmem:[%s6776_s26 + $0xa8] sm:$0xff] }
0x17c8   : > { %v4864_v6 = vld [vmem:[%s6776_s26 + $0xb0] sm:$0xff] }
0x17c9   : > { %v3275_v44 = vadd.f32 %v4854_v8, %v3266_v41  ;;  %v4862_v8 = vld [vmem:[%s6776_s26 + $0xa0] sm:$0xff] }
0x17ca   : > { %v5839_v41 = vpack.c.bf16 %v4863_v3, %v4862_v8 }
0x17cb   : > { %6035 = vtanh.f32 %v3275_v44  ;;  %v4855_v5 = vmul.f32 -1.442695, %v3275_v44  ;;  %v4865_v44 = vld [vmem:[%s6776_s26 + $0xb8] sm:$0xff] }
0x17cd   : > { %6037 = vpow2.f32 %v4855_v5  ;;  %v4866_v5 = vld [vmem:[%s6776_s26 + $0xc0] sm:$0xff] }
0x17d5   : > { %v6036_v38 = vpop.eup %6035 }
0x17d6   : > { %3285 = vrot.lane.b32.xlu0 %v6036_v38, %s7272_s19  ;;  %v5842_v38 = vpack.c.bf16 %v4865_v44, %v4864_v6 }
0x17d7   : > { %v6038_v11 = vpop.eup %6037 }
0x17d8   : > { %v3279_v12 = vadd.f32 1.0, %v6038_v11  ;;  %v4867_v11 = vld [vmem:[%s6776_s26 + $0xc8] sm:$0xff] }
0x17da   : > { %6039 = vrcp.f32 %v3279_v12  ;;  %v5845_v12 = vpack.c.bf16 %v4867_v11, %v4866_v5 }
0x17e4   : > { %v6040_v13 = vpop.eup %6039 }
0x17e5   : > { %v3283_v50 = vmul.f32 %v6040_v13, %v6822_v45  ;;  %v3497_v45 = vmul.f32 %v4880_v54, %v6838_v10  ;;  %v4873_v54 = vld [vmem:[%s6776_s26 + $0xf8] sm:$0xff] }
0x17e6   : > { %v5854_v55 = vpack.c.bf16 %v4873_v54, %v4872_v53 }
0x17e7   : > { %v3505_v15 = vadd.f32 %v3497_v45, %v6828_v9  ;;  %v4877_v45 = vld [vmem:[%s6820_s23 + $0x48] sm:$0xff] }
0x17e8   : > { %v3494_v60 = vmul.f32 %v4877_v45, %v6890_v59  ;;  %v4919_v45 = vld [vmem:[%s6820_s23 + $0xa0] sm:$0xff] }
0x17e9   : > { %v5857_v27 = vpack.c.bf16 %v3506_v30, %v3505_v15  ;;  %v2997_v15 = vlaneseq }
0x17ea   : > { %v3502_v57 = vadd.f32 %v3494_v60, %v6902_v63  ;;  %v4920_v60 = vld [vmem:[%s6820_s23 + $0xa8] sm:$0xff] }
0x17eb   : > { %5858 = vmatpush3.bf16.msra.mxu0 %v5857_v27  ;;  %v2998_v16 = vand.u32 127, %v2997_v15  ;;  %v3886_v15 = vmul.f32 %v4920_v60, %v6843_v4 }
0x17ec   : > { %5859 = vmatprep.subr.bf16.mxu0 %v6095_v1  ;;  %v5863_v62 = vpack.c.bf16 %v3502_v57, %v3501_v61  ;;  %v3885_v61 = vmul.f32 %v4919_v45, %v6838_v10  ;;  %v4891_v57 = vld [vmem:[%s6966_s21 + $0x30] sm:$0xff] }
0x17ed   : > { %vm2999_vm4 = vcmp.lt.s32.totalorder %v2998_v16, 2  ;;  %v4921_v16 = vld [vmem:[%s6820_s23 + $0xb0] sm:$0xff] }
0x17ee   : > { %v4911_v45 = vld [vmem:[%s6776_s26 + $0x170] sm:$0xff] }
0x17ef   : > { %5861 = vmatpush3.bf16.msra.mxu0 %v5860_v28  ;;  %v7045_v28 = vsel %vm2999_vm4, 1.0, %v6093_v0 }
0x17f0   : > { %5862 = vmatprep.subr.bf16.mxu0 %v6095_v1 }
0x1848   : > { %v3286_v48 = vpop.permute.xlu0 %3285 }
0x1849   : > { %v3288_v49 = vmul.f32 %v6040_v13, %v3286_v48  ;;  %v4869_v48 = vld [vmem:[%s6776_s26 + $0xd8] sm:$0xff] }
0x184b   : > { %3290 = vrot.lane.b32.xlu1 %v3288_v49, %s7280_s1 }
0x18bd   : > { %v3291_v51 = vpop.permute.xlu1 %3290 }
0x18be   : > { %v6968_v52 = vadd.f32 %v3291_v51, %v3283_v50  ;;  %v4870_v50 = vld [vmem:[%s6776_s26 + $0xe0] sm:$0xff]  ;;  %v4871_v51 = vld [vmem:[%s6776_s26 + $0xe8] sm:$0xff] }
0x18bf   : > { %v5851_v47 = vpack.c.bf16 %v4871_v51, %v4870_v50 }
0x18c0   : > { %6041 = vtanh.f32 %v6968_v52 }
0x18ca   : > { %v6042_v23 = vpop.eup %6041 }
0x18cb   : > { %3296 = vrot.lane.b32.xlu0 %v6042_v23, %s7272_s19 }
0x193d   : > { %v3297_v32 = vpop.permute.xlu0 %3296 }
0x193e   : > { %v3299_v19 = vmul.f32 %v6040_v13, %v3297_v32  ;;  %v4868_v13 = vld [vmem:[%s6776_s26 + $0xd0] sm:$0xff] }
0x193f   : > { %v5848_v49 = vpack.c.bf16 %v4869_v48, %v4868_v13 }
0x1940   : > { %3312 = vrot.lane.b32.xlu1 %v3299_v19, %s7280_s1  ;;  %v4878_v19 = vld [vmem:[%s6820_s23 + $0x50] sm:$0xff] }
0x1941   : > { %v3495_v35 = vmul.f32 %v4878_v19, %v6909_v21 }
0x1943   : > { %v3503_v39 = vadd.f32 %v3495_v35, %v6925_v29 }
0x19b2   : > { %v3313_v34 = vpop.permute.xlu1 %3312 }
0x19b3   : > { %5488 = vmatmul.mubr.msk.f32.vlgmr.msra.gmra.mrb[28].mxu1 %vm836_vm3, %v3313_v34  ;;  %5534 = vmatmul.mubr.msk.f32.vlgmr.msra.gmra.mrb[26].mxu0 %vm836_vm3, %v3313_v34  ;;  %v4875_v34 = vld [vmem:[%s6941_s20 + $0x1] ss:$0 sm:$0xff] }
0x19b4   : > { %5834 = vmatpush3.bf16.msra.mxu1 %v5833_v36  ;;  %5522 = vmatprep.mubr.msk.f32.mxu1 %vm6094_vm0, %v6093_v0  ;;  %v3496_v36 = vmul.f32 %v4879_v33, %v6914_v22 }
0x19b5   : > { %5835 = vmatprep.subr.bf16.mxu1 %v6095_v1  ;;  %5544 = vmatprep.mubr.msk.f32.mxu0 %vm6094_vm0, %v6093_v0 }
0x19b6   : > { %5864 = vmatpush3.bf16.msra.mxu0 %v5863_v62  ;;  %v4892_v62 = vld [vmem:[%s6966_s21 + $0x38] sm:$0xff] }
0x19b7   : > { %5865 = vmatprep.subr.bf16.mxu0 %v6095_v1 }
0x19b8   : > { %5837 = vmatpush3.bf16.msra.mxu1 %v5836_v7 }
0x19b9   : > { %5838 = vmatprep.subr.bf16.mxu1 %v6095_v1 }
0x19bc   : > { %5840 = vmatpush3.bf16.msra.mxu1 %v5839_v41  ;;  %v4887_v41 = vld [vmem:[%s6956_s16 + $0x1] ss:$0 sm:$0xff] }
0x19bd   : > { %5841 = vmatprep.subr.bf16.mxu1 %v6095_v1 }
0x19c0   : > { %5843 = vmatpush3.bf16.msra.mxu1 %v5842_v38 }
0x19c1   : > { %5844 = vmatprep.subr.bf16.mxu1 %v6095_v1 }
0x19c4   : > { %5846 = vmatpush3.bf16.msra.mxu1 %v5845_v12 }
0x19c5   : > { %5847 = vmatprep.subr.bf16.mxu1 %v6095_v1 }
0x19c8   : > { %5849 = vmatpush3.bf16.msra.mxu1 %v5848_v49 }
0x19c9   : > { %5850 = vmatprep.subr.bf16.mxu1 %v6095_v1 }
0x19cc   : > { %5852 = vmatpush3.bf16.msra.mxu1 %v5851_v47 }
0x19cd   : > { %5853 = vmatprep.subr.bf16.mxu1 %v6095_v1 }
0x19d0   : > { %5855 = vmatpush3.bf16.msra.mxu1 %v5854_v55  ;;  %v4889_v55 = vld [vmem:[%s6966_s21 + $0x20] sm:$0xff] }
0x19d1   : > { %5898 = vmatprep.subr.bf16.mxu1 %v6095_v1  ;;  %v5869_v58 = vpack.c.bf16 %v4890_v56, %v4889_v55  ;;  %v4910_v55 = vld [vmem:[%s6776_s26 + $0x168] sm:$0xff] }
0x1a86   : > { %v3382_v20 = vpop.f32.mrb[28].mxu1  ;;  %v3577_v30 = vpop.f32.mrb[26].mxu0 }
0x1a87   : > { %v3383_v25 = vadd.f32 %v4856_v18, %v3382_v20  ;;  %v5489_v26 = vpop.f32.mrb[29].mxu1  ;;  %v5535_v27 = vpop.f32.mrb[27].mxu0  ;;  %v4922_v18 = vld [vmem:[%s6820_s23 + $0xb8] sm:$0xff]  ;;  %v5872_v20 = vpack.c.bf16 %v4892_v62, %v4891_v57  ;;  %v4916_v57 = vld [vmem:[%s6820_s23 + $0x88] sm:$0xff] }
0x1a88   : > { %v3894_v26 = vadd.f32 %v3886_v15, %v6833_v14  ;;  %v3882_v15 = vmul.f32 %v4916_v57, %v6890_v59  ;;  %v4959_v57 = vld [vmem:[%s6820_s23 + $0xe8] sm:$0xff] }
0x1a89   : > { %v3386_v23 = vadd.f32 %v3383_v25, %v6808_v37  ;;  %v3504_v37 = vadd.f32 %v3496_v36, %v6930_v31  ;;  %v3888_v25 = vmul.f32 %v4922_v18, %v6867_v46 }
0x1a8a   : > { %v3890_v18 = vadd.f32 %v3882_v15, %v6902_v63  ;;  %v4930_v15 = vld [vmem:[%s6966_s21 + $0x50] sm:$0xff] }
0x1a8b   : > { %3387 = vst [vmem:[%s7042_s2] sm:$0x3] %v3386_v23  ;;  %v7050_v32 = vmul.f32 %v7045_v28, %v3386_v23  ;;  %v5866_v40 = vpack.c.bf16 %v3504_v37, %v3503_v39  ;;  %v3896_v23 = vadd.f32 %v3888_v25, %v6857_v42  ;;  %v4897_v37 = vld [vmem:[%s6776_s26 + $0x100] sm:$0xff] }
0x1a8d   : > { %5523 = vmatmul.mubr.f32.vlgmr.msra.gmra.mrb[30].mxu1 %v7050_v32  ;;  %5867 = vmatpush3.bf16.msra.mxu0 %v5866_v40  ;;  %v4898_v40 = vld [vmem:[%s6776_s26 + $0x108] sm:$0xff] }
0x1a8e   : > { %5601 = vmatprep.mubr.msk.f32.mxu1 %vm6094_vm0, %v6093_v0  ;;  %5868 = vmatprep.subr.bf16.mxu0 %v6095_v1 }
0x1b60   : > { %v3480_v7 = vpop.f32.mrb[30].mxu1 }
0x1b61   : > { %v3481_v8 = vadd.f32 %v4875_v34, %v3480_v7  ;;  %v5524_v3 = vpop.f32.mrb[31].mxu1  ;;  %v5875_v34 = vpack.c.bf16 %v4898_v40, %v4897_v37  ;;  %v4899_v7 = vld [vmem:[%s6776_s26 + $0x110] sm:$0xff] }
0x1b63   : > { %5545 = vmatmul.mubr.msk.f32.vlgmr.msra.gmra.mrb[28].mxu0 %vm836_vm3, %v3481_v8  ;;  %v4900_v8 = vld [vmem:[%s6776_s26 + $0x118] sm:$0xff] }
0x1b64   : > { %5555 = vmatprep.mubr.msk.f32.mxu0 %vm6094_vm0, %v6093_v0  ;;  %5870 = vmatpush3.bf16.msra.mxu0 %v5869_v58  ;;  %v4912_v58 = vld [vmem:[%s6776_s26 + $0x178] sm:$0xff] }
0x1b65   : > { %5871 = vmatprep.subr.bf16.mxu0 %v6095_v1  ;;  %v5896_v60 = vpack.c.bf16 %v4912_v58, %v4911_v45  ;;  %v4928_v45 = vld [vmem:[%s6966_s21 + $0x40] sm:$0xff]  ;;  %v4929_v58 = vld [vmem:[%s6966_s21 + $0x48] sm:$0xff] }
0x1b68   : > { %5873 = vmatpush3.bf16.msra.mxu0 %v5872_v20  ;;  %v4894_v20 = vld [vmem:[%s7034_s30 + $0x1] ss:$0 sm:$0xff] }
0x1b69   : > { %5874 = vmatprep.subr.bf16.mxu0 %v6095_v1 }
0x1c36   : > { %v3650_v6 = vpop.f32.mrb[28].mxu0 }
0x1c37   : > { %v3651_v44 = vadd.f32 %v3650_v6, %v3577_v30  ;;  %v5546_v38 = vpop.f32.mrb[29].mxu0  ;;  %v3887_v30 = vmul.f32 %v4921_v16, %v6862_v43  ;;  %v4901_v6 = vld [vmem:[%s6776_s26 + $0x120] sm:$0xff] }
0x1c39   : > { %v3660_v5 = vadd.f32 %v4887_v41, %v3651_v44  ;;  %v3895_v27 = vadd.f32 %v3887_v30, %v6852_v24  ;;  %v5878_v41 = vpack.c.bf16 %v4900_v8, %v4899_v7  ;;  %v4902_v44 = vld [vmem:[%s6776_s26 + $0x128] sm:$0xff]  ;;  %v4914_v7 = vld [vmem:[%s6941_s20 + $0x2] ss:$0 sm:$0xff] }
0x1c3a   : > { %v5881_v38 = vpack.c.bf16 %v4902_v44, %v4901_v6  ;;  %v4926_v6 = vld [vmem:[%s6956_s16 + $0x2] ss:$0 sm:$0xff] }
0x1c3b   : > { %6043 = vtanh.f32 %v3660_v5  ;;  %v4888_v12 = vmul.f32 -1.442695, %v3660_v5  ;;  %v5902_v33 = vpack.c.bf16 %v3896_v23, %v3895_v27  ;;  %v4903_v5 = vld [vmem:[%s6776_s26 + $0x130] sm:$0xff] }
0x1c3d   : > { %6045 = vpow2.f32 %v4888_v12 }
0x1c45   : > { %v6044_v11 = vpop.eup %6043 }
0x1c46   : > { %3670 = vrot.lane.b32.xlu0 %v6044_v11, %s7283_s25  ;;  %v4904_v11 = vld [vmem:[%s6776_s26 + $0x138] sm:$0xff] }
0x1c47   : > { %v6046_v13 = vpop.eup %6045  ;;  %v5884_v12 = vpack.c.bf16 %v4904_v11, %v4903_v5 }
0x1c48   : > { %v3664_v48 = vadd.f32 1.0, %v6046_v13  ;;  %v4905_v13 = vld [vmem:[%s6776_s26 + $0x140] sm:$0xff] }
0x1c4a   : > { %6047 = vrcp.f32 %v3664_v48  ;;  %v4906_v48 = vld [vmem:[%s6776_s26 + $0x148] sm:$0xff] }
0x1c54   : > { %v6048_v49 = vpop.eup %6047 }
0x1c55   : > { %v3668_v47 = vmul.f32 %v6048_v49, %v6968_v52  ;;  %v3893_v52 = vadd.f32 %v3885_v61, %v6828_v9  ;;  %v4915_v61 = vld [vmem:[%s6820_s23 + $0x80] sm:$0xff] }
0x1c56   : > { %v3881_v62 = vmul.f32 %v4915_v61, %v6885_v2  ;;  %v5911_v61 = vpack.c.bf16 %v4929_v58, %v4928_v45 }
0x1c57   : > { %v5899_v19 = vpack.c.bf16 %v3894_v26, %v3893_v52 }
0x1c58   : > { %v3889_v16 = vadd.f32 %v3881_v62, %v6897_v17 }
0x1c59   : > { %5900 = vmatpush3.bf16.msra.mxu1 %v5899_v19 }
0x1c5a   : > { %5901 = vmatprep.subr.bf16.mxu1 %v6095_v1  ;;  %v5905_v52 = vpack.c.bf16 %v3890_v18, %v3889_v16  ;;  %v4931_v16 = vld [vmem:[%s6966_s21 + $0x58] sm:$0xff]  ;;  %v4274_v18 = vmul.f32 %v4959_v57, %v6843_v4  ;;  %v4933_v57 = vld [vmem:[%s7034_s30 + $0x2] ss:$0 sm:$0xff] }
0x1c5d   : > { %5903 = vmatpush3.bf16.msra.mxu1 %v5902_v33 }
0x1c5e   : > { %5904 = vmatprep.subr.bf16.mxu1 %v6095_v1 }
0x1cb8   : > { %v3671_v50 = vpop.permute.xlu0 %3670 }
0x1cb9   : > { %v3673_v51 = vmul.f32 %v6048_v49, %v3671_v50  ;;  %v4907_v50 = vld [vmem:[%s6776_s26 + $0x150] sm:$0xff] }
0x1cbb   : > { %3675 = vrot.lane.b32.xlu1 %v3673_v51, %s7280_s1  ;;  %v4908_v51 = vld [vmem:[%s6776_s26 + $0x158] sm:$0xff] }
0x1d2d   : > { %v3676_v53 = vpop.permute.xlu1 %3675 }
0x1d2e   : > { %v7070_v54 = vadd.f32 %v3676_v53, %v3668_v47  ;;  %v5890_v47 = vpack.c.bf16 %v4908_v51, %v4907_v50  ;;  %v4909_v53 = vld [vmem:[%s6776_s26 + $0x160] sm:$0xff] }
0x1d2f   : > { %v5893_v56 = vpack.c.bf16 %v4910_v55, %v4909_v53 }
0x1d30   : > { %6049 = vtanh.f32 %v7070_v54 }
0x1d3a   : > { %v6050_v35 = vpop.eup %6049 }
0x1d3b   : > { %3681 = vrot.lane.b32.xlu0 %v6050_v35, %s7283_s25  ;;  %v4917_v35 = vld [vmem:[%s6820_s23 + $0x90] sm:$0xff] }
0x1dad   : > { %v3682_v36 = vpop.permute.xlu0 %3681 }
0x1dae   : > { %v3684_v39 = vmul.f32 %v6048_v49, %v3682_v36  ;;  %v5887_v49 = vpack.c.bf16 %v4906_v48, %v4905_v13  ;;  %v4918_v36 = vld [vmem:[%s6820_s23 + $0x98] sm:$0xff] }
0x1daf   : > { %v3884_v37 = vmul.f32 %v4918_v36, %v6914_v22  ;;  %v4939_v36 = vld [vmem:[%s6776_s26 + $0x198] sm:$0xff] }
0x1db0   : > { %3699 = vrot.lane.b32.xlu1 %v3684_v39, %s7280_s1  ;;  %v3883_v39 = vmul.f32 %v4917_v35, %v6909_v21  ;;  %v4938_v35 = vld [vmem:[%s6776_s26 + $0x190] sm:$0xff] }
0x1db2   : > { %v3891_v40 = vadd.f32 %v3883_v39, %v6925_v29 }
0x1e22   : > { %v3700_v3 = vpop.permute.xlu1 %3699 }
0x1e23   : > { %5556 = vmatmul.mubr.msk.f32.vlgmr.msra.gmra.mrb[30].mxu0 %vm836_vm3, %v3700_v3  ;;  %5602 = vmatmul.mubr.msk.f32.vlgmr.msra.gmra.mrb[32].mxu1 %vm836_vm3, %v3700_v3 }
0x1e24   : > { %5876 = vmatpush3.bf16.msra.mxu0 %v5875_v34  ;;  %5590 = vmatprep.mubr.msk.f32.mxu0 %vm6094_vm0, %v6093_v0 }
0x1e25   : > { %5877 = vmatprep.subr.bf16.mxu0 %v6095_v1  ;;  %5612 = vmatprep.mubr.msk.f32.mxu1 %vm6094_vm0, %v6093_v0 }
0x1e26   : > { %5906 = vmatpush3.bf16.msra.mxu1 %v5905_v52  ;;  %v4960_v52 = vld [vmem:[%s6820_s23 + $0xf0] sm:$0xff] }
0x1e27   : > { %5907 = vmatprep.subr.bf16.mxu1 %v6095_v1 }
0x1e28   : > { %5879 = vmatpush3.bf16.msra.mxu0 %v5878_v41 }
0x1e29   : > { %5880 = vmatprep.subr.bf16.mxu0 %v6095_v1 }
0x1e2c   : > { %5882 = vmatpush3.bf16.msra.mxu0 %v5881_v38 }
0x1e2d   : > { %5883 = vmatprep.subr.bf16.mxu0 %v6095_v1 }
0x1e30   : > { %5885 = vmatpush3.bf16.msra.mxu0 %v5884_v12 }
0x1e31   : > { %5886 = vmatprep.subr.bf16.mxu0 %v6095_v1 }
0x1e34   : > { %5888 = vmatpush3.bf16.msra.mxu0 %v5887_v49 }
0x1e35   : > { %5889 = vmatprep.subr.bf16.mxu0 %v6095_v1 }
0x1e38   : > { %5891 = vmatpush3.bf16.msra.mxu0 %v5890_v47 }
0x1e39   : > { %5892 = vmatprep.subr.bf16.mxu0 %v6095_v1 }
0x1e3c   : > { %5894 = vmatpush3.bf16.msra.mxu0 %v5893_v56 }
0x1e3d   : > { %5895 = vmatprep.subr.bf16.mxu0 %v6095_v1 }
0x1e40   : > { %5897 = vmatpush3.bf16.msra.mxu0 %v5896_v60  ;;  %v4958_v60 = vld [vmem:[%s6820_s23 + $0xe0] sm:$0xff] }
0x1e41   : > { %5940 = vmatprep.subr.bf16.mxu0 %v6095_v1  ;;  %v4273_v62 = vmul.f32 %v4958_v60, %v6838_v10 }
0x1ef6   : > { %v3769_v30 = vpop.f32.mrb[30].mxu0  ;;  %v3965_v25 = vpop.f32.mrb[32].mxu1 }
0x1ef7   : > { %v3770_v26 = vadd.f32 %v4894_v20, %v3769_v30  ;;  %v5557_v27 = vpop.f32.mrb[31].mxu0  ;;  %v5603_v23 = vpop.f32.mrb[33].mxu1  ;;  %v4961_v20 = vld [vmem:[%s6820_s23 + $0xf8] sm:$0xff]  ;;  %v5914_v30 = vpack.c.bf16 %v4931_v16, %v4930_v15 }
0x1ef8   : > { %v4282_v27 = vadd.f32 %v4274_v18, %v6833_v14 }
0x1ef9   : > { %v3773_v19 = vadd.f32 %v3770_v26, %v7050_v32  ;;  %v3892_v32 = vadd.f32 %v3884_v37, %v6930_v31  ;;  %v4276_v26 = vmul.f32 %v4961_v20, %v6867_v46  ;;  %v4937_v46 = vld [vmem:[%s6776_s26 + $0x188] sm:$0xff]  ;;  %v5920_v37 = vpack.c.bf16 %v4939_v36, %v4938_v35  ;;  %v4967_v36 = vld [vmem:[%s6966_s21 + $0x60] sm:$0xff] }
0x1efb   : > { %4896 = vst [vmem:[%s7042_s2 + $0x2] sm:$0x3] %v3773_v19  ;;  %v7136_v33 = vmul.f32 %v7045_v28, %v3773_v19  ;;  %v5908_v34 = vpack.c.bf16 %v3892_v32, %v3891_v40  ;;  %v4284_v4 = vadd.f32 %v4276_v26, %v6857_v42  ;;  %v4936_v42 = vld [vmem:[%s6776_s26 + $0x180] sm:$0xff]  ;;  %v4941_v32 = vld [vmem:[%s6776_s26 + $0x1a8] sm:$0xff] }
0x1efc   : > { %v5917_v19 = vpack.c.bf16 %v4937_v46, %v4936_v42  ;;  %v4940_v40 = vld [vmem:[%s6776_s26 + $0x1a0] sm:$0xff] }
0x1efd   : > { %5591 = vmatmul.mubr.f32.vlgmr.msra.gmra.mrb[32].mxu0 %v7136_v33  ;;  %5909 = vmatpush3.bf16.msra.mxu1 %v5908_v34  ;;  %v5923_v34 = vpack.c.bf16 %v4941_v32, %v4940_v40  ;;  %v4970_v32 = vld [vmem:[%s6966_s21 + $0x78] sm:$0xff] }
0x1efe   : > { %5669 = vmatprep.mubr.msk.f32.mxu0 %vm6094_vm0, %v6093_v0  ;;  %5910 = vmatprep.subr.bf16.mxu1 %v6095_v1 }
0x1fd0   : > { %v3868_v8 = vpop.f32.mrb[32].mxu0 }
0x1fd1   : > { %v3869_v3 = vadd.f32 %v4914_v7, %v3868_v8  ;;  %v5592_v41 = vpop.f32.mrb[33].mxu0  ;;  %v4942_v7 = vld [vmem:[%s6776_s26 + $0x1b0] sm:$0xff]  ;;  %v4943_v8 = vld [vmem:[%s6776_s26 + $0x1b8] sm:$0xff] }
0x1fd2   : > { %v4944_v41 = vld [vmem:[%s6776_s26 + $0x1c0] sm:$0xff] }
0x1fd3   : > { %5613 = vmatmul.mubr.msk.f32.vlgmr.msra.gmra.mrb[34].mxu1 %vm836_vm3, %v3869_v3  ;;  %v5926_v3 = vpack.c.bf16 %v4943_v8, %v4942_v7 }
0x1fd4   : > { %5623 = vmatprep.mubr.msk.f32.mxu1 %vm6094_vm0, %v6093_v0  ;;  %5912 = vmatpush3.bf16.msra.mxu1 %v5911_v61 }
0x1fd5   : > { %5913 = vmatprep.subr.bf16.mxu1 %v6095_v1 }
0x1fd8   : > { %5915 = vmatpush3.bf16.msra.mxu1 %v5914_v30 }
0x1fd9   : > { %5916 = vmatprep.subr.bf16.mxu1 %v6095_v1 }
0x20a6   : > { %v4038_v44 = vpop.f32.mrb[34].mxu1 }
0x20a7   : > { %v4039_v38 = vadd.f32 %v4038_v44, %v3965_v25  ;;  %v5614_v5 = vpop.f32.mrb[35].mxu1  ;;  %v4275_v25 = vmul.f32 %v4960_v52, %v6862_v43 }
0x20a8   : > { %v4947_v5 = vld [vmem:[%s6776_s26 + $0x1d8] sm:$0xff] }
0x20a9   : > { %v4048_v11 = vadd.f32 %v4926_v6, %v4039_v38  ;;  %v4283_v10 = vadd.f32 %v4275_v25, %v6852_v24  ;;  %v4945_v6 = vld [vmem:[%s6776_s26 + $0x1c8] sm:$0xff]  ;;  %v4946_v38 = vld [vmem:[%s6776_s26 + $0x1d0] sm:$0xff] }
0x20aa   : > { %v5929_v44 = vpack.c.bf16 %v4945_v6, %v4944_v41  ;;  %v4972_v41 = vld [vmem:[%s7034_s30 + $0x3] ss:$0 sm:$0xff] }
0x20ab   : > { %6051 = vtanh.f32 %v4048_v11  ;;  %v4927_v13 = vmul.f32 -1.442695, %v4048_v11  ;;  %v5932_v11 = vpack.c.bf16 %v4947_v5, %v4946_v38 }
0x20ad   : > { %6053 = vpow2.f32 %v4927_v13  ;;  %v4949_v13 = vld [vmem:[%s6776_s26 + $0x1e8] sm:$0xff] }
0x20b5   : > { %v6052_v12 = vpop.eup %6051 }
0x20b6   : > { %4058 = vrot.lane.b32.xlu0 %v6052_v12, %s7283_s25  ;;  %v4948_v12 = vld [vmem:[%s6776_s26 + $0x1e0] sm:$0xff] }
0x20b7   : > { %v6054_v48 = vpop.eup %6053 }
0x20b8   : > { %v4052_v49 = vadd.f32 1.0, %v6054_v48  ;;  %v5935_v48 = vpack.c.bf16 %v4949_v13, %v4948_v12 }
0x20ba   : > { %6055 = vrcp.f32 %v4052_v49  ;;  %v4950_v49 = vld [vmem:[%s6776_s26 + $0x1f0] sm:$0xff] }
0x20c4   : > { %v6056_v50 = vpop.eup %6055 }
0x20c5   : > { %v4056_v53 = vmul.f32 %v6056_v50, %v7070_v54  ;;  %v4281_v54 = vadd.f32 %v4273_v62, %v6828_v9  ;;  %v5944_v9 = vpack.c.bf16 %v4284_v4, %v4283_v10 }
0x20c7   : > { %v5941_v23 = vpack.c.bf16 %v4282_v27, %v4281_v54 }
0x20c9   : > { %5942 = vmatpush3.bf16.msra.mxu0 %v5941_v23 }
0x20ca   : > { %5943 = vmatprep.subr.bf16.mxu0 %v6095_v1 }
0x20cd   : > { %5945 = vmatpush3.bf16.msra.mxu0 %v5944_v9 }
0x20ce   : > { %5946 = vmatprep.subr.bf16.mxu0 %v6095_v1 }
0x2128   : > { %v4059_v51 = vpop.permute.xlu0 %4058 }
0x2129   : > { %v4061_v47 = vmul.f32 %v6056_v50, %v4059_v51 }
0x212b   : > { %4063 = vrot.lane.b32.xlu1 %v4061_v47, %s7280_s1  ;;  %v4954_v47 = vld [vmem:[%s6820_s23 + $0xc0] sm:$0xff] }
0x219d   : > { %v4064_v55 = vpop.permute.xlu1 %4063 }
0x219e   : > { %v7156_v56 = vadd.f32 %v4064_v55, %v4056_v53  ;;  %v4955_v53 = vld [vmem:[%s6820_s23 + $0xc8] sm:$0xff]  ;;  %v4269_v55 = vmul.f32 %v4954_v47, %v6885_v2 }
0x219f   : > { %v4270_v45 = vmul.f32 %v4955_v53, %v6890_v59 }
0x21a0   : > { %6057 = vtanh.f32 %v7156_v56  ;;  %v4277_v58 = vadd.f32 %v4269_v55, %v6897_v17  ;;  %v4956_v17 = vld [vmem:[%s6820_s23 + $0xd0] sm:$0xff] }
0x21a1   : > { %v4278_v60 = vadd.f32 %v4270_v45, %v6902_v63  ;;  %v4957_v63 = vld [vmem:[%s6820_s23 + $0xd8] sm:$0xff]  ;;  %v4271_v20 = vmul.f32 %v4956_v17, %v6909_v21  ;;  %v4965_v21 = vld [vmem:[%s6956_s16 + $0x3] ss:$0 sm:$0xff] }
0x21a2   : > { %v4272_v54 = vmul.f32 %v4957_v63, %v6914_v22 }
0x21a3   : > { %v5947_v61 = vpack.c.bf16 %v4278_v60, %v4277_v58  ;;  %v4279_v30 = vadd.f32 %v4271_v20, %v6925_v29 }
0x21a4   : > { %v4280_v25 = vadd.f32 %v4272_v54, %v6930_v31 }
0x21a6   : > { %v5950_v26 = vpack.c.bf16 %v4280_v25, %v4279_v30 }
0x21aa   : > { %v6058_v43 = vpop.eup %6057 }
0x21ab   : > { %4069 = vrot.lane.b32.xlu0 %v6058_v43, %s7283_s25 }
0x221d   : > { %v4070_v14 = vpop.permute.xlu0 %4069 }
0x221e   : > { %v4072_v24 = vmul.f32 %v6056_v50, %v4070_v14  ;;  %v4951_v50 = vld [vmem:[%s6776_s26 + $0x1f8] sm:$0xff] }
0x221f   : > { %v5938_v51 = vpack.c.bf16 %v4951_v50, %v4950_v49 }
0x2220   : > { %4087 = vrot.lane.b32.xlu1 %v4072_v24, %s7280_s1 }
0x2292   : > { %v4088_v39 = vpop.permute.xlu1 %4087 }
0x2293   : > { %5624 = vmatmul.mubr.msk.f32.vlgmr.msra.gmra.mrb[36].mxu1 %vm836_vm3, %v4088_v39  ;;  %5670 = vmatmul.mubr.msk.f32.vlgmr.msra.gmra.mrb[34].mxu0 %vm836_vm3, %v4088_v39  ;;  %v4968_v39 = vld [vmem:[%s6966_s21 + $0x68] sm:$0xff] }
0x2294   : > { %5918 = vmatpush3.bf16.msra.mxu1 %v5917_v19  ;;  %5658 = vmatprep.mubr.msk.f32.mxu1 %vm6094_vm0, %v6093_v0  ;;  %v5953_v40 = vpack.c.bf16 %v4968_v39, %v4967_v36 }
0x2295   : > { %5919 = vmatprep.subr.bf16.mxu1 %v6095_v1  ;;  %5680 = vmatprep.mubr.msk.f32.mxu0 %vm6094_vm0, %v6093_v0 }
0x2296   : > { %5948 = vmatpush3.bf16.msra.mxu0 %v5947_v61 }
0x2297   : > { %5949 = vmatprep.subr.bf16.mxu0 %v6095_v1 }
0x2298   : > { %5921 = vmatpush3.bf16.msra.mxu1 %v5920_v37  ;;  %v4969_v37 = vld [vmem:[%s6966_s21 + $0x70] sm:$0xff] }
0x2299   : > { %5922 = vmatprep.subr.bf16.mxu1 %v6095_v1 }
0x229a   : > { %5951 = vmatpush3.bf16.msra.mxu0 %v5950_v26 }
0x229b   : > { %5952 = vmatprep.subr.bf16.mxu0 %v6095_v1 }
0x229c   : > { %5924 = vmatpush3.bf16.msra.mxu1 %v5923_v34  ;;  %v5956_v34 = vpack.c.bf16 %v4970_v32, %v4969_v37 }
0x229d   : > { %5925 = vmatprep.subr.bf16.mxu1 %v6095_v1 }
0x22a0   : > { %5927 = vmatpush3.bf16.msra.mxu1 %v5926_v3 }
0x22a1   : > { %5928 = vmatprep.subr.bf16.mxu1 %v6095_v1 }
0x22a4   : > { %5930 = vmatpush3.bf16.msra.mxu1 %v5929_v44 }
0x22a5   : > { %5931 = vmatprep.subr.bf16.mxu1 %v6095_v1 }
0x22a8   : > { %5933 = vmatpush3.bf16.msra.mxu1 %v5932_v11 }
0x22a9   : > { %5934 = vmatprep.subr.bf16.mxu1 %v6095_v1 }
0x22ac   : > { %5936 = vmatpush3.bf16.msra.mxu1 %v5935_v48 }
0x22ad   : > { %5937 = vmatprep.subr.bf16.mxu1 %v6095_v1 }
0x22b0   : > { %5939 = vmatpush3.bf16.msra.mxu1 %v5938_v51 }
0x2366   : > { %v4157_v62 = vpop.f32.mrb[36].mxu1  ;;  %v4353_v15 = vpop.f32.mrb[34].mxu0 }
0x2367   : > { %v4158_v16 = vadd.f32 %v4933_v57, %v4157_v62  ;;  %v5625_v18 = vpop.f32.mrb[37].mxu1  ;;  %v5671_v52 = vpop.f32.mrb[35].mxu0 }
0x2369   : > { %v4161_v2 = vadd.f32 %v4158_v16, %v7136_v33  ;;  %v4953_v33 = vld [vmem:[%s6941_s20 + $0x3] ss:$0 sm:$0xff] }
0x236b   : > { %4935 = vst [vmem:[%s7042_s2 + $0x4] sm:$0x3] %v4161_v2  ;;  %v4164_v59 = vmul.f32 %v7045_v28, %v4161_v2 }
0x236d   : > { %5659 = vmatmul.mubr.f32.vlgmr.msra.gmra.mrb[38].mxu1 %v4164_v59 }
0x2440   : > { %v4256_v27 = vpop.f32.mrb[38].mxu1 }
0x2441   : > { %v4257_v10 = vadd.f32 %v4953_v33, %v4256_v27  ;;  %v5660_v28 = vpop.f32.mrb[39].mxu1 }
0x2443   : > { %5681 = vmatmul.mubr.msk.f32.vlgmr.msra.gmra.mrb[36].mxu0 %vm836_vm3, %v4257_v10 }
0x2444   : > { %5691 = vmatprep.mubr.msk.f32.mxu0 %vm6094_vm0, %v6093_v0  ;;  %5954 = vmatpush3.bf16.msra.mxu0 %v5953_v40 }
0x2445   : > { %5955 = vmatprep.subr.bf16.mxu0 %v6095_v1 }
0x2448   : > { %5957 = vmatpush3.bf16.msra.mxu0 %v5956_v34 }
0x2516   : > { %v4426_v4 = vpop.f32.mrb[36].mxu0 }
0x2517   : > { %v4427_v22 = vadd.f32 %v4426_v4, %v4353_v15  ;;  %v5682_v23 = vpop.f32.mrb[37].mxu0 }
0x2519   : > { %v4436_v29 = vadd.f32 %v4965_v21, %v4427_v22 }
0x251b   : > { %6059 = vtanh.f32 %v4436_v29  ;;  %v4966_v9 = vmul.f32 -1.442695, %v4436_v29 }
0x251d   : > { %6061 = vpow2.f32 %v4966_v9 }
0x2525   : > { %v6060_v31 = vpop.eup %6059 }
0x2526   : > { %4446 = vrot.lane.b32.xlu0 %v6060_v31, %s7283_s25 }
0x2527   : > { %v6062_v43 = vpop.eup %6061 }
0x2528   : > { %v4440_v14 = vadd.f32 1.0, %v6062_v43 }
0x252a   : > { %6063 = vrcp.f32 %v4440_v14 }
0x2534   : > { %v6064_v24 = vpop.eup %6063 }
0x2535   : > { %v4444_v46 = vmul.f32 %v6064_v24, %v7156_v56 }
0x2598   : > { %v4447_v0 = vpop.permute.xlu0 %4446 }
0x2599   : > { %v4449_v42 = vmul.f32 %v6064_v24, %v4447_v0 }
0x259b   : > { %4451 = vrot.lane.b32.xlu1 %v4449_v42, %s7280_s1 }
0x260d   : > { %v4452_v19 = vpop.permute.xlu1 %4451 }
0x260e   : > { %v4454_v35 = vadd.f32 %v4452_v19, %v4444_v46 }
0x2610   : > { %6065 = vtanh.f32 %v4454_v35 }
0x261a   : > { %v6066_v7 = vpop.eup %6065 }
0x261b   : > { %4457 = vrot.lane.b32.xlu0 %v6066_v7, %s7283_s25 }
0x268d   : > { %v4458_v8 = vpop.permute.xlu0 %4457 }
0x268e   : > { %v4460_v56 = vmul.f32 %v6064_v24, %v4458_v8 }
0x2690   : > { %4475 = vrot.lane.b32.xlu1 %v4460_v56, %s7280_s1 }
0x2702   : > { %v4476_v3 = vpop.permute.xlu1 %4475 }
0x2703   : > { %5692 = vmatmul.mubr.msk.f32.vlgmr.msra.gmra.mrb[38].mxu0 %vm836_vm3, %v4476_v3 }
0x27d6   : > { %v4545_v6 = vpop.f32.mrb[38].mxu0 }
0x27d7   : > { %v4546_v44 = vadd.f32 %v4972_v41, %v4545_v6  ;;  %v5693_v38 = vpop.f32.mrb[39].mxu0 }
0x27d9   : > { %v4549_v5 = vadd.f32 %v4546_v44, %v4164_v59 }
0x27db   : > { %4974 = vst [vmem:[%s7042_s2 + $0x6] sm:$0x3] %v4549_v5 }
0x27dc PF: > { %s27_s24 = sadd.s32 1, %s6091_s24  }
0x27dd   : > { %p24_p4 = scmp.ge.s32.totalorder %s27_s24, 4  }
0x27df   :  { %26 = sbr.rel (!%p24_p4) target bundleno = 4 (0x4), region = 187 }

</bundles_post_ra>
